<compile_context>
chip_gen: v7x
topology: tpu7x:2x2x1
jax: 0.10.0
libtpu: 0.0.40
codegen_flags: <defaults>
</compile_context>

<pallas_src>
import functools
import math
import numpy as np
import jax
import jax.numpy as jnp
from jax.experimental import pallas as pl
from jax.experimental.pallas import tpu as pltpu

_BN_EPS = 1e-5     # nn.BatchNorm1d default eps
_L2_EPS2 = 1e-24   # (F.normalize default eps)**2


def _row_batchnorm(y):
    # GNN.forward creates fresh nn.BatchNorm1d modules (training mode, weight=1,
    # bias=0) every call on a batch of size 1, with channels = rows (nodes/edges)
    # and "length" = the feature dim -> per-row normalisation over the feature
    # dim with biased variance.
    mu = jnp.mean(y, axis=-1, keepdims=True)
    d = y - mu
    var = jnp.mean(d * d, axis=-1, keepdims=True)
    return d * jax.lax.rsqrt(var + _BN_EPS)


def _gnn_layer(x, edge4, w_abuv, w_e, mask_j, inv_n):
    """One GNN layer on G images at once.

    x      : (G, n, C) f32 node features
    edge4  : (G, n, n, C) f32 edge features (axis 1 = end node i, axis 2 = start j)
    w_abuv : (C, 4C) bf16 fused [A|B|U|V] right-multiply weights
    w_e    : (C, C)  bf16 edge projection
    mask_j : (G, 1, n, 1) f32 start-node validity mask
    inv_n  : (G, 1, 1) f32 1/num_anchors per image
    """
    f32 = jnp.float32
    bf16 = jnp.bfloat16
    G, n, c = x.shape

    # Fused A/B/U/V projection: one lane-dense (G*n, C) @ (C, 4C) MXU matmul.
    y = jnp.dot(x.reshape(G * n, c).astype(bf16), w_abuv,
                preferred_element_type=f32).reshape(G, n, 4 * c)
    vix = y[..., 0 * c:1 * c]        # A(x)  (end-node term)
    vjx = y[..., 1 * c:2 * c]        # B(x)  (start-node term)
    uix = y[..., 2 * c:3 * c]        # U(x)
    vvx = y[..., 3 * c:4 * c]        # V(x)

    # edge message: A(x)[end] + B(x)[start] + E(edge) via leading-dim broadcasts
    # (no incidence one-hot matmuls).
    e_proj = jnp.dot(edge4.reshape(G * n * n, c).astype(bf16), w_e,
                     preferred_element_type=f32).reshape(G, n, n, c)
    msg = e_proj + vix[:, :, None, :] + vjx[:, None, :, :]
    edge4 = edge4 + jnp.maximum(_row_batchnorm(msg), 0.0)

    # sigmoid then Softmax over the start-node axis j (torch Softmax(dim=2)),
    # masked to each image's valid nodes; denominator floored so zero-crop
    # (padded) images stay finite.  exp / reciprocal ride the EUP slot.
    sig = pl.reciprocal(1.0 + jnp.exp(-edge4), approx=True)
    ex = jnp.exp(sig) * mask_j                                   # (G, n, n, C)
    denom = jnp.maximum(jnp.sum(ex, axis=2, keepdims=True), 1e-12)
    attn = ex * pl.reciprocal(denom, approx=True)

    # node update: U(x) + (sum_j attn[i, j] * V(x)[j]) / num_anchors
    agg = jnp.sum(attn * vvx[:, None, :, :], axis=2)             # (G, n, C)
    x_new = uix + agg * inv_n
    x_new = jnp.maximum(x + _row_batchnorm(x_new), 0.0)          # act(res + bn)
    return x_new, edge4


def _head_kernel(crops_ref, img_ref, mask_ref, invn_ref, wproj_ref, wabuv_ref,
                 we_ref, sct_ref, out_ref):
    f32 = jnp.float32
    bf16 = jnp.bfloat16
    G, n, _, c = crops_ref.shape
    k_pad = out_ref.shape[-1]

    # Node features: mean over crop tokens (padded crop rows are zero).
    node = jnp.mean(crops_ref[...].astype(f32), axis=2)                 # (G, n, C)
    glob = jnp.mean(img_ref[...].astype(f32), axis=1, keepdims=True)    # (G, 1, C)

    mask_j = mask_ref[...][:, None, :, :]                               # (G, 1, n, 1)
    inv_n = invn_ref[...]                                               # (G, 1, 1)

    # TODO(synk): GEM edge extractor (self.edge_extractor) source is not part of
    # the provided module; stand-in edge features = linear projection of
    # (node_i + node_j + pooled global feature), with the reference's trailing
    # .mean(dim=-2) folded into the projection.
    pair = node[:, :, None, :] + node[:, None, :, :] + glob[:, None, :, :]
    edge4 = jnp.dot(pair.reshape(G * n * n, c).astype(bf16), wproj_ref[...],
                    preferred_element_type=f32).reshape(G, n, n, c)

    # 2-layer GNN (weights fused per layer: [A|B|U|V] and E).
    x = node
    x, edge4 = _gnn_layer(x, edge4, wabuv_ref[0], we_ref[0], mask_j, inv_n)
    x, edge4 = _gnn_layer(x, edge4, wabuv_ref[1], we_ref[1], mask_j, inv_n)

    # F.normalize(node_features, p=2, dim=-1) via a single rsqrt.
    x_n = x * jax.lax.rsqrt(
        jnp.maximum(jnp.sum(x * x, axis=-1, keepdims=True), _L2_EPS2))

    # cl = x_n @ sc_n.T  (relu + L2-normalized prototypes precomputed host-side,
    # padded to a lane-dense 128-wide class dim and pre-transposed to (C, K_pad)).
    cl = jnp.dot(x_n.reshape(G * n, c).astype(bf16), sct_ref[...],
                 preferred_element_type=f32)
    out_ref[...] = cl.reshape(G, n, k_pad)


@functools.partial(jax.jit, static_argnames=("B_pad", "n_pad", "imgs_per_step"))
def _head_batched(w_proj, w_abuv, w_e, sc_t, initial_features, cropped, idx, pos,
                  counts, *, B_pad, n_pad, imgs_per_step):
    """Scatter crops into a padded tensor and run ONE gridded pallas_call."""
    B, s_img, c = initial_features.shape
    s_crop = cropped.shape[-2]
    k_pad = sc_t.shape[1]
    G = imgs_per_step
    num_steps = B_pad // G

    if B_pad > B:
        initial_features = jnp.pad(initial_features,
                                   ((0, B_pad - B), (0, 0), (0, 0)))
        counts = jnp.pad(counts, (0, B_pad - B))

    crops_padded = jnp.zeros((B_pad, n_pad, s_crop, c), cropped.dtype)
    crops_padded = crops_padded.at[idx, pos].set(cropped)

    # Per-image validity mask over the start-node axis and 1/num_anchors.
    mask = (jnp.arange(n_pad, dtype=jnp.int32)[None, :]
            < counts[:, None]).astype(jnp.float32)[:, :, None]           # (B_pad, n, 1)
    inv_n = (1.0 / jnp.maximum(counts, 1).astype(jnp.float32))[:, None, None]

    grid_spec = pltpu.PrefetchScalarGridSpec(
        num_scalar_prefetch=0,
        grid=(num_steps,),
        in_specs=[
            pl.BlockSpec((G, n_pad, s_crop, c), lambda g: (g, 0, 0, 0)),
            pl.BlockSpec((G, s_img, c), lambda g: (g, 0, 0)),
            pl.BlockSpec((G, n_pad, 1), lambda g: (g, 0, 0)),
            pl.BlockSpec((G, 1, 1), lambda g: (g, 0, 0)),
            # Shared weights: constant index_map -> resident across the grid.
            pl.BlockSpec((c, c), lambda g: (0, 0)),
            pl.BlockSpec((2, c, 4 * c), lambda g: (0, 0, 0)),
            pl.BlockSpec((2, c, c), lambda g: (0, 0, 0)),
            pl.BlockSpec((c, k_pad), lambda g: (0, 0)),
        ],
        out_specs=pl.BlockSpec((G, n_pad, k_pad), lambda g: (g, 0, 0)),
    )
    return pl.pallas_call(
        _head_kernel,
        grid_spec=grid_spec,
        out_shape=jax.ShapeDtypeStruct((B_pad, n_pad, k_pad), jnp.float32),
        compiler_params=pltpu.CompilerParams(
            dimension_semantics=("parallel",),   # v7x: shard steps across both TCs
        ),
    )(crops_padded, initial_features, mask, inv_n, w_proj, w_abuv, w_e, sc_t)


def init_params(key, c, num_classes):
    k_gnn, k_sc, k_proj = jax.random.split(key, 3)
    scale = math.sqrt(2.0 / c)  # GNN.init_weights_linear(dim_in, gain=1)
    # Right-multiply weight matrices, order [A1,B1,E1,U1,V1, A2,B2,E2,U2,V2].
    w_gnn = scale * jax.random.normal(k_gnn, (10, c, c), jnp.float32)
    bound = math.sqrt(6.0 / (num_classes + c))  # xavier_uniform_ for self.sc
    sc = jax.random.uniform(k_sc, (num_classes, c), jnp.float32, -bound, bound)
    w_edge = scale * jax.random.normal(k_proj, (c, c), jnp.float32)
    return {"w_gnn": w_gnn, "sc": sc, "w_edge_proj": w_edge}


def pack_params(params):
    """Fuse per-layer A/B/U/V into (C, 4C); pre-normalize/pad/transpose sc; cast
    all matmul operands to bf16 (accumulation stays f32 in-kernel)."""
    w = params["w_gnn"]
    c = w.shape[-1]

    def layer_pack(layer):
        a, b, e, u, v = (w[5 * layer + k] for k in range(5))
        return jnp.concatenate([a, b, u, v], axis=1), e

    abuv1, e1 = layer_pack(0)
    abuv2, e2 = layer_pack(1)
    w_abuv = jnp.stack([abuv1, abuv2], axis=0).astype(jnp.bfloat16)   # (2, C, 4C)
    w_e = jnp.stack([e1, e2], axis=0).astype(jnp.bfloat16)            # (2, C, C)
    w_proj = params["w_edge_proj"].astype(jnp.bfloat16)               # (C, C)

    # sc = relu(self.sc); F.normalize(sc, dim=-1): image-independent -> once here.
    sc = jnp.maximum(params["sc"], 0.0)
    sc_n = sc * jax.lax.rsqrt(
        jnp.maximum(jnp.sum(sc * sc, axis=-1, keepdims=True), _L2_EPS2))
    k = int(sc_n.shape[0])
    k_pad = ((k + 127) // 128) * 128                                  # lane-dense out
    sc_t = jnp.zeros((c, k_pad), jnp.float32).at[:, :k].set(sc_n.T)
    return {"w_abuv": w_abuv, "w_e": w_e, "w_proj": w_proj,
            "sc_t": sc_t.astype(jnp.bfloat16), "num_classes": k}


def head_forward(packed, initial_features, cropped_features, image_indices, *,
                 n_pad=8, imgs_per_step=None):
    """Head.forward: returns a list of per-image (n_i, num_classes) logits."""
    B = int(initial_features.shape[0])
    idx = np.asarray(image_indices).astype(np.int32)
    counts = np.bincount(idx, minlength=B).astype(np.int32)           # (B,)
    if counts.size and int(counts.max()) > n_pad:
        raise ValueError(f"max crops per image {int(counts.max())} > n_pad={n_pad}; "
                         "raise the static n_pad")

    if imgs_per_step is None:
        imgs_per_step = max(1, B // 2)       # keep >= 2 grid steps when B >= 2
    num_steps = -(-B // imgs_per_step)
    B_pad = num_steps * imgs_per_step

    # Vectorized cumcount: position of each crop within its image (no Python loop).
    if idx.size:
        sorter = np.argsort(idx, kind="stable")
        sidx = idx[sorter]
        run = np.arange(idx.size)
        group_start = np.maximum.accumulate(
            np.where(np.r_[True, sidx[1:] != sidx[:-1]], run, 0))
        pos = np.empty(idx.size, dtype=np.int32)
        pos[sorter] = (run - group_start).astype(np.int32)
    else:
        pos = np.zeros(0, dtype=np.int32)

    out = _head_batched(
        packed["w_proj"], packed["w_abuv"], packed["w_e"], packed["sc_t"],
        initial_features, cropped_features,
        jnp.asarray(idx), jnp.asarray(pos), jnp.asarray(counts),
        B_pad=B_pad, n_pad=n_pad, imgs_per_step=imgs_per_step)

    k = packed["num_classes"]
    return [out[i, :int(counts[i]), :k] for i in range(B)]


if __name__ == "__main__":
    key = jax.random.PRNGKey(0)
    B, C, K = 4, 32, 4                 # images, in_channels, num_classes
    S_crop, S_img = 16, 16
    crops_per_image = [8, 6, 5, 7]     # ragged on purpose (exercises the masking)

    k1, k2, k3 = jax.random.split(key, 3)
    n_total = int(sum(crops_per_image))
    initial_features = jax.random.normal(k1, (B, S_img, C), jnp.float32)
    cropped_features = jax.random.normal(k2, (n_total, S_crop, C), jnp.float32)
    image_indices = jnp.asarray(np.repeat(np.arange(B), crops_per_image))

    params = init_params(k3, C, K)
    packed = pack_params(params)

    outs = head_forward(packed, initial_features, cropped_features, image_indices)
    for o in outs:
        jax.block_until_ready(o)
    assert len(outs) == B
    assert [o.shape for o in outs] == [(n, K) for n in crops_per_image]
    assert all(bool(jnp.all(jnp.isfinite(o))) for o in outs)
    print("KERNEL_OK")
</pallas_src>

<mosaic_0001>
module attributes {stable_mosaic.version = 11 : i64} {
  func.func @_head_kernel(%arg0: i32, %arg1: memref<2x8x16x32xf32, #tpu.memory_space<vmem>>, %arg2: memref<2x16x32xf32, #tpu.memory_space<vmem>>, %arg3: memref<2x8x1xf32, #tpu.memory_space<vmem>>, %arg4: memref<2x1x1xf32, #tpu.memory_space<vmem>>, %arg5: memref<32x32xbf16, #tpu.memory_space<vmem>>, %arg6: memref<2x32x128xbf16, #tpu.memory_space<vmem>>, %arg7: memref<2x32x32xbf16, #tpu.memory_space<vmem>>, %arg8: memref<32x128xbf16, #tpu.memory_space<vmem>>, %arg9: memref<2x8x128xf32, #tpu.memory_space<vmem>>) attributes {dimension_semantics = [#tpu.dimension_semantics<parallel>], iteration_bounds = array<i64: 2>, scalar_prefetch = 0 : i64, scratch_operands = 0 : i64, tpu.core_type = #tpu.core_type<tc>, window_params = [{transform_indices = @transform_0, window_bounds = array<i64: 2, 8, 16, 32>}, {transform_indices = @transform_1, window_bounds = array<i64: 2, 16, 32>}, {transform_indices = @transform_2, window_bounds = array<i64: 2, 8, 1>}, {transform_indices = @transform_3, window_bounds = array<i64: 2, 1, 1>}, {pipeline_mode = #tpu.pipeline_mode<synchronous>, transform_indices = @transform_4, window_bounds = array<i64: 32, 32>}, {pipeline_mode = #tpu.pipeline_mode<synchronous>, transform_indices = @transform_5, window_bounds = array<i64: 2, 32, 128>}, {pipeline_mode = #tpu.pipeline_mode<synchronous>, transform_indices = @transform_6, window_bounds = array<i64: 2, 32, 32>}, {pipeline_mode = #tpu.pipeline_mode<synchronous>, transform_indices = @transform_7, window_bounds = array<i64: 32, 128>}, {transform_indices = @transform_8, window_bounds = array<i64: 2, 8, 128>}]} {
    %c0 = arith.constant 0 : index
    %c0_0 = arith.constant 0 : index
    %c0_1 = arith.constant 0 : index
    %c0_2 = arith.constant 0 : index
    %0 = vector.load %arg1[%c0, %c0_0, %c0_1, %c0_2] : memref<2x8x16x32xf32, #tpu.memory_space<vmem>>, vector<2x8x16x32xf32>
    %cst = arith.constant dense<0.000000e+00> : vector<2x8x32xf32>
    %1 = vector.multi_reduction <add>, %0, %cst [2] : vector<2x8x16x32xf32> to vector<2x8x32xf32>
    %cst_3 = arith.constant 1.600000e+01 : f32
    %2 = vector.broadcast %cst_3 : f32 to vector<2x8x32xf32>
    %3 = arith.divf %1, %2 : vector<2x8x32xf32>
    %c0_4 = arith.constant 0 : index
    %c0_5 = arith.constant 0 : index
    %c0_6 = arith.constant 0 : index
    %4 = vector.load %arg2[%c0_4, %c0_5, %c0_6] : memref<2x16x32xf32, #tpu.memory_space<vmem>>, vector<2x16x32xf32>
    %cst_7 = arith.constant dense<0.000000e+00> : vector<2x32xf32>
    %5 = vector.multi_reduction <add>, %4, %cst_7 [1] : vector<2x16x32xf32> to vector<2x32xf32>
    %6 = vector.shape_cast %5 : vector<2x32xf32> to vector<2x1x32xf32>
    %cst_8 = arith.constant 1.600000e+01 : f32
    %7 = vector.broadcast %cst_8 : f32 to vector<2x1x32xf32>
    %8 = arith.divf %6, %7 : vector<2x1x32xf32>
    %c0_9 = arith.constant 0 : index
    %c0_10 = arith.constant 0 : index
    %c0_11 = arith.constant 0 : index
    %9 = vector.load %arg3[%c0_9, %c0_10, %c0_11] : memref<2x8x1xf32, #tpu.memory_space<vmem>>, vector<2x8x1xf32>
    %10 = vector.shape_cast %9 : vector<2x8x1xf32> to vector<2x1x8x1xf32>
    %c0_12 = arith.constant 0 : index
    %c0_13 = arith.constant 0 : index
    %c0_14 = arith.constant 0 : index
    %11 = vector.load %arg4[%c0_12, %c0_13, %c0_14] : memref<2x1x1xf32, #tpu.memory_space<vmem>>, vector<2x1x1xf32>
    %12 = vector.shape_cast %3 : vector<2x8x32xf32> to vector<2x8x1x32xf32>
    %13 = vector.shape_cast %3 : vector<2x8x32xf32> to vector<2x1x8x32xf32>
    %14 = vector.broadcast %12 : vector<2x8x1x32xf32> to vector<2x8x8x32xf32>
    %15 = vector.broadcast %13 : vector<2x1x8x32xf32> to vector<2x8x8x32xf32>
    %16 = arith.addf %14, %15 : vector<2x8x8x32xf32>
    %17 = vector.shape_cast %8 : vector<2x1x32xf32> to vector<2x1x1x32xf32>
    %18 = vector.broadcast %17 : vector<2x1x1x32xf32> to vector<2x8x8x32xf32>
    %19 = arith.addf %16, %18 : vector<2x8x8x32xf32>
    %20 = vector.shape_cast %19 : vector<2x8x8x32xf32> to vector<128x32xf32>
    %21 = arith.truncf %20 : vector<128x32xf32> to vector<128x32xbf16>
    %c0_15 = arith.constant 0 : index
    %c0_16 = arith.constant 0 : index
    %22 = vector.load %arg5[%c0_15, %c0_16] : memref<32x32xbf16, #tpu.memory_space<vmem>>, vector<32x32xbf16>
    %cst_17 = arith.constant dense<0.000000e+00> : vector<128x32xf32>
    %23 = tpu.matmul %21, %22, %cst_17 {dimension_numbers = #tpu.dot_dimension_numbers<[1], [0], [0], [1], [0, 0, 1, 1], [], []>} : vector<128x32xbf16>, vector<32x32xbf16>, vector<128x32xf32> -> vector<128x32xf32>
    %24 = vector.shape_cast %23 : vector<128x32xf32> to vector<2x8x8x32xf32>
    %c0_18 = arith.constant 0 : index
    %c0_19 = arith.constant 0 : index
    %c0_20 = arith.constant 0 : index
    %25 = vector.load %arg6[%c0_18, %c0_19, %c0_20] : memref<2x32x128xbf16, #tpu.memory_space<vmem>>, vector<1x32x128xbf16>
    %26 = vector.shape_cast %25 : vector<1x32x128xbf16> to vector<32x128xbf16>
    %c0_21 = arith.constant 0 : index
    %c0_22 = arith.constant 0 : index
    %c0_23 = arith.constant 0 : index
    %27 = vector.load %arg7[%c0_21, %c0_22, %c0_23] : memref<2x32x32xbf16, #tpu.memory_space<vmem>>, vector<1x32x32xbf16>
    %28 = vector.shape_cast %27 : vector<1x32x32xbf16> to vector<32x32xbf16>
    %29 = vector.shape_cast %3 : vector<2x8x32xf32> to vector<16x32xf32>
    %30 = arith.truncf %29 : vector<16x32xf32> to vector<16x32xbf16>
    %cst_24 = arith.constant dense<0.000000e+00> : vector<16x128xf32>
    %31 = tpu.matmul %30, %26, %cst_24 {dimension_numbers = #tpu.dot_dimension_numbers<[1], [0], [0], [1], [0, 0, 1, 1], [], []>} : vector<16x32xbf16>, vector<32x128xbf16>, vector<16x128xf32> -> vector<16x128xf32>
    %32 = vector.shape_cast %31 : vector<16x128xf32> to vector<2x8x128xf32>
    %33 = vector.extract_strided_slice %32 {offsets = [0, 0, 0], sizes = [2, 8, 32], strides = [1, 1, 1]} : vector<2x8x128xf32> to vector<2x8x32xf32>
    %34 = vector.extract_strided_slice %32 {offsets = [0, 0, 32], sizes = [2, 8, 32], strides = [1, 1, 1]} : vector<2x8x128xf32> to vector<2x8x32xf32>
    %35 = vector.extract_strided_slice %32 {offsets = [0, 0, 64], sizes = [2, 8, 32], strides = [1, 1, 1]} : vector<2x8x128xf32> to vector<2x8x32xf32>
    %36 = vector.extract_strided_slice %32 {offsets = [0, 0, 96], sizes = [2, 8, 32], strides = [1, 1, 1]} : vector<2x8x128xf32> to vector<2x8x32xf32>
    %37 = vector.shape_cast %24 : vector<2x8x8x32xf32> to vector<128x32xf32>
    %38 = arith.truncf %37 : vector<128x32xf32> to vector<128x32xbf16>
    %cst_25 = arith.constant dense<0.000000e+00> : vector<128x32xf32>
    %39 = tpu.matmul %38, %28, %cst_25 {dimension_numbers = #tpu.dot_dimension_numbers<[1], [0], [0], [1], [0, 0, 1, 1], [], []>} : vector<128x32xbf16>, vector<32x32xbf16>, vector<128x32xf32> -> vector<128x32xf32>
    %40 = vector.shape_cast %39 : vector<128x32xf32> to vector<2x8x8x32xf32>
    %41 = vector.shape_cast %33 : vector<2x8x32xf32> to vector<2x8x1x32xf32>
    %42 = vector.broadcast %41 : vector<2x8x1x32xf32> to vector<2x8x8x32xf32>
    %43 = arith.addf %40, %42 : vector<2x8x8x32xf32>
    %44 = vector.shape_cast %34 : vector<2x8x32xf32> to vector<2x1x8x32xf32>
    %45 = vector.broadcast %44 : vector<2x1x8x32xf32> to vector<2x8x8x32xf32>
    %46 = arith.addf %43, %45 : vector<2x8x8x32xf32>
    %cst_26 = arith.constant dense<0.000000e+00> : vector<2x8x8xf32>
    %47 = vector.multi_reduction <add>, %46, %cst_26 [3] : vector<2x8x8x32xf32> to vector<2x8x8xf32>
    %48 = vector.shape_cast %47 : vector<2x8x8xf32> to vector<2x8x8x1xf32>
    %cst_27 = arith.constant 3.200000e+01 : f32
    %49 = vector.broadcast %cst_27 : f32 to vector<2x8x8x1xf32>
    %50 = arith.divf %48, %49 : vector<2x8x8x1xf32>
    %51 = vector.broadcast %50 : vector<2x8x8x1xf32> to vector<2x8x8x32xf32>
    %52 = arith.subf %46, %51 : vector<2x8x8x32xf32>
    %53 = arith.mulf %52, %52 : vector<2x8x8x32xf32>
    %cst_28 = arith.constant dense<0.000000e+00> : vector<2x8x8xf32>
    %54 = vector.multi_reduction <add>, %53, %cst_28 [3] : vector<2x8x8x32xf32> to vector<2x8x8xf32>
    %55 = vector.shape_cast %54 : vector<2x8x8xf32> to vector<2x8x8x1xf32>
    %cst_29 = arith.constant 3.200000e+01 : f32
    %56 = vector.broadcast %cst_29 : f32 to vector<2x8x8x1xf32>
    %57 = arith.divf %55, %56 : vector<2x8x8x1xf32>
    %cst_30 = arith.constant 9.99999974E-6 : f32
    %58 = vector.broadcast %cst_30 : f32 to vector<2x8x8x1xf32>
    %59 = arith.addf %57, %58 : vector<2x8x8x1xf32>
    %60 = math.rsqrt %59 : vector<2x8x8x1xf32>
    %61 = vector.broadcast %60 : vector<2x8x8x1xf32> to vector<2x8x8x32xf32>
    %62 = arith.mulf %52, %61 : vector<2x8x8x32xf32>
    %cst_31 = arith.constant 0.000000e+00 : f32
    %63 = vector.broadcast %cst_31 : f32 to vector<2x8x8x32xf32>
    %64 = arith.maximumf %62, %63 : vector<2x8x8x32xf32>
    %65 = arith.addf %24, %64 : vector<2x8x8x32xf32>
    %cst_32 = arith.constant 0.000000e+00 : f32
    %66 = vector.broadcast %cst_32 : f32 to vector<2x8x8x32xf32>
    %67 = arith.subf %66, %65 : vector<2x8x8x32xf32>
    %68 = math.exp %67 : vector<2x8x8x32xf32>
    %cst_33 = arith.constant 1.000000e+00 : f32
    %69 = vector.broadcast %cst_33 : f32 to vector<2x8x8x32xf32>
    %70 = arith.addf %69, %68 : vector<2x8x8x32xf32>
    %71 = tpu.reciprocal %70 {approx = true} : vector<2x8x8x32xf32> -> vector<2x8x8x32xf32>
    %72 = math.exp %71 : vector<2x8x8x32xf32>
    %73 = vector.broadcast %10 : vector<2x1x8x1xf32> to vector<2x8x8x32xf32>
    %74 = arith.mulf %72, %73 : vector<2x8x8x32xf32>
    %cst_34 = arith.constant dense<0.000000e+00> : vector<2x8x32xf32>
    %75 = vector.multi_reduction <add>, %74, %cst_34 [2] : vector<2x8x8x32xf32> to vector<2x8x32xf32>
    %76 = vector.shape_cast %75 : vector<2x8x32xf32> to vector<2x8x1x32xf32>
    %cst_35 = arith.constant 9.99999996E-13 : f32
    %77 = vector.broadcast %cst_35 : f32 to vector<2x8x1x32xf32>
    %78 = arith.maximumf %76, %77 : vector<2x8x1x32xf32>
    %79 = tpu.reciprocal %78 {approx = true} : vector<2x8x1x32xf32> -> vector<2x8x1x32xf32>
    %80 = vector.broadcast %79 : vector<2x8x1x32xf32> to vector<2x8x8x32xf32>
    %81 = arith.mulf %74, %80 : vector<2x8x8x32xf32>
    %82 = vector.shape_cast %36 : vector<2x8x32xf32> to vector<2x1x8x32xf32>
    %83 = vector.broadcast %82 : vector<2x1x8x32xf32> to vector<2x8x8x32xf32>
    %84 = arith.mulf %81, %83 : vector<2x8x8x32xf32>
    %cst_36 = arith.constant dense<0.000000e+00> : vector<2x8x32xf32>
    %85 = vector.multi_reduction <add>, %84, %cst_36 [2] : vector<2x8x8x32xf32> to vector<2x8x32xf32>
    %86 = vector.broadcast %11 : vector<2x1x1xf32> to vector<2x8x32xf32>
    %87 = arith.mulf %85, %86 : vector<2x8x32xf32>
    %88 = arith.addf %35, %87 : vector<2x8x32xf32>
    %cst_37 = arith.constant dense<0.000000e+00> : vector<2x8xf32>
    %89 = vector.multi_reduction <add>, %88, %cst_37 [2] : vector<2x8x32xf32> to vector<2x8xf32>
    %90 = vector.shape_cast %89 : vector<2x8xf32> to vector<2x8x1xf32>
    %cst_38 = arith.constant 3.200000e+01 : f32
    %91 = vector.broadcast %cst_38 : f32 to vector<2x8x1xf32>
    %92 = arith.divf %90, %91 : vector<2x8x1xf32>
    %93 = vector.broadcast %92 : vector<2x8x1xf32> to vector<2x8x32xf32>
    %94 = arith.subf %88, %93 : vector<2x8x32xf32>
    %95 = arith.mulf %94, %94 : vector<2x8x32xf32>
    %cst_39 = arith.constant dense<0.000000e+00> : vector<2x8xf32>
    %96 = vector.multi_reduction <add>, %95, %cst_39 [2] : vector<2x8x32xf32> to vector<2x8xf32>
    %97 = vector.shape_cast %96 : vector<2x8xf32> to vector<2x8x1xf32>
    %cst_40 = arith.constant 3.200000e+01 : f32
    %98 = vector.broadcast %cst_40 : f32 to vector<2x8x1xf32>
    %99 = arith.divf %97, %98 : vector<2x8x1xf32>
    %cst_41 = arith.constant 9.99999974E-6 : f32
    %100 = vector.broadcast %cst_41 : f32 to vector<2x8x1xf32>
    %101 = arith.addf %99, %100 : vector<2x8x1xf32>
    %102 = math.rsqrt %101 : vector<2x8x1xf32>
    %103 = vector.broadcast %102 : vector<2x8x1xf32> to vector<2x8x32xf32>
    %104 = arith.mulf %94, %103 : vector<2x8x32xf32>
    %105 = arith.addf %3, %104 : vector<2x8x32xf32>
    %cst_42 = arith.constant 0.000000e+00 : f32
    %106 = vector.broadcast %cst_42 : f32 to vector<2x8x32xf32>
    %107 = arith.maximumf %105, %106 : vector<2x8x32xf32>
    %c1 = arith.constant 1 : index
    %c0_43 = arith.constant 0 : index
    %c0_44 = arith.constant 0 : index
    %108 = vector.load %arg6[%c1, %c0_43, %c0_44] : memref<2x32x128xbf16, #tpu.memory_space<vmem>>, vector<1x32x128xbf16>
    %109 = vector.shape_cast %108 : vector<1x32x128xbf16> to vector<32x128xbf16>
    %c1_45 = arith.constant 1 : index
    %c0_46 = arith.constant 0 : index
    %c0_47 = arith.constant 0 : index
    %110 = vector.load %arg7[%c1_45, %c0_46, %c0_47] : memref<2x32x32xbf16, #tpu.memory_space<vmem>>, vector<1x32x32xbf16>
    %111 = vector.shape_cast %110 : vector<1x32x32xbf16> to vector<32x32xbf16>
    %112 = vector.shape_cast %107 : vector<2x8x32xf32> to vector<16x32xf32>
    %113 = arith.truncf %112 : vector<16x32xf32> to vector<16x32xbf16>
    %cst_48 = arith.constant dense<0.000000e+00> : vector<16x128xf32>
    %114 = tpu.matmul %113, %109, %cst_48 {dimension_numbers = #tpu.dot_dimension_numbers<[1], [0], [0], [1], [0, 0, 1, 1], [], []>} : vector<16x32xbf16>, vector<32x128xbf16>, vector<16x128xf32> -> vector<16x128xf32>
    %115 = vector.shape_cast %114 : vector<16x128xf32> to vector<2x8x128xf32>
    %116 = vector.extract_strided_slice %115 {offsets = [0, 0, 0], sizes = [2, 8, 32], strides = [1, 1, 1]} : vector<2x8x128xf32> to vector<2x8x32xf32>
    %117 = vector.extract_strided_slice %115 {offsets = [0, 0, 32], sizes = [2, 8, 32], strides = [1, 1, 1]} : vector<2x8x128xf32> to vector<2x8x32xf32>
    %118 = vector.extract_strided_slice %115 {offsets = [0, 0, 64], sizes = [2, 8, 32], strides = [1, 1, 1]} : vector<2x8x128xf32> to vector<2x8x32xf32>
    %119 = vector.extract_strided_slice %115 {offsets = [0, 0, 96], sizes = [2, 8, 32], strides = [1, 1, 1]} : vector<2x8x128xf32> to vector<2x8x32xf32>
    %120 = vector.shape_cast %65 : vector<2x8x8x32xf32> to vector<128x32xf32>
    %121 = arith.truncf %120 : vector<128x32xf32> to vector<128x32xbf16>
    %cst_49 = arith.constant dense<0.000000e+00> : vector<128x32xf32>
    %122 = tpu.matmul %121, %111, %cst_49 {dimension_numbers = #tpu.dot_dimension_numbers<[1], [0], [0], [1], [0, 0, 1, 1], [], []>} : vector<128x32xbf16>, vector<32x32xbf16>, vector<128x32xf32> -> vector<128x32xf32>
    %123 = vector.shape_cast %122 : vector<128x32xf32> to vector<2x8x8x32xf32>
    %124 = vector.shape_cast %116 : vector<2x8x32xf32> to vector<2x8x1x32xf32>
    %125 = vector.broadcast %124 : vector<2x8x1x32xf32> to vector<2x8x8x32xf32>
    %126 = arith.addf %123, %125 : vector<2x8x8x32xf32>
    %127 = vector.shape_cast %117 : vector<2x8x32xf32> to vector<2x1x8x32xf32>
    %128 = vector.broadcast %127 : vector<2x1x8x32xf32> to vector<2x8x8x32xf32>
    %129 = arith.addf %126, %128 : vector<2x8x8x32xf32>
    %cst_50 = arith.constant dense<0.000000e+00> : vector<2x8x8xf32>
    %130 = vector.multi_reduction <add>, %129, %cst_50 [3] : vector<2x8x8x32xf32> to vector<2x8x8xf32>
    %131 = vector.shape_cast %130 : vector<2x8x8xf32> to vector<2x8x8x1xf32>
    %cst_51 = arith.constant 3.200000e+01 : f32
    %132 = vector.broadcast %cst_51 : f32 to vector<2x8x8x1xf32>
    %133 = arith.divf %131, %132 : vector<2x8x8x1xf32>
    %134 = vector.broadcast %133 : vector<2x8x8x1xf32> to vector<2x8x8x32xf32>
    %135 = arith.subf %129, %134 : vector<2x8x8x32xf32>
    %136 = arith.mulf %135, %135 : vector<2x8x8x32xf32>
    %cst_52 = arith.constant dense<0.000000e+00> : vector<2x8x8xf32>
    %137 = vector.multi_reduction <add>, %136, %cst_52 [3] : vector<2x8x8x32xf32> to vector<2x8x8xf32>
    %138 = vector.shape_cast %137 : vector<2x8x8xf32> to vector<2x8x8x1xf32>
    %cst_53 = arith.constant 3.200000e+01 : f32
    %139 = vector.broadcast %cst_53 : f32 to vector<2x8x8x1xf32>
    %140 = arith.divf %138, %139 : vector<2x8x8x1xf32>
    %cst_54 = arith.constant 9.99999974E-6 : f32
    %141 = vector.broadcast %cst_54 : f32 to vector<2x8x8x1xf32>
    %142 = arith.addf %140, %141 : vector<2x8x8x1xf32>
    %143 = math.rsqrt %142 : vector<2x8x8x1xf32>
    %144 = vector.broadcast %143 : vector<2x8x8x1xf32> to vector<2x8x8x32xf32>
    %145 = arith.mulf %135, %144 : vector<2x8x8x32xf32>
    %cst_55 = arith.constant 0.000000e+00 : f32
    %146 = vector.broadcast %cst_55 : f32 to vector<2x8x8x32xf32>
    %147 = arith.maximumf %145, %146 : vector<2x8x8x32xf32>
    %148 = arith.addf %65, %147 : vector<2x8x8x32xf32>
    %cst_56 = arith.constant 0.000000e+00 : f32
    %149 = vector.broadcast %cst_56 : f32 to vector<2x8x8x32xf32>
    %150 = arith.subf %149, %148 : vector<2x8x8x32xf32>
    %151 = math.exp %150 : vector<2x8x8x32xf32>
    %cst_57 = arith.constant 1.000000e+00 : f32
    %152 = vector.broadcast %cst_57 : f32 to vector<2x8x8x32xf32>
    %153 = arith.addf %152, %151 : vector<2x8x8x32xf32>
    %154 = tpu.reciprocal %153 {approx = true} : vector<2x8x8x32xf32> -> vector<2x8x8x32xf32>
    %155 = math.exp %154 : vector<2x8x8x32xf32>
    %156 = vector.broadcast %10 : vector<2x1x8x1xf32> to vector<2x8x8x32xf32>
    %157 = arith.mulf %155, %156 : vector<2x8x8x32xf32>
    %cst_58 = arith.constant dense<0.000000e+00> : vector<2x8x32xf32>
    %158 = vector.multi_reduction <add>, %157, %cst_58 [2] : vector<2x8x8x32xf32> to vector<2x8x32xf32>
    %159 = vector.shape_cast %158 : vector<2x8x32xf32> to vector<2x8x1x32xf32>
    %cst_59 = arith.constant 9.99999996E-13 : f32
    %160 = vector.broadcast %cst_59 : f32 to vector<2x8x1x32xf32>
    %161 = arith.maximumf %159, %160 : vector<2x8x1x32xf32>
    %162 = tpu.reciprocal %161 {approx = true} : vector<2x8x1x32xf32> -> vector<2x8x1x32xf32>
    %163 = vector.broadcast %162 : vector<2x8x1x32xf32> to vector<2x8x8x32xf32>
    %164 = arith.mulf %157, %163 : vector<2x8x8x32xf32>
    %165 = vector.shape_cast %119 : vector<2x8x32xf32> to vector<2x1x8x32xf32>
    %166 = vector.broadcast %165 : vector<2x1x8x32xf32> to vector<2x8x8x32xf32>
    %167 = arith.mulf %164, %166 : vector<2x8x8x32xf32>
    %cst_60 = arith.constant dense<0.000000e+00> : vector<2x8x32xf32>
    %168 = vector.multi_reduction <add>, %167, %cst_60 [2] : vector<2x8x8x32xf32> to vector<2x8x32xf32>
    %169 = vector.broadcast %11 : vector<2x1x1xf32> to vector<2x8x32xf32>
    %170 = arith.mulf %168, %169 : vector<2x8x32xf32>
    %171 = arith.addf %118, %170 : vector<2x8x32xf32>
    %cst_61 = arith.constant dense<0.000000e+00> : vector<2x8xf32>
    %172 = vector.multi_reduction <add>, %171, %cst_61 [2] : vector<2x8x32xf32> to vector<2x8xf32>
    %173 = vector.shape_cast %172 : vector<2x8xf32> to vector<2x8x1xf32>
    %cst_62 = arith.constant 3.200000e+01 : f32
    %174 = vector.broadcast %cst_62 : f32 to vector<2x8x1xf32>
    %175 = arith.divf %173, %174 : vector<2x8x1xf32>
    %176 = vector.broadcast %175 : vector<2x8x1xf32> to vector<2x8x32xf32>
    %177 = arith.subf %171, %176 : vector<2x8x32xf32>
    %178 = arith.mulf %177, %177 : vector<2x8x32xf32>
    %cst_63 = arith.constant dense<0.000000e+00> : vector<2x8xf32>
    %179 = vector.multi_reduction <add>, %178, %cst_63 [2] : vector<2x8x32xf32> to vector<2x8xf32>
    %180 = vector.shape_cast %179 : vector<2x8xf32> to vector<2x8x1xf32>
    %cst_64 = arith.constant 3.200000e+01 : f32
    %181 = vector.broadcast %cst_64 : f32 to vector<2x8x1xf32>
    %182 = arith.divf %180, %181 : vector<2x8x1xf32>
    %cst_65 = arith.constant 9.99999974E-6 : f32
    %183 = vector.broadcast %cst_65 : f32 to vector<2x8x1xf32>
    %184 = arith.addf %182, %183 : vector<2x8x1xf32>
    %185 = math.rsqrt %184 : vector<2x8x1xf32>
    %186 = vector.broadcast %185 : vector<2x8x1xf32> to vector<2x8x32xf32>
    %187 = arith.mulf %177, %186 : vector<2x8x32xf32>
    %188 = arith.addf %107, %187 : vector<2x8x32xf32>
    %cst_66 = arith.constant 0.000000e+00 : f32
    %189 = vector.broadcast %cst_66 : f32 to vector<2x8x32xf32>
    %190 = arith.maximumf %188, %189 : vector<2x8x32xf32>
    %191 = arith.mulf %190, %190 : vector<2x8x32xf32>
    %cst_67 = arith.constant dense<0.000000e+00> : vector<2x8xf32>
    %192 = vector.multi_reduction <add>, %191, %cst_67 [2] : vector<2x8x32xf32> to vector<2x8xf32>
    %193 = vector.shape_cast %192 : vector<2x8xf32> to vector<2x8x1xf32>
    %cst_68 = arith.constant 1.000000e-24 : f32
    %194 = vector.broadcast %cst_68 : f32 to vector<2x8x1xf32>
    %195 = arith.maximumf %193, %194 : vector<2x8x1xf32>
    %196 = math.rsqrt %195 : vector<2x8x1xf32>
    %197 = vector.broadcast %196 : vector<2x8x1xf32> to vector<2x8x32xf32>
    %198 = arith.mulf %190, %197 : vector<2x8x32xf32>
    %199 = vector.shape_cast %198 : vector<2x8x32xf32> to vector<16x32xf32>
    %200 = arith.truncf %199 : vector<16x32xf32> to vector<16x32xbf16>
    %c0_69 = arith.constant 0 : index
    %c0_70 = arith.constant 0 : index
    %201 = vector.load %arg8[%c0_69, %c0_70] : memref<32x128xbf16, #tpu.memory_space<vmem>>, vector<32x128xbf16>
    %cst_71 = arith.constant dense<0.000000e+00> : vector<16x128xf32>
    %202 = tpu.matmul %200, %201, %cst_71 {dimension_numbers = #tpu.dot_dimension_numbers<[1], [0], [0], [1], [0, 0, 1, 1], [], []>} : vector<16x32xbf16>, vector<32x128xbf16>, vector<16x128xf32> -> vector<16x128xf32>
    %203 = vector.shape_cast %202 : vector<16x128xf32> to vector<2x8x128xf32>
    %c0_72 = arith.constant 0 : index
    %c0_73 = arith.constant 0 : index
    %c0_74 = arith.constant 0 : index
    %204 = vector.load %arg9[%c0_72, %c0_73, %c0_74] : memref<2x8x128xf32, #tpu.memory_space<vmem>>, vector<2x8x128xf32>
    tpu.vector_store %arg9[%c0_72, %c0_73, %c0_74], %203 {strides = array<i32>} : memref<2x8x128xf32, #tpu.memory_space<vmem>>, vector<2x8x128xf32>,
    return
  }
  func.func @transform_0(%arg0: i32) -> (i32, i32, i32, i32) {
    %c0_i32 = arith.constant 0 : i32
    %c0_i32_0 = arith.constant 0 : i32
    %c0_i32_1 = arith.constant 0 : i32
    %c0_i32_2 = arith.constant 0 : i32
    return %arg0, %c0_i32, %c0_i32_0, %c0_i32_1 : i32, i32, i32, i32
  }
  func.func @transform_1(%arg0: i32) -> (i32, i32, i32) {
    %c0_i32 = arith.constant 0 : i32
    %c0_i32_0 = arith.constant 0 : i32
    %c0_i32_1 = arith.constant 0 : i32
    return %arg0, %c0_i32, %c0_i32_0 : i32, i32, i32
  }
  func.func @transform_2(%arg0: i32) -> (i32, i32, i32) {
    %c0_i32 = arith.constant 0 : i32
    %c0_i32_0 = arith.constant 0 : i32
    %c0_i32_1 = arith.constant 0 : i32
    return %arg0, %c0_i32, %c0_i32_0 : i32, i32, i32
  }
  func.func @transform_3(%arg0: i32) -> (i32, i32, i32) {
    %c0_i32 = arith.constant 0 : i32
    %c0_i32_0 = arith.constant 0 : i32
    %c0_i32_1 = arith.constant 0 : i32
    return %arg0, %c0_i32, %c0_i32_0 : i32, i32, i32
  }
  func.func @transform_4(%arg0: i32) -> (i32, i32) {
    %c0_i32 = arith.constant 0 : i32
    %c0_i32_0 = arith.constant 0 : i32
    %c0_i32_1 = arith.constant 0 : i32
    return %c0_i32, %c0_i32_0 : i32, i32
  }
  func.func @transform_5(%arg0: i32) -> (i32, i32, i32) {
    %c0_i32 = arith.constant 0 : i32
    %c0_i32_0 = arith.constant 0 : i32
    %c0_i32_1 = arith.constant 0 : i32
    %c0_i32_2 = arith.constant 0 : i32
    return %c0_i32, %c0_i32_0, %c0_i32_1 : i32, i32, i32
  }
  func.func @transform_6(%arg0: i32) -> (i32, i32, i32) {
    %c0_i32 = arith.constant 0 : i32
    %c0_i32_0 = arith.constant 0 : i32
    %c0_i32_1 = arith.constant 0 : i32
    %c0_i32_2 = arith.constant 0 : i32
    return %c0_i32, %c0_i32_0, %c0_i32_1 : i32, i32, i32
  }
  func.func @transform_7(%arg0: i32) -> (i32, i32) {
    %c0_i32 = arith.constant 0 : i32
    %c0_i32_0 = arith.constant 0 : i32
    %c0_i32_1 = arith.constant 0 : i32
    return %c0_i32, %c0_i32_0 : i32, i32
  }
  func.func @transform_8(%arg0: i32) -> (i32, i32, i32) {
    %c0_i32 = arith.constant 0 : i32
    %c0_i32_0 = arith.constant 0 : i32
    %c0_i32_1 = arith.constant 0 : i32
    return %arg0, %c0_i32, %c0_i32_0 : i32, i32, i32
  }
}

</mosaic_0001>

<bundles_post_ra>
// kernel: _head_batched.1
= control target key start
LH: loop header
LB: loop body
LE: loop exit
PB: predicated region body
PF: predicated region fallthrough
CT: control target
= control target key end

     0   :  { %13 = vsyncpa [#allocation3], 0  ;;  %s6254_s0 = inlined_call_operand.vmem [shape: f32[4,8,16,32], index: 0, kind: input, shape index: {}]   ;;  %s6255_s1 = inlined_call_operand.vmem [shape: f32[4,16,32], index: 1, kind: input, shape index: {}]   ;;  %s6256_s2 = inlined_call_operand.vmem [shape: f32[4,8,1], index: 2, kind: input, shape index: {}]   ;;  %s6257_s3 = inlined_call_operand.vmem [shape: f32[4,1,1], index: 3, kind: input, shape index: {}]   ;;  %s6258_s4 = inlined_call_operand.vmem [shape: bf16[32,32], index: 4, kind: input, shape index: {}]   ;;  %s6259_s5 = inlined_call_operand.vmem [shape: bf16[2,32,128], index: 5, kind: input, shape index: {}]   ;;  %s6260_s6 = inlined_call_operand.vmem [shape: bf16[2,32,32], index: 6, kind: input, shape index: {}]   ;;  %s6261_s7 = inlined_call_operand.vmem [shape: bf16[32,128], index: 7, kind: input, shape index: {}]   ;;  %s6262_s8 = inlined_call_operand.hbm [shape: f32[4,8,128], index: 8, kind: output, shape index: {}]  }
   0x1   :  { %15 = vsyncpa [#allocation3 + $0x1], 0  ;;  %s4619_s27 = smov 0   ;;  %s4621_s28 = smov 0  }
   0x2   :  { %s4623_s29 = smov 0   ;;  %s4625_s30 = smov 0  }
   0x3 LB: > { %s4640_s9 = sadd.s32 4294967295, %s4562_s30   ;;  %s3908_s10 = sadd.s32 4294967294, %s4562_s30   ;;  %s4562_s30 = sphi %s4625_s30, %s6378_s30   ;;  %s4558_s29 = sphi %s4623_s29, %s6377_s29   ;;  %s4554_s28 = sphi %s4621_s28, %s6376_s28   ;;  %s4550_s27 = sphi %s4619_s27, %s6375_s27  }
   0x4   : > { %s4644_s11 = sadd.s32 1, %s4562_s30   ;;  %s216_s12 = sadd.s32 1, %s4558_s29 }
   0x5   : > { %s213_s13 = ssub.s32 %s4562_s30, %s4644_s11  ;;  %p226_p0 = scmp.ne.s32.totalorder %s4558_s29, %s4554_s28 }
   0x6   : > { %p214_p1 = scmp.eq.s32.totalorder %s213_s13, 0  ;;  %p227_p2 = scmp.eq.s32.totalorder %s4640_s9, 1 }
   0x7   : > { %p232_p3 = scmp.ne.s32.totalorder %s4554_s28, %s4550_s27  ;;  %p233_p4 = scmp.eq.s32.totalorder %s3908_s10, 1 }
   0x8   : > { %s4655_s14 = scalar_select %p214_p1, %s4558_s29, %s216_s12  }
   0x9   : > { %p4657_p5 = por %p227_p2, %p226_p0  ;;  %p4661_p6 = por %p233_p4, %p232_p3 }
   0xa   : > { %p3911_p7 = scmp.ge.s32.totalorder %s4562_s30, 1  ;;  %p300_p8 = scmp.lt.s32.totalorder %s4562_s30, 3 }
   0xc   : > { %p301_p9 = pnand %p3911_p7, %p300_p8 }
   0xe   : > { %304 = sbr.rel (%p301_p9) target bundleno = 3782 (0xec6), region = 52 }
  0x15   : > { %v4156_v0 = vld [vmem:[%s6258_s4] sm:$0xff]   ;;  %s3913_s19 = sshll.u32 %s4640_s9, 1  ;;  %v4157_v1 = vld [vmem:[%s6258_s4 + $0x8] sm:$0xff]   ;;  %vm409_vm0 = vcmask 261120   ;;  %v6263_v11 = vmov 0.0   ;;  %vm615_vm1 = vcmask 1041409  }
  0x16   : > { %p351_p10 = scmp.lt.s32.totalorder %s3913_s19, 3  ;;  %4018 = vmatprep.subr.bf16.mxu0 %v4156_v0  ;;  %4102 = vmatprep.subr.bf16.mxu1 %v4156_v0  ;;  %vm617_vm2 = vcmask 1042434   ;;  %vm619_vm3 = vcmask 1043459   ;;  %vm621_vm4 = vcmask 1044484   ;;  %vm623_vm5 = vcmask 1045509   ;;  %s4569_s18 = smov 32  }
  0x17   : > { %4019 = vmatpush3.bf16.msra.mxu0 %v4156_v0  ;;  %4104 = vmatpush3.bf16.msra.mxu1 %v4156_v0  ;;  %vm625_vm6 = vcmask 1046534   ;;  %vm627_vm7 = vcmask 1047559   ;;  %vm4565_vm8 = vmmov 0  }
  0x18   : > { %s6380_s19 = smov (!%p351_p10, %s3913_s19), 3  ;;  %4020 = vmatprep.subr.bf16.mxu0 %v4157_v1  ;;  %4103 = vmatprep.subr.bf16.mxu1 %v4157_v1 }
  0x19   : > { %s3976_s22 = sshll.u32 %s6380_s19, 7  ;;  %s3977_s26 = sshll.u32 %s6380_s19, 4 }
  0x1a   : > { %s4680_s25 = scalar_lea.vmem %s6254_s0, %s3976_s22  ;;  %s4719_s13 = scalar_lea.vmem %s6255_s1, %s3977_s26 }
  0x1b   : > { %4021 = vmatpush3.bf16.msra.mxu0 %v4157_v1  ;;  %v377_v2 = vld [vmem:[%s4680_s25] sm:$0xff]  ;;  %v378_v3 = vld [vmem:[%s4680_s25 + $0x8] sm:$0xff]  ;;  %v379_v4 = vld [vmem:[%s4680_s25 + $0x10] sm:$0xff]  ;;  %4105 = vmatpush3.bf16.msra.mxu1 %v4157_v1  ;;  %s4566_s26 = smov 96   ;;  %s3920_s10 = sshll.u32 %s6380_s19, 3 }
  0x1c   : > { %v380_v5 = vld [vmem:[%s4680_s25 + $0x18] sm:$0xff]  ;;  %v381_v6 = vld [vmem:[%s4680_s25 + $0x20] sm:$0xff]  ;;  %v382_v7 = vld [vmem:[%s4680_s25 + $0x28] sm:$0xff]  ;;  %v410_v8 = vsel %vm409_vm0, %v377_v2, 0.0  ;;  %v411_v9 = vsel %vm409_vm0, %v378_v3, 0.0  ;;  %v419_v10 = vsel %vm409_vm0, %v379_v4, 0.0  ;;  %4038 = vmatprep.subr.bf16.mxu1 %v6263_v11  ;;  %4066 = vmatprep.subr.bf16.mxu0 %v6263_v11  ;;  %s368_s17 = scalar_lea.vmem %s6256_s2, %s3920_s10  ;;  %s373_s22 = scalar_lea.vmem %s6257_s3, %s6380_s19 }
  0x1d   : > { %v383_v12 = vld [vmem:[%s4680_s25 + $0x30] sm:$0xff]  ;;  %v384_v13 = vld [vmem:[%s4680_s25 + $0x38] sm:$0xff]  ;;  %v385_v14 = vld [vmem:[%s4680_s25 + $0x40] sm:$0xff]  ;;  %v412_v15 = vadd.f32 %v411_v9, %v410_v8  ;;  %v420_v16 = vsel %vm409_vm0, %v380_v5, 0.0  ;;  %v428_v17 = vsel %vm409_vm0, %v381_v6, 0.0  ;;  %v429_v18 = vsel %vm409_vm0, %v382_v7, 0.0 }
  0x1e   : > { %v386_v19 = vld [vmem:[%s4680_s25 + $0x48] sm:$0xff]  ;;  %v387_v20 = vld [vmem:[%s4680_s25 + $0x50] sm:$0xff]  ;;  %v388_v21 = vld [vmem:[%s4680_s25 + $0x58] sm:$0xff]  ;;  %v421_v22 = vadd.f32 %v420_v16, %v419_v10  ;;  %v430_v23 = vadd.f32 %v429_v18, %v428_v17  ;;  %v437_v24 = vsel %vm409_vm0, %v383_v12, 0.0  ;;  %v438_v25 = vsel %vm409_vm0, %v384_v13, 0.0  ;;  %s4570_s19 = smov 64  }
  0x1f   : > { %v389_v26 = vld [vmem:[%s4680_s25 + $0x60] sm:$0xff]  ;;  %v413_v27 = vrot.slane %v412_v15, 4  ;;  %v439_v28 = vadd.f32 %v438_v25, %v437_v24  ;;  %v446_v29 = vsel %vm409_vm0, %v385_v14, 0.0  ;;  %v447_v30 = vsel %vm409_vm0, %v386_v19, 0.0  ;;  %v390_v31 = vld [vmem:[%s4680_s25 + $0x68] sm:$0xff]  ;;  %v391_v32 = vld [vmem:[%s4680_s25 + $0x70] sm:$0xff] }
  0x20   : > { %v422_v33 = vrot.slane %v421_v22, 4  ;;  %v431_v34 = vrot.slane %v430_v23, 4  ;;  %v448_v35 = vadd.f32 %v447_v30, %v446_v29  ;;  %v455_v36 = vsel %vm409_vm0, %v387_v20, 0.0  ;;  %v392_v41 = vld [vmem:[%s4680_s25 + $0x78] sm:$0xff]  ;;  %v571_v6 = vld [vmem:[%s4719_s13] sm:$0xff]  ;;  %v572_v16 = vld [vmem:[%s4719_s13 + $0x8] sm:$0xff] }
  0x21   : > { %v414_v37 = vadd.f32 %v413_v27, %v412_v15  ;;  %v440_v38 = vrot.slane %v439_v28, 4  ;;  %v456_v39 = vsel %vm409_vm0, %v388_v21, 0.0  ;;  %v464_v40 = vsel %vm409_vm0, %v389_v26, 0.0  ;;  %s3978_s10 = sshll.u32 %s4640_s9, 8  ;;  %s4571_s9 = smov [#allocation2]  }
  0x22   : > { %v423_v42 = vadd.f32 %v422_v33, %v421_v22  ;;  %v432_v43 = vadd.f32 %v431_v34, %v430_v23  ;;  %v449_v44 = vrot.slane %v448_v35, 4  ;;  %v457_v45 = vadd.f32 %v456_v39, %v455_v36 }
  0x23   : > { %v415_v46 = vrot.slane %v414_v37, 2  ;;  %v441_v47 = vadd.f32 %v440_v38, %v439_v28  ;;  %v465_v48 = vsel %vm409_vm0, %v390_v31, 0.0  ;;  %v473_v49 = vsel %vm409_vm0, %v391_v32, 0.0 }
  0x24   : > { %v424_v50 = vrot.slane %v423_v42, 2  ;;  %v433_v51 = vrot.slane %v432_v43, 2  ;;  %v450_v52 = vadd.f32 %v449_v44, %v448_v35  ;;  %v458_v53 = vrot.slane %v457_v45, 4 }
  0x25   : > { %v416_v54 = vadd.f32 %v415_v46, %v414_v37  ;;  %v442_v55 = vrot.slane %v441_v47, 2  ;;  %v466_v56 = vadd.f32 %v465_v48, %v464_v40  ;;  %v474_v57 = vsel %vm409_vm0, %v392_v41, 0.0  ;;  %v393_v37 = vld [vmem:[%s4680_s25 + $0x80] sm:$0xff]  ;;  %v394_v41 = vld [vmem:[%s4680_s25 + $0x88] sm:$0xff]  ;;  %v395_v46 = vld [vmem:[%s4680_s25 + $0x90] sm:$0xff] }
  0x26   : > { %v425_v58 = vadd.f32 %v424_v50, %v423_v42  ;;  %v434_v59 = vadd.f32 %v433_v51, %v432_v43  ;;  %v451_v60 = vrot.slane %v450_v52, 2  ;;  %v459_v61 = vadd.f32 %v458_v53, %v457_v45  ;;  %v397_v48 = vld [vmem:[%s4680_s25 + $0xa0] sm:$0xff] }
  0x27   : > { %v417_v62 = vrot.slane %v416_v54, 1  ;;  %v443_v63 = vadd.f32 %v442_v55, %v441_v47  ;;  %v467_v0 = vrot.slane %v466_v56, 4  ;;  %v475_v1 = vadd.f32 %v474_v57, %v473_v49  ;;  %v396_v47 = vld [vmem:[%s4680_s25 + $0x98] sm:$0xff]  ;;  %v399_v57 = vld [vmem:[%s4680_s25 + $0xb0] sm:$0xff] }
  0x28   : > { %v426_v2 = vrot.slane %v425_v58, 1  ;;  %v435_v3 = vrot.slane %v434_v59, 1  ;;  %v452_v4 = vadd.f32 %v451_v60, %v450_v52  ;;  %v460_v5 = vrot.slane %v459_v61, 2 }
  0x29   : > { %v418_v7 = vadd.f32 %v417_v62, %v416_v54  ;;  %v444_v8 = vrot.slane %v443_v63, 1  ;;  %v468_v9 = vadd.f32 %v467_v0, %v466_v56  ;;  %v476_v10 = vrot.slane %v475_v1, 4  ;;  %v398_v56 = vld [vmem:[%s4680_s25 + $0xa8] sm:$0xff] }
  0x2a   : > { %v427_v12 = vadd.f32 %v426_v2, %v425_v58  ;;  %v436_v13 = vadd.f32 %v435_v3, %v434_v59  ;;  %v453_v14 = vrot.slane %v452_v4, 1  ;;  %v461_v15 = vadd.f32 %v460_v5, %v459_v61  ;;  %v400_v58 = vld [vmem:[%s4680_s25 + $0xb8] sm:$0xff] }
  0x2b   : > { %v445_v17 = vadd.f32 %v444_v8, %v443_v63  ;;  %v469_v18 = vrot.slane %v468_v9, 2  ;;  %v477_v19 = vadd.f32 %v476_v10, %v475_v1  ;;  %v4724_v20 = vmul.f32 0.0625, %v418_v7 }
  0x2c   : > { %v454_v21 = vadd.f32 %v453_v14, %v452_v4  ;;  %v462_v22 = vrot.slane %v461_v15, 1  ;;  %v4726_v23 = vmul.f32 0.0625, %v427_v12  ;;  %v4728_v24 = vmul.f32 0.0625, %v436_v13 }
  0x2d   : > { %v470_v25 = vadd.f32 %v469_v18, %v468_v9  ;;  %v478_v26 = vrot.slane %v477_v19, 2  ;;  %v4730_v27 = vmul.f32 0.0625, %v445_v17  ;;  %v575_v28 = vsel %vm409_vm0, %v571_v6, 0.0  ;;  %v401_v17 = vld [vmem:[%s4680_s25 + $0xc0] sm:$0xff]  ;;  %v402_v18 = vld [vmem:[%s4680_s25 + $0xc8] sm:$0xff] }
  0x2e   : > { %v463_v29 = vadd.f32 %v462_v22, %v461_v15  ;;  %v4733_v30 = vmul.f32 0.0625, %v454_v21  ;;  %v576_v31 = vsel %vm409_vm0, %v572_v16, 0.0  ;;  %v616_v32 = vsel %vm615_vm1, %v4726_v23, %v4724_v20 }
  0x2f   : > { %v471_v33 = vrot.slane %v470_v25, 1  ;;  %v479_v34 = vadd.f32 %v478_v26, %v477_v19  ;;  %v577_v35 = vadd.f32 %v576_v31, %v575_v28  ;;  %v618_v36 = vsel %vm617_vm2, %v4728_v24, %v616_v32  ;;  %v403_v28 = vld [vmem:[%s4680_s25 + $0xd0] sm:$0xff] }
  0x30   : > { %v4742_v38 = vmul.f32 0.0625, %v463_v29  ;;  %v620_v39 = vsel %vm619_vm3, %v4730_v27, %v618_v36  ;;  %v823_v40 = vpack.c.bf16 %v4724_v20, %v4724_v20  ;;  %v824_v50 = vpack.c.bf16 %v4726_v23, %v4726_v23  ;;  %v404_v29 = vld [vmem:[%s4680_s25 + $0xd8] sm:$0xff] }
  0x31   : > { %v472_v42 = vadd.f32 %v471_v33, %v470_v25  ;;  %v480_v43 = vrot.slane %v479_v34, 1  ;;  %v578_v44 = vrot.slane %v577_v35, 4  ;;  %v622_v45 = vsel %vm621_vm4, %v4733_v30, %v620_v39 }
  0x32   : > { %v624_v49 = vsel %vm623_vm5, %v4742_v38, %v622_v45  ;;  %v4758_v51 = vunpack.c.l.b16 %v823_v40  ;;  %v482_v52 = vsel %vm409_vm0, %v393_v37, 0.0  ;;  %v483_v59 = vsel %vm409_vm0, %v394_v41, 0.0 }
  0x33   : > { %v481_v53 = vadd.f32 %v480_v43, %v479_v34  ;;  %v4761_v54 = vmul.f32 0.0625, %v472_v42  ;;  %v579_v55 = vadd.f32 %v578_v44, %v577_v35  ;;  %v484_v60 = vadd.f32 %v483_v59, %v482_v52 }
  0x34   : > { %v491_v61 = vsel %vm409_vm0, %v395_v46, 0.0  ;;  %v492_v62 = vsel %vm409_vm0, %v396_v47, 0.0  ;;  %v500_v63 = vsel %vm409_vm0, %v397_v48, 0.0  ;;  %v501_v5 = vsel %vm409_vm0, %v398_v56, 0.0 }
  0x35   : > { %v4770_v0 = vmul.f32 0.0625, %v481_v53  ;;  %v580_v1 = vrot.slane %v579_v55, 2  ;;  %v626_v2 = vsel %vm625_vm6, %v4761_v54, %v624_v49  ;;  %v493_v3 = vadd.f32 %v492_v62, %v491_v61 }
  0x36   : > { %v485_v4 = vrot.slane %v484_v60, 4  ;;  %v509_v6 = vsel %vm409_vm0, %v399_v57, 0.0  ;;  %v510_v7 = vsel %vm409_vm0, %v400_v58, 0.0  ;;  %v502_v12 = vadd.f32 %v501_v5, %v500_v63 }
  0x37   : > { %v581_v8 = vadd.f32 %v580_v1, %v579_v55  ;;  %v628_v9 = vsel %vm627_vm7, %v4770_v0, %v626_v2  ;;  %v494_v10 = vrot.slane %v493_v3, 4  ;;  %v511_v35 = vadd.f32 %v510_v7, %v509_v6  ;;  %v405_v1 = vld [vmem:[%s4680_s25 + $0xe0] sm:$0xff]  ;;  %v406_v2 = vld [vmem:[%s4680_s25 + $0xe8] sm:$0xff]  ;;  %v407_v7 = vld [vmem:[%s4680_s25 + $0xf0] sm:$0xff] }
  0x38   : > { %v638_v13 = vadd.f32 %v628_v9, %v4724_v20  ;;  %v639_v14 = vadd.f32 %v628_v9, %v4726_v23  ;;  %v640_v15 = vadd.f32 %v628_v9, %v4728_v24  ;;  %v641_v16 = vadd.f32 %v628_v9, %v4730_v27 }
  0x39   : > { %v582_v19 = vrot.slane %v581_v8, 1  ;;  %v642_v21 = vadd.f32 %v628_v9, %v4733_v30  ;;  %v643_v22 = vadd.f32 %v628_v9, %v4742_v38  ;;  %v644_v25 = vadd.f32 %v628_v9, %v4761_v54 }
  0x3a   : > { %v645_v26 = vadd.f32 %v628_v9, %v4770_v0  ;;  %v486_v31 = vadd.f32 %v485_v4, %v484_v60  ;;  %v495_v32 = vadd.f32 %v494_v10, %v493_v3  ;;  %v503_v33 = vrot.slane %v502_v12, 4  ;;  %v408_v10 = vld [vmem:[%s4680_s25 + $0xf8] sm:$0xff] }
  0x3b   : > { %v583_v34 = vadd.f32 %v582_v19, %v581_v8  ;;  %v518_v36 = vsel %vm409_vm0, %v401_v17, 0.0  ;;  %v519_v37 = vsel %vm409_vm0, %v402_v18, 0.0  ;;  %v512_v44 = vrot.slane %v511_v35, 4 }
  0x3c   : > { %v487_v39 = vrot.slane %v486_v31, 2  ;;  %v496_v40 = vrot.slane %v495_v32, 2  ;;  %v504_v41 = vadd.f32 %v503_v33, %v502_v12  ;;  %v520_v42 = vadd.f32 %v519_v37, %v518_v36 }
  0x3d   : > { %v593_v43 = vmul.f32 0.0625, %v583_v34  ;;  %v527_v45 = vsel %vm409_vm0, %v403_v28, 0.0  ;;  %v528_v46 = vsel %vm409_vm0, %v404_v29, 0.0  ;;  %v513_v9 = vadd.f32 %v512_v44, %v511_v35  ;;  %v573_v28 = vld [vmem:[%s4719_s13 + $0x10] sm:$0xff] }
  0x3e   : > { %v488_v47 = vadd.f32 %v487_v39, %v486_v31  ;;  %v497_v48 = vadd.f32 %v496_v40, %v495_v32  ;;  %v505_v49 = vrot.slane %v504_v41, 2  ;;  %v521_v52 = vrot.slane %v520_v42, 4  ;;  %v574_v39 = vld [vmem:[%s4719_s13 + $0x18] sm:$0xff] }
  0x3f   : > { %v654_v53 = vadd.f32 %v638_v13, %v593_v43  ;;  %v655_v55 = vadd.f32 %v639_v14, %v593_v43  ;;  %v656_v56 = vadd.f32 %v640_v15, %v593_v43  ;;  %v657_v57 = vadd.f32 %v641_v16, %v593_v43 }
  0x40   : > { %v658_v58 = vadd.f32 %v642_v21, %v593_v43  ;;  %v659_v59 = vadd.f32 %v643_v22, %v593_v43  ;;  %v660_v60 = vadd.f32 %v644_v25, %v593_v43  ;;  %v661_v61 = vadd.f32 %v645_v26, %v593_v43 }
  0x41   : > { %v670_v62 = vpack.c.bf16 %v655_v55, %v654_v53  ;;  %v671_v63 = vpack.c.bf16 %v657_v57, %v656_v56  ;;  %v489_v3 = vrot.slane %v488_v47, 1  ;;  %v498_v4 = vrot.slane %v497_v48, 1 }
  0x42   : > { %v672_v5 = vpack.c.bf16 %v659_v59, %v658_v58  ;;  %v673_v6 = vpack.c.bf16 %v661_v61, %v660_v60  ;;  %v506_v8 = vadd.f32 %v505_v49, %v504_v41  ;;  %v522_v14 = vadd.f32 %v521_v52, %v520_v42 }
  0x43   : > { %4022 = vmatprep.mubr.msk.bf16.mxu0 %vm409_vm0, %v670_v62  ;;  %v490_v12 = vadd.f32 %v489_v3, %v488_v47  ;;  %v499_v13 = vadd.f32 %v498_v4, %v497_v48  ;;  %v529_v15 = vadd.f32 %v528_v46, %v527_v45  ;;  %v514_v17 = vrot.slane %v513_v9, 2 }
  0x44   : > { %4023 = vmatmul.mubr.msk.bf16.vlgmr.msra.gmra.mrb[0].mxu0 %vm409_vm0, %v671_v63  ;;  %v507_v16 = vrot.slane %v506_v8, 1  ;;  %v536_v18 = vsel %vm409_vm0, %v405_v1, 0.0  ;;  %v537_v19 = vsel %vm409_vm0, %v406_v2, 0.0  ;;  %v523_v21 = vrot.slane %v522_v14, 2 }
  0x45   : > { %4026 = vmatprep.mubr.msk.bf16.mxu0 %vm409_vm0, %v672_v5  ;;  %v530_v22 = vrot.slane %v529_v15, 4  ;;  %v538_v25 = vadd.f32 %v537_v19, %v536_v18  ;;  %v545_v26 = vsel %vm409_vm0, %v407_v7, 0.0  ;;  %v515_v31 = vadd.f32 %v514_v17, %v513_v9 }
  0x46   : > { %v508_v29 = vadd.f32 %v507_v16, %v506_v8  ;;  %v546_v32 = vsel %vm409_vm0, %v408_v10, 0.0  ;;  %v4807_v33 = vmul.f32 0.0625, %v490_v12  ;;  %v524_v34 = vadd.f32 %v523_v21, %v522_v14 }
  0x47   : > { %v531_v35 = vadd.f32 %v530_v22, %v529_v15  ;;  %v539_v36 = vrot.slane %v538_v25, 4  ;;  %v547_v37 = vadd.f32 %v546_v32, %v545_v26  ;;  %v516_v40 = vrot.slane %v515_v31, 1 }
  0x48   : > { %v4810_v41 = vmul.f32 0.0625, %v499_v13  ;;  %v4812_v42 = vmul.f32 0.0625, %v508_v29  ;;  %v584_v43 = vsel %vm409_vm0, %v573_v28, 0.0  ;;  %v525_v44 = vrot.slane %v524_v34, 1 }
  0x49   : > { %v532_v45 = vrot.slane %v531_v35, 2  ;;  %v540_v46 = vadd.f32 %v539_v36, %v538_v25  ;;  %v548_v47 = vrot.slane %v547_v37, 4  ;;  %v517_v48 = vadd.f32 %v516_v40, %v515_v31 }
  0x4a   : > { %v585_v49 = vsel %vm409_vm0, %v574_v39, 0.0  ;;  %v629_v52 = vsel %vm615_vm1, %v4810_v41, %v4807_v33  ;;  %v831_v53 = vpack.c.bf16 %v4807_v33, %v4807_v33  ;;  %v526_v55 = vadd.f32 %v525_v44, %v524_v34 }
  0x4b   : > { %v533_v56 = vadd.f32 %v532_v45, %v531_v35  ;;  %v541_v57 = vrot.slane %v540_v46, 2  ;;  %v549_v58 = vadd.f32 %v548_v47, %v547_v37  ;;  %v4822_v59 = vmul.f32 0.0625, %v517_v48 }
  0x4c   : > { %4027 = vmatmul.mubr.msk.bf16.gmra.mrb[4].mxu0 %vm409_vm0, %v673_v6  ;;  %v586_v60 = vadd.f32 %v585_v49, %v584_v43  ;;  %v630_v61 = vsel %vm617_vm2, %v4812_v42, %v629_v52  ;;  %v832_v62 = vpack.c.bf16 %v4810_v41, %v4810_v41  ;;  %v4828_v3 = vmul.f32 0.0625, %v526_v55 }
  0x4d   : > { %v534_v63 = vrot.slane %v533_v56, 1  ;;  %v542_v1 = vadd.f32 %v541_v57, %v540_v46  ;;  %v550_v2 = vrot.slane %v549_v58, 2  ;;  %v856_v4 = vunpack.c.l.b16 %v824_v50 }
  0x4e   : > { %v587_v5 = vrot.slane %v586_v60, 4  ;;  %v631_v6 = vsel %vm619_vm3, %v4822_v59, %v630_v61  ;;  %v4835_v7 = vunpack.c.l.b16 %v831_v53  ;;  %v864_v12 = vunpack.c.l.b16 %v832_v62 }
  0x4f   : > { %v535_v8 = vadd.f32 %v534_v63, %v533_v56  ;;  %v543_v9 = vrot.slane %v542_v1, 1  ;;  %v551_v10 = vadd.f32 %v550_v2, %v549_v58  ;;  %v632_v14 = vsel %vm621_vm4, %v4828_v3, %v631_v6 }
  0x50   : > { %v588_v13 = vadd.f32 %v587_v5, %v586_v60  ;;  %v825_v15 = vpack.c.bf16 %v4728_v24, %v4728_v24  ;;  %v826_v50 = vpack.c.bf16 %v4730_v27, %v4730_v27  ;;  %v827_v19 = vpack.c.bf16 %v4733_v30, %v4733_v30 }
  0x51   : > { %v544_v16 = vadd.f32 %v543_v9, %v542_v1  ;;  %v552_v17 = vrot.slane %v551_v10, 1  ;;  %v4843_v18 = vmul.f32 0.0625, %v535_v8  ;;  %v828_v22 = vpack.c.bf16 %v4742_v38, %v4742_v38 }
  0x52   : > { %v589_v21 = vrot.slane %v588_v13, 2  ;;  %v829_v25 = vpack.c.bf16 %v4761_v54, %v4761_v54  ;;  %v830_v26 = vpack.c.bf16 %v4770_v0, %v4770_v0  ;;  %v833_v32 = vpack.c.bf16 %v4812_v42, %v4812_v42 }
  0x53   : > { %6314 = vst [vmem:[#allocation5_spill] sm:$0xff] %v4843_v18  ;;  %v553_v28 = vadd.f32 %v552_v17, %v551_v10  ;;  %v4853_v29 = vmul.f32 0.0625, %v544_v16  ;;  %v633_v31 = vsel %vm623_vm5, %v4843_v18, %v632_v14  ;;  %v834_v35 = vpack.c.bf16 %v4822_v59, %v4822_v59 }
  0x54   : > { %v590_v34 = vadd.f32 %v589_v21, %v588_v13  ;;  %v835_v36 = vpack.c.bf16 %v4828_v3, %v4828_v3  ;;  %v836_v37 = vpack.c.bf16 %v4843_v18, %v4843_v18  ;;  %v857_v44 = vunpack.c.l.b16 %v825_v15 }
  0x55   : > { %6315 = vst [vmem:[#allocation6_spill] sm:$0xff] %v4853_v29  ;;  %v4865_v39 = vmul.f32 0.0625, %v553_v28  ;;  %v634_v40 = vsel %vm625_vm6, %v4853_v29, %v633_v31  ;;  %v837_v43 = vpack.c.bf16 %v4853_v29, %v4853_v29  ;;  %v858_v46 = vunpack.c.l.b16 %v826_v50 }
  0x56   : > { %v591_v45 = vrot.slane %v590_v34, 1  ;;  %v859_v47 = vunpack.c.l.b16 %v827_v19  ;;  %v860_v48 = vunpack.c.l.b16 %v828_v22  ;;  %v861_v53 = vunpack.c.l.b16 %v829_v25 }
  0x57   : > { %6316 = vst [vmem:[#allocation7_spill] sm:$0xff] %v4865_v39  ;;  %v635_v49 = vsel %vm627_vm7, %v4865_v39, %v634_v40  ;;  %v838_v52 = vpack.c.bf16 %v4865_v39, %v4865_v39  ;;  %v862_v55 = vunpack.c.l.b16 %v830_v26  ;;  %v865_v6 = vunpack.c.l.b16 %v833_v32 }
  0x58   : > { %v592_v56 = vadd.f32 %v591_v45, %v590_v34  ;;  %v646_v57 = vadd.f32 %v635_v49, %v4807_v33  ;;  %v647_v58 = vadd.f32 %v635_v49, %v4810_v41  ;;  %v648_v60 = vadd.f32 %v635_v49, %v4812_v42 }
  0x59   : > { %v649_v61 = vadd.f32 %v635_v49, %v4822_v59  ;;  %v650_v62 = vadd.f32 %v635_v49, %v4828_v3  ;;  %v651_v63 = vadd.f32 %v635_v49, %v4843_v18  ;;  %v652_v1 = vadd.f32 %v635_v49, %v4853_v29 }
  0x5a   : > { %v594_v2 = vmul.f32 0.0625, %v592_v56  ;;  %v653_v5 = vadd.f32 %v635_v49, %v4865_v39  ;;  %v866_v8 = vunpack.c.l.b16 %v834_v35  ;;  %v867_v9 = vunpack.c.l.b16 %v835_v36 }
  0x5b   : > { %v868_v10 = vunpack.c.l.b16 %v836_v37  ;;  %v869_v13 = vunpack.c.l.b16 %v837_v43  ;;  %v871_v14 = vsel %vm615_vm1, %v856_v4, %v4758_v51  ;;  %v878_v32 = vsel %vm615_vm1, %v864_v12, %v4835_v7  ;;  %v4158_v51 = vld [vmem:[%s6259_s5] sm:$0xff]  }
  0x5c   : > { %v662_v15 = vadd.f32 %v646_v57, %v594_v2  ;;  %v663_v50 = vadd.f32 %v647_v58, %v594_v2  ;;  %v664_v16 = vadd.f32 %v648_v60, %v594_v2  ;;  %v665_v17 = vadd.f32 %v649_v61, %v594_v2 }
  0x5d   : > { %v666_v19 = vadd.f32 %v650_v62, %v594_v2  ;;  %v667_v21 = vadd.f32 %v651_v63, %v594_v2  ;;  %v668_v22 = vadd.f32 %v652_v1, %v594_v2  ;;  %v669_v25 = vadd.f32 %v653_v5, %v594_v2 }
  0x5e   : > { %v674_v26 = vpack.c.bf16 %v663_v50, %v662_v15  ;;  %v675_v28 = vpack.c.bf16 %v665_v17, %v664_v16  ;;  %v872_v31 = vsel %vm617_vm2, %v857_v44, %v871_v14  ;;  %v879_v36 = vsel %vm617_vm2, %v865_v6, %v878_v32 }
  0x5f   : > { %v676_v34 = vpack.c.bf16 %v667_v21, %v666_v19  ;;  %v677_v35 = vpack.c.bf16 %v669_v25, %v668_v22  ;;  %v873_v4 = vsel %vm619_vm3, %v858_v46, %v872_v31  ;;  %v870_v37 = vunpack.c.l.b16 %v838_v52  ;;  %v4159_v46 = vld [vmem:[%s6259_s5 + $0x8] sm:$0xff]   ;;  %v4160_v52 = vld [vmem:[%s6260_s6] sm:$0xff]  }
  0x60   : > { %4030 = vmatprep.mubr.msk.bf16.mxu0 %vm409_vm0, %v674_v26  ;;  %v874_v40 = vsel %vm621_vm4, %v859_v47, %v873_v4  ;;  %v880_v43 = vsel %vm619_vm3, %v866_v8, %v879_v36 }
  0x61   : > { %4031 = vmatmul.mubr.msk.bf16.gmra.mrb[8].mxu0 %vm409_vm0, %v675_v28  ;;  %4034 = vmatprep.mubr.msk.bf16.mxu1 %vm409_vm0, %v676_v34  ;;  %v875_v7 = vsel %vm623_vm5, %v860_v48, %v874_v40  ;;  %v881_v12 = vsel %vm621_vm4, %v867_v9, %v880_v43  ;;  %v4567_v34 = vmov 1966171168  }
  0x62   : > { %4035 = vmatmul.mubr.msk.bf16.vlgmr.msra.gmra.mrb[0].mxu1 %vm409_vm0, %v677_v35  ;;  %v876_v44 = vsel %vm625_vm6, %v861_v53, %v875_v7  ;;  %v882_v45 = vsel %vm623_vm5, %v868_v10, %v881_v12  ;;  %4070 = vmatprep.mubr.msk.bf16.mxu0 %vm4565_vm8, %v6263_v11  ;;  %v1087_v35 = vunpack.c.l.s4 %v4567_v34 }
  0x63   : > { %4039 = vmatpush3.bf16.msra.mxu1 %v4158_v51  ;;  %4042 = vmatprep.mubr.msk.bf16.mxu1 %vm4565_vm8, %v6263_v11  ;;  %v877_v47 = vsel %vm627_vm7, %v862_v55, %v876_v44  ;;  %v883_v48 = vsel %vm625_vm6, %v869_v13, %v882_v45  ;;  %v4161_v55 = vld [vmem:[%s6260_s6 + $0x8] sm:$0xff]   ;;  %v1089_v51 = vlaneseq }
  0x64   : > { %4040 = vmatprep.subr.bf16.mxu1 %v6263_v11  ;;  %v884_v49 = vsel %vm627_vm7, %v870_v37, %v883_v48  ;;  %v1088_v4 = vunpack.c.0.s8 %v1087_v35 }
  0x65   : > { %v885_v53 = vpack.c.b16 %v884_v49, %v877_v47  ;;  %v1090_v36 = vshrl.u32 %v1089_v51, 7 }
  0x67   : > { %4041 = vmatpush3.bf16.msra.mxu1 %v4159_v46  ;;  %v4988_v37 = vsub.s32 %v1088_v4, %v1090_v36  ;;  %v4997_v47 = vsub.s32 0, %v1090_v36 }
  0x68   : > { %4046 = vmatprep.subr.bf16.mxu1 %v4160_v52 }
  0x69   : > { %6317 = vst [vmem:[#allocation8_spill] sm:$0xff] %v4988_v37  ;;  %6318 = vst [vmem:[#allocation9_spill] sm:$0xff] %v4997_v47 }
  0x6a   : > { %4043 = vmatmul.mubr.msk.bf16.vlgmr.msra.gmra.mrb[4].mxu1 %vm409_vm0, %v885_v53 }
  0x6b   : > { %4047 = vmatpush3.bf16.msra.mxu1 %v4160_v52 }
  0x6c   : > { %4048 = vmatprep.subr.bf16.mxu1 %v4161_v55 }
  0x6f   : > { %4049 = vmatpush3.bf16.msra.mxu1 %v4161_v55 }
  0x70   : > { %4094 = vmatprep.subr.bf16.mxu1 %v6263_v11 }
 0x117   : > { %v4922_v56 = vpop.f32.mrb[0].mxu0 }
 0x118   : > { %v4924_v57 = vpop.f32.mrb[1].mxu0 }
 0x119   : > { %v4926_v58 = vpop.f32.mrb[2].mxu0 }
 0x11a   : > { %v943_v60 = vpack.c.bf16 %v4926_v58, %v4922_v56  ;;  %v4930_v61 = vpop.f32.mrb[3].mxu0 }
 0x11b   : > { %v942_v62 = vpack.c.bf16 %v4930_v61, %v4924_v57 }
 0x11d   : > { %4050 = vmatprep.mubr.msk.bf16.mxu1 %vm409_vm0, %v942_v62 }
 0x11e   : > { %4051 = vmatmul.mubr.msk.bf16.vlgmr.msra.gmra.mrb[8].mxu1 %vm409_vm0, %v943_v60 }
 0x11f   : > { %v4936_v63 = vpop.f32.mrb[4].mxu0 }
 0x120   : > { %v4938_v1 = vpop.f32.mrb[5].mxu0 }
 0x121   : > { %v4940_v2 = vpop.f32.mrb[6].mxu0 }
 0x122   : > { %v945_v5 = vpack.c.bf16 %v4940_v2, %v4936_v63  ;;  %v4944_v6 = vpop.f32.mrb[7].mxu0 }
 0x123   : > { %v944_v8 = vpack.c.bf16 %v4944_v6, %v4938_v1 }
 0x125   : > { %4054 = vmatprep.mubr.msk.bf16.mxu1 %vm409_vm0, %v944_v8 }
 0x126   : > { %4055 = vmatmul.mubr.msk.bf16.gmra.mrb[12].mxu1 %vm409_vm0, %v945_v5 }
 0x134   : > { %v4950_v9 = vpop.f32.mrb[8].mxu0 }
 0x135   : > { %v4952_v10 = vpop.f32.mrb[9].mxu0  ;;  %v4954_v13 = vpop.f32.mrb[0].mxu1 }
 0x136   : > { %v4956_v14 = vpop.f32.mrb[10].mxu0  ;;  %v4958_v15 = vpop.f32.mrb[1].mxu1 }
 0x137   : > { %v947_v50 = vpack.c.bf16 %v4956_v14, %v4950_v9  ;;  %v4962_v16 = vpop.f32.mrb[11].mxu0  ;;  %v4964_v17 = vpop.f32.mrb[2].mxu1 }
 0x138   : > { %v946_v19 = vpack.c.bf16 %v4962_v16, %v4952_v10  ;;  %v949_v21 = vpack.c.bf16 %v4964_v17, %v4954_v13  ;;  %v4970_v22 = vpop.f32.mrb[3].mxu1 }
 0x139   : > { %v948_v25 = vpack.c.bf16 %v4970_v22, %v4958_v15 }
 0x13a   : > { %4058 = vmatprep.mubr.msk.bf16.mxu1 %vm409_vm0, %v946_v19 }
 0x13b   : > { %4059 = vmatmul.mubr.msk.bf16.gmra.mrb[16].mxu1 %vm409_vm0, %v947_v50 }
 0x13c   : > { %4062 = vmatprep.mubr.msk.bf16.mxu1 %vm409_vm0, %v948_v25 }
 0x13d   : > { %v4977_v26 = vpop.f32.mrb[4].mxu1 }
 0x13e   : > { %1279 = vrot.lane.b32.xlu0 %v4977_v26, %s4566_s26  ;;  %v4044_v28 = vpop.f32.mrb[5].mxu1  ;;  %v1092_v40 = vrot.slane %v4977_v26, %v4988_v37  ;;  %v1085_v43 = vcombine.high %v4977_v26, %v4977_v26 }
 0x13f   : > { %v4981_v31 = vpop.f32.mrb[6].mxu1 }
 0x140   : > { %v4045_v32 = vpop.f32.mrb[7].mxu1  ;;  %v1100_v7 = vcombine.high %v1092_v40, %v1092_v40  ;;  %v1108_v12 = vrot.slane %v1092_v40, %v4988_v37  ;;  %v1099_v45 = vrot.slane %v1085_v43, %v4988_v37 }
 0x142   : > { %1281 = vrot.lane.b32.xlu0 %v4981_v31, %s4566_s26  ;;  %v1122_v44 = vrot.slane %v1100_v7, %v4988_v37  ;;  %v1130_v46 = vcombine.high %v1108_v12, %v1108_v12  ;;  %v1101_v49 = vcombine.high %v1099_v45, %v1099_v45  ;;  %v1115_v53 = vrot.slane %v1099_v45, %v4988_v37 }
 0x143   : > { %4063 = vmatmul.mubr.msk.bf16.gmra.mrb[20].mxu1 %vm409_vm0, %v949_v21  ;;  %v1186_v60 = vrot.slane %v1108_v12, %v4997_v47 }
 0x144   : > { %4098 = vmatprep.mubr.msk.bf16.mxu1 %vm4565_vm8, %v6263_v11  ;;  %v1132_v48 = vcombine.high %v1122_v44, %v1122_v44  ;;  %v1194_v52 = vrot.slane %v1130_v46, %v4997_v47  ;;  %v1129_v50 = vrot.slane %v1101_v49, %v4988_v37  ;;  %v1190_v28 = vrot.slane %v1122_v44, %v4997_v47 }
 0x145   : > { %v1131_v51 = vcombine.high %v1115_v53, %v1115_v53  ;;  %v1202_v44 = vrot.slane %v1115_v53, %v4997_v47 }
 0x146   : > { %v1198_v8 = vrot.slane %v1132_v48, %v4997_v47  ;;  %v1133_v43 = vcombine.high %v1129_v50, %v1129_v50 }
 0x147   : > { %v1210_v7 = vrot.slane %v1131_v51, %v4997_v47 }
 0x148   : > { %v1214_v49 = vrot.slane %v1133_v43, %v4997_v47 }
 0x1b0   : > { %v5004_v19 = vpop.permute.xlu0 %1279 }
 0x1f1   : > { %v4052_v55 = vpop.f32.mrb[8].mxu1 }
 0x1f2   : > { %v1265_v62 = vadd.f32 %v4052_v55, %v1194_v52  ;;  %v1020_v5 = vpop.f32.mrb[9].mxu1 }
 0x1f3   : > { %v1263_v21 = vadd.f32 %v1186_v60, %v1020_v5  ;;  %v4053_v25 = vpop.f32.mrb[10].mxu1 }
 0x1f4   : > { %v1266_v32 = vadd.f32 %v4053_v25, %v1198_v8  ;;  %v1023_v34 = vpop.f32.mrb[11].mxu1  ;;  %v5008_v35 = vadd.f32 %v5004_v19, %v1265_v62  ;;  %v1206_v62 = vrot.slane %v1129_v50, %v4997_v47  ;;  %v1134_v50 = vcombine.high %v4981_v31, %v4981_v31 }
 0x1f5   : > { %v1264_v4 = vadd.f32 %v1190_v28, %v1023_v34  ;;  %v5013_v40 = vadd.f32 %v5004_v19, %v1263_v21  ;;  %v1141_v28 = vrot.slane %v4981_v31, %v4988_v37 }
 0x1f6   : > { %v1307_v36 = vsel %vm409_vm0, %v5008_v35, 0.0  ;;  %v5021_v52 = vadd.f32 %v5004_v19, %v1266_v32 }
 0x1f7   : > { %1308 = vadd.xlane.f32.xlu1 %v1307_v36  ;;  %v1301_v48 = vsel %vm409_vm0, %v5013_v40, 0.0  ;;  %v5029_v25 = vadd.f32 %v5004_v19, %v1264_v4  ;;  %v1149_v51 = vcombine.high %v1141_v28, %v1141_v28  ;;  %v1157_v36 = vrot.slane %v1141_v28, %v4988_v37 }
 0x1f8   : > { %v1310_v53 = vsel %vm409_vm0, %v5021_v52, 0.0 }
 0x1f9   : > { %v4056_v12 = vpop.f32.mrb[12].mxu1  ;;  %v1304_v32 = vsel %vm409_vm0, %v5029_v25, 0.0 }
 0x1fa   : > { %v1269_v45 = vadd.f32 %v4056_v12, %v1210_v7  ;;  %v1036_v46 = vpop.f32.mrb[13].mxu1  ;;  %v1171_v7 = vrot.slane %v1149_v51, %v4988_v37  ;;  %v1148_v12 = vrot.slane %v1134_v50, %v4988_v37  ;;  %v1282_v51 = vpop.permute.xlu0 %1281 }
 0x1fb   : > { %v1267_v55 = vadd.f32 %v1202_v44, %v1036_v46  ;;  %1302 = vadd.xlane.f32.xlu1 %v1301_v48  ;;  %v4057_v60 = vpop.f32.mrb[14].mxu1  ;;  %v1179_v44 = vcombine.high %v1157_v36, %v1157_v36 }
 0x1fc   : > { %v5024_v5 = vadd.f32 %v4057_v60, %v1214_v49  ;;  %v1039_v8 = vpop.f32.mrb[15].mxu1  ;;  %v5036_v34 = vadd.f32 %v5004_v19, %v1269_v45  ;;  %v1181_v48 = vcombine.high %v1171_v7, %v1171_v7  ;;  %v1150_v49 = vcombine.high %v1148_v12, %v1148_v12 }
 0x1fd   : > { %v1268_v21 = vadd.f32 %v1206_v62, %v1039_v8  ;;  %v5044_v43 = vadd.f32 %v5004_v19, %v1267_v55  ;;  %v1226_v60 = vrot.slane %v1179_v44, %v4997_v47  ;;  %v1164_v55 = vrot.slane %v1148_v12, %v4988_v37 }
 0x1fe   : > { %v1319_v4 = vsel %vm409_vm0, %v5036_v34, 0.0  ;;  %v1218_v8 = vrot.slane %v1157_v36, %v4997_v47  ;;  %v1230_v50 = vrot.slane %v1181_v48, %v4997_v47  ;;  %v1222_v44 = vrot.slane %v1171_v7, %v4997_v47 }
 0x1ff   : > { %1311 = vadd.xlane.f32.xlu1 %v1310_v53  ;;  %v1313_v45 = vsel %vm409_vm0, %v5044_v43, 0.0  ;;  %v5051_v46 = vadd.f32 %v5004_v19, %v1268_v21  ;;  %v1178_v21 = vrot.slane %v1150_v49, %v4988_v37  ;;  %v1180_v39 = vcombine.high %v1164_v55, %v1164_v55 }
 0x201   : > { %v1316_v53 = vsel %vm409_vm0, %v5051_v46, 0.0  ;;  %v1242_v7 = vrot.slane %v1180_v39, %v4997_v47 }
 0x203   : > { %1305 = vadd.xlane.f32.xlu1 %v1304_v32 }
 0x207   : > { %1320 = vadd.xlane.f32.xlu1 %v1319_v4 }
 0x20b   : > { %1314 = vadd.xlane.f32.xlu1 %v1313_v45 }
 0x20e   : > { %v4060_v62 = vpop.f32.mrb[16].mxu1 }
 0x20f   : > { %v1273_v28 = vadd.f32 %v4060_v62, %v1226_v60  ;;  %v1052_v32 = vpop.f32.mrb[17].mxu1  ;;  %1317 = vadd.xlane.f32.xlu1 %v1316_v53  ;;  %v1182_v60 = vcombine.high %v1178_v21, %v1178_v21  ;;  %v1234_v53 = vrot.slane %v1164_v55, %v4997_v47 }
 0x210   : > { %v1271_v4 = vadd.f32 %v1218_v8, %v1052_v32  ;;  %v4061_v45 = vpop.f32.mrb[18].mxu1 }
 0x211   : > { %v1274_v11 = vadd.f32 %v4061_v45, %v1230_v50  ;;  %v1055_v12 = vpop.f32.mrb[19].mxu1  ;;  %v5061_v29 = vadd.f32 %v1282_v51, %v1273_v28  ;;  %v1246_v50 = vrot.slane %v1182_v60, %v4997_v47 }
 0x212   : > { %v1272_v36 = vadd.f32 %v1222_v44, %v1055_v12  ;;  %v5063_v18 = vadd.f32 %v1282_v51, %v1271_v4  ;;  %v1238_v12 = vrot.slane %v1178_v21, %v4997_v47 }
 0x213   : > { %v1331_v48 = vsel %vm409_vm0, %v5061_v29, 0.0  ;;  %v5067_v62 = vadd.f32 %v1282_v51, %v1274_v11 }
 0x214   : > { %v1325_v49 = vsel %vm409_vm0, %v5063_v18, 0.0  ;;  %1332 = vadd.xlane.f32.xlu1 %v1331_v48  ;;  %v5076_v45 = vadd.f32 %v1282_v51, %v1272_v36 }
 0x215   : > { %1326 = vadd.xlane.f32.xlu0 %v1325_v49  ;;  %v1334_v4 = vsel %vm409_vm0, %v5067_v62, 0.0 }
 0x216   : > { %v4064_v8 = vpop.f32.mrb[20].mxu1  ;;  %v1328_v60 = vsel %vm409_vm0, %v5076_v45, 0.0 }
 0x217   : > { %v1277_v28 = vadd.f32 %v4064_v8, %v1242_v7  ;;  %v1068_v32 = vpop.f32.mrb[21].mxu1 }
 0x218   : > { %v1275_v11 = vadd.f32 %v1234_v53, %v1068_v32  ;;  %v4065_v44 = vpop.f32.mrb[22].mxu1  ;;  %1335 = vadd.xlane.f32.xlu1 %v1334_v4 }
 0x219   : > { %v1278_v48 = vadd.f32 %v4065_v44, %v1246_v50  ;;  %v1071_v49 = vpop.f32.mrb[23].mxu1  ;;  %v5079_v39 = vadd.f32 %v1282_v51, %v1277_v28  ;;  %v5097_v28 = vadd.f32 %v5004_v19, %v5024_v5  ;;  %v4568_v50 = vmov 0  }
 0x21a   : > { %v1276_v37 = vadd.f32 %v1238_v12, %v1071_v49  ;;  %v5085_v7 = vadd.f32 %v1282_v51, %v1275_v11  ;;  %4154 = vset.pattern.permute.xlu1 %v4568_v50  ;;  %4155 = vset.pattern.permute.xlu0 %v4568_v50 }
 0x21b   : > { %v1343_v55 = vsel %vm409_vm0, %v5079_v39, 0.0  ;;  %v5091_v8 = vadd.f32 %v1282_v51, %v1278_v48 }
 0x21c   : > { %1344 = vadd.xlane.f32.xlu0 %v1343_v55  ;;  %v5087_v36 = vadd.f32 %v1282_v51, %v1276_v37  ;;  %1329 = vadd.xlane.f32.xlu1 %v1328_v60  ;;  %v1337_v53 = vsel %vm409_vm0, %v5085_v7, 0.0  ;;  %v1322_v37 = vsel %vm409_vm0, %v5097_v28, 0.0 }
 0x21d   : > { %v1346_v32 = vsel %vm409_vm0, %v5091_v8, 0.0 }
 0x21e   : > { %v1340_v21 = vsel %vm409_vm0, %v5087_v36, 0.0 }
 0x220   : > { %1341 = vadd.xlane.f32.xlu0 %v1340_v21  ;;  %1338 = vadd.xlane.f32.xlu1 %v1337_v53 }
 0x224   : > { %1347 = vadd.xlane.f32.xlu0 %v1346_v32  ;;  %1323 = vadd.xlane.f32.xlu1 %v1322_v37 }
 0x284   : > { %v1309_v51 = vpop.xlane.xlu1 %1308 }
 0x285   : > { %v1352_v4 = vmul.f32 0.03125, %v1309_v51 }
 0x287   : > { %v5104_v11 = vsub.f32 %v5008_v35, %v1352_v4 }
 0x288   : > { %v1303_v19 = vpop.xlane.xlu1 %1302 }
 0x289   : > { %v1350_v5 = vmul.f32 0.03125, %v1303_v19  ;;  %v1384_v44 = vmul.f32 %v5104_v11, %v5104_v11 }
 0x28b   : > { %v5109_v12 = vsub.f32 %v5013_v40, %v1350_v5  ;;  %v1404_v48 = vsel %vm409_vm0, %v1384_v44, 0.0 }
 0x28c   : > { %v1312_v49 = vpop.xlane.xlu1 %1311  ;;  %1405 = vadd.xlane.f32.xlu1 %v1404_v48 }
 0x28d   : > { %v1353_v55 = vmul.f32 0.03125, %v1312_v49  ;;  %v1382_v60 = vmul.f32 %v5109_v12, %v5109_v12 }
 0x28f   : > { %v5115_v21 = vsub.f32 %v5021_v52, %v1353_v55  ;;  %v1398_v35 = vsel %vm409_vm0, %v1382_v60, 0.0 }
 0x290   : > { %v1306_v53 = vpop.xlane.xlu1 %1305  ;;  %1399 = vadd.xlane.f32.xlu1 %v1398_v35 }
 0x291   : > { %v1351_v32 = vmul.f32 0.03125, %v1306_v53  ;;  %v1385_v40 = vmul.f32 %v5115_v21, %v5115_v21 }
 0x293   : > { %v5121_v37 = vsub.f32 %v5029_v25, %v1351_v32  ;;  %v1407_v50 = vsel %vm409_vm0, %v1385_v40, 0.0 }
 0x294   : > { %v1321_v51 = vpop.xlane.xlu1 %1320  ;;  %1408 = vadd.xlane.f32.xlu1 %v1407_v50 }
 0x295   : > { %v1383_v4 = vmul.f32 %v5121_v37, %v5121_v37  ;;  %v1356_v35 = vmul.f32 0.03125, %v1321_v51 }
 0x297   : > { %v1401_v52 = vsel %vm409_vm0, %v1383_v4, 0.0 }
 0x298   : > { %v1315_v19 = vpop.xlane.xlu1 %1314  ;;  %1402 = vadd.xlane.f32.xlu0 %v1401_v52 }
 0x299   : > { %v1354_v5 = vmul.f32 0.03125, %v1315_v19 }
 0x29b   : > { %v5128_v44 = vsub.f32 %v5044_v43, %v1354_v5 }
 0x29c   : > { %v1318_v48 = vpop.xlane.xlu1 %1317 }
 0x29d   : > { %v1355_v49 = vmul.f32 0.03125, %v1318_v48  ;;  %v1386_v25 = vmul.f32 %v5128_v44, %v5128_v44 }
 0x29f   : > { %v5133_v55 = vsub.f32 %v5051_v46, %v1355_v49  ;;  %v1410_v60 = vsel %vm409_vm0, %v1386_v25, 0.0  ;;  %v5143_v46 = vsub.f32 %v5036_v34, %v1356_v35 }
 0x2a0   : > { %1411 = vadd.xlane.f32.xlu1 %v1410_v60 }
 0x2a1   : > { %v1333_v53 = vpop.xlane.xlu1 %1332  ;;  %v1387_v32 = vmul.f32 %v5133_v55, %v5133_v55 }
 0x2a2   : > { %v1327_v40 = vpop.xlane.xlu0 %1326  ;;  %v1360_v50 = vmul.f32 0.03125, %v1333_v53 }
 0x2a3   : > { %v1358_v43 = vmul.f32 0.03125, %v1327_v40  ;;  %v1413_v4 = vsel %vm409_vm0, %v1387_v32, 0.0 }
 0x2a4   : > { %v5140_v52 = vsub.f32 %v5061_v29, %v1360_v50  ;;  %1414 = vadd.xlane.f32.xlu1 %v1413_v4 }
 0x2a5   : > { %v5146_v19 = vsub.f32 %v5063_v18, %v1358_v43  ;;  %v1336_v51 = vpop.xlane.xlu1 %1335  ;;  %v1388_v18 = vmul.f32 %v5143_v46, %v5143_v46 }
 0x2a6   : > { %v1361_v5 = vmul.f32 0.03125, %v1336_v51  ;;  %v1392_v48 = vmul.f32 %v5140_v52, %v5140_v52 }
 0x2a7   : > { %v1390_v49 = vmul.f32 %v5146_v19, %v5146_v19  ;;  %v1416_v51 = vsel %vm409_vm0, %v1388_v18, 0.0 }
 0x2a8   : > { %v5153_v25 = vsub.f32 %v5067_v62, %v1361_v5  ;;  %v1428_v29 = vsel %vm409_vm0, %v1392_v48, 0.0 }
 0x2a9   : > { %v1345_v60 = vpop.xlane.xlu0 %1344  ;;  %v1330_v53 = vpop.xlane.xlu1 %1329  ;;  %v1422_v34 = vsel %vm409_vm0, %v1390_v49, 0.0  ;;  %1429 = vadd.xlane.f32.xlu0 %v1428_v29 }
 0x2aa   : > { %v1364_v35 = vmul.f32 0.03125, %v1345_v60  ;;  %v1359_v32 = vmul.f32 0.03125, %v1330_v53  ;;  %1423 = vadd.xlane.f32.xlu1 %v1422_v34  ;;  %v1393_v40 = vmul.f32 %v5153_v25, %v5153_v25 }
 0x2ac   : > { %v5162_v50 = vsub.f32 %v5079_v39, %v1364_v35  ;;  %v5165_v62 = vsub.f32 %v5076_v45, %v1359_v32  ;;  %v1431_v43 = vsel %vm409_vm0, %v1393_v40, 0.0 }
 0x2ad   : > { %v1342_v4 = vpop.xlane.xlu0 %1341  ;;  %v1339_v5 = vpop.xlane.xlu1 %1338  ;;  %1432 = vadd.xlane.f32.xlu0 %v1431_v43 }
 0x2ae   : > { %1417 = vadd.xlane.f32.xlu1 %v1416_v51  ;;  %v1362_v48 = vmul.f32 0.03125, %v1339_v5  ;;  %v1391_v49 = vmul.f32 %v5165_v62, %v5165_v62  ;;  %v1363_v29 = vmul.f32 0.03125, %v1342_v4  ;;  %v1396_v45 = vmul.f32 %v5162_v50, %v5162_v50 }
 0x2b0   : > { %v5172_v60 = vsub.f32 %v5085_v7, %v1362_v48  ;;  %v1425_v39 = vsel %vm409_vm0, %v1391_v49, 0.0  ;;  %v5178_v35 = vsub.f32 %v5087_v36, %v1363_v29  ;;  %v1440_v7 = vsel %vm409_vm0, %v1396_v45, 0.0  ;;  %v596_v45 = vld [vmem:[%s368_s17 + $0x8] sm:$0xff] }
 0x2b1   : > { %v1348_v53 = vpop.xlane.xlu0 %1347  ;;  %v1324_v34 = vpop.xlane.xlu1 %1323  ;;  %1426 = vadd.xlane.f32.xlu0 %v1425_v39  ;;  %v3945_v39 = vld [vmem:[%s373_s22] ss:$0 sm:$0xff] }
 0x2b2   : > { %v1357_v18 = vmul.f32 0.03125, %v1324_v34  ;;  %v1365_v32 = vmul.f32 0.03125, %v1348_v53  ;;  %v1394_v43 = vmul.f32 %v5172_v60, %v5172_v60  ;;  %v3946_v53 = vld [vmem:[%s373_s22 + $0x1] ss:$0 sm:$0xff] }
 0x2b4   : > { %v5181_v40 = vsub.f32 %v5097_v28, %v1357_v18  ;;  %v5189_v51 = vsub.f32 %v5091_v8, %v1365_v32  ;;  %v1434_v5 = vsel %vm409_vm0, %v1394_v43, 0.0  ;;  %v1395_v28 = vmul.f32 %v5178_v35, %v5178_v35  ;;  %v595_v8 = vld [vmem:[%s368_s17] sm:$0xff]  ;;  %s6211_s17 = scalar_lea.hbm %s6262_s8, %s3978_s10 }
 0x2b5   : > { %1441 = vadd.xlane.f32.xlu0 %v1440_v7 }
 0x2b6   : > { %v1389_v4 = vmul.f32 %v5181_v40, %v5181_v40  ;;  %v1437_v48 = vsel %vm409_vm0, %v1395_v28, 0.0  ;;  %v1397_v49 = vmul.f32 %v5189_v51, %v5189_v51 }
 0x2b8   : > { %v1419_v36 = vsel %vm409_vm0, %v1389_v4, 0.0  ;;  %v1443_v29 = vsel %vm409_vm0, %v1397_v49, 0.0 }
 0x2b9   : > { %1420 = vadd.xlane.f32.xlu1 %v1419_v36  ;;  %1435 = vadd.xlane.f32.xlu0 %v1434_v5 }
 0x2bd   : > { %1438 = vadd.xlane.f32.xlu0 %v1437_v48 }
 0x2c1   : > { %1444 = vadd.xlane.f32.xlu0 %v1443_v29 }
 0x2ca   : > { %1656 = vperm.xlu1 %4154, %v595_v8  }
 0x2ce   : > { %1840 = vrot.lane.b32.xlu1 %v4977_v26, %s4569_s18 }
 0x2d2   : > { %1842 = vrot.lane.b32.xlu1 %v4981_v31, %s4569_s18 }
 0x2d6   : > { %1985 = vperm.xlu1 %4154, %v3945_v39  }
 0x2d7   : > { %1661 = vperm.xlu0 %4155, %v596_v45  }
 0x2da   : > { %1989 = vperm.xlu1 %4154, %v3946_v53  }
 0x319   : > { %v1406_v34 = vpop.xlane.xlu1 %1405 }
 0x31a   : > { %v1448_v18 = vmul.f32 0.03125, %v1406_v34 }
 0x31c   : > { %v1464_v32 = vadd.f32 1e-05, %v1448_v18 }
 0x31d   : > { %v1400_v7 = vpop.xlane.xlu1 %1399 }
 0x31e   : > { %4168 = vrsqrt.f32 %v1464_v32  ;;  %v1446_v43 = vmul.f32 0.03125, %v1400_v7 }
 0x320   : > { %v1462_v4 = vadd.f32 1e-05, %v1446_v43 }
 0x321   : > { %v1409_v36 = vpop.xlane.xlu1 %1408 }
 0x322   : > { %4170 = vrsqrt.f32 %v1462_v4  ;;  %v1449_v5 = vmul.f32 0.03125, %v1409_v36 }
 0x324   : > { %v1465_v28 = vadd.f32 1e-05, %v1449_v5 }
 0x325   : > { %v1403_v48 = vpop.xlane.xlu0 %1402 }
 0x326   : > { %4172 = vrsqrt.f32 %v1465_v28  ;;  %v1447_v49 = vmul.f32 0.03125, %v1403_v48 }
 0x328   : > { %v4169_v29 = vpop.eup %4168  ;;  %v1463_v8 = vadd.f32 1e-05, %v1447_v49 }
 0x329   : > { %v1496_v39 = vmul.f32 %v4169_v29, %v5104_v11 }
 0x32a   : > { %4174 = vrsqrt.f32 %v1463_v8 }
 0x32b   : > { %v1512_v45 = vmax.f32 %v1496_v39, 0.0 }
 0x32c   : > { %v4171_v53 = vpop.eup %4170 }
 0x32d   : > { %v5213_v34 = vadd.f32 %v4922_v56, %v1512_v45  ;;  %v1494_v18 = vmul.f32 %v4171_v53, %v5109_v12  ;;  %v1412_v32 = vpop.xlane.xlu1 %1411 }
 0x32e   : > { %v1450_v7 = vmul.f32 0.03125, %v1412_v32 }
 0x32f   : > { %6319 = vst [vmem:[#allocation10_spill] sm:$0xff] %v5213_v34  ;;  %v1544_v43 = vsub.f32 0.0, %v5213_v34  ;;  %v1510_v4 = vmax.f32 %v1494_v18, 0.0 }
 0x330   : > { %v4173_v36 = vpop.eup %4172  ;;  %v1466_v5 = vadd.f32 1e-05, %v1450_v7 }
 0x331   : > { %v1562_v28 = vmul.f32 1.442695, %v1544_v43  ;;  %v5218_v48 = vadd.f32 %v1510_v4, %v4924_v57  ;;  %v1497_v11 = vmul.f32 %v4173_v36, %v5115_v21  ;;  %v1415_v49 = vpop.xlane.xlu1 %1414 }
 0x332   : > { %4176 = vrsqrt.f32 %v1466_v5  ;;  %v1451_v29 = vmul.f32 0.03125, %v1415_v49 }
 0x333   : > { %4178 = vpow2.f32 %v1562_v28  ;;  %v1542_v56 = vsub.f32 0.0, %v5218_v48  ;;  %v1513_v12 = vmax.f32 %v1497_v11, 0.0 }
 0x334   : > { %v4175_v8 = vpop.eup %4174  ;;  %v1467_v39 = vadd.f32 1e-05, %v1451_v29 }
 0x335   : > { %v1558_v45 = vmul.f32 1.442695, %v1542_v56  ;;  %v5223_v53 = vadd.f32 %v4926_v58, %v1513_v12  ;;  %v1495_v18 = vmul.f32 %v4175_v8, %v5121_v37 }
 0x336   : > { %4180 = vrsqrt.f32 %v1467_v39  ;;  %v1430_v57 = vpop.xlane.xlu0 %1429 }
 0x337   : > { %6320 = vst [vmem:[#allocation11_spill] sm:$0xff] %v5223_v53  ;;  %4182 = vpow2.f32 %v1558_v45  ;;  %v1545_v21 = vsub.f32 0.0, %v5223_v53  ;;  %v1511_v32 = vmax.f32 %v1495_v18, 0.0  ;;  %v1424_v7 = vpop.xlane.xlu1 %1423  ;;  %v1456_v43 = vmul.f32 0.03125, %v1430_v57 }
 0x338   : > { %v1454_v4 = vmul.f32 0.03125, %v1424_v7 }
 0x339   : > { %v1564_v36 = vmul.f32 1.442695, %v1545_v21  ;;  %v5228_v5 = vadd.f32 %v1511_v32, %v4930_v61  ;;  %v1472_v28 = vadd.f32 1e-05, %v1456_v43 }
 0x33a   : > { %v1470_v11 = vadd.f32 1e-05, %v1454_v4  ;;  %v1433_v49 = vpop.xlane.xlu0 %1432 }
 0x33b   : > { %6321 = vst [vmem:[#allocation12_spill] sm:$0xff] %v5228_v5  ;;  %4184 = vpow2.f32 %v1564_v36  ;;  %v1543_v58 = vsub.f32 0.0, %v5228_v5  ;;  %v1418_v37 = vpop.xlane.xlu1 %1417  ;;  %v1457_v29 = vmul.f32 0.03125, %v1433_v49 }
 0x33c   : > { %v4177_v56 = vpop.eup %4176  ;;  %4186 = vrsqrt.f32 %v1470_v11  ;;  %v1452_v12 = vmul.f32 0.03125, %v1418_v37 }
 0x33d   : > { %v4179_v8 = vpop.eup %4178  ;;  %v1560_v39 = vmul.f32 1.442695, %v1543_v58  ;;  %v1498_v45 = vmul.f32 %v4177_v56, %v5128_v44  ;;  %4188 = vrsqrt.f32 %v1472_v28  ;;  %v1473_v61 = vadd.f32 1e-05, %v1457_v29 }
 0x33e   : > { %v1592_v18 = vadd.f32 1.0, %v4179_v8  ;;  %v1468_v57 = vadd.f32 1e-05, %v1452_v12  ;;  %v1427_v21 = vpop.xlane.xlu0 %1426 }
 0x33f   : > { %4190 = vpow2.f32 %v1560_v39  ;;  %v1514_v32 = vmax.f32 %v1498_v45, 0.0  ;;  %v1455_v7 = vmul.f32 0.03125, %v1427_v21 }
 0x340   : > { %v4181_v43 = vpop.eup %4180  ;;  %4192 = vrcp.f32 %v1592_v18 }
 0x341   : > { %v4183_v4 = vpop.eup %4182  ;;  %v5233_v36 = vadd.f32 %v1514_v32, %v4938_v1  ;;  %v1499_v11 = vmul.f32 %v4181_v43, %v5133_v55  ;;  %4194 = vrsqrt.f32 %v1468_v57  ;;  %v1471_v49 = vadd.f32 1e-05, %v1455_v7 }
 0x342   : > { %v1590_v58 = vadd.f32 1.0, %v4183_v4  ;;  %4196 = vrsqrt.f32 %v1473_v61  ;;  %v1442_v44 = vpop.xlane.xlu0 %1441 }
 0x343   : > { %6322 = vst [vmem:[#allocation13_spill] sm:$0xff] %v5233_v36  ;;  %v1546_v28 = vsub.f32 0.0, %v5233_v36  ;;  %v1515_v37 = vmax.f32 %v1499_v11, 0.0  ;;  %4198 = vrsqrt.f32 %v1471_v49  ;;  %v1460_v29 = vmul.f32 0.03125, %v1442_v44 }
 0x344   : > { %4200 = vrcp.f32 %v1590_v58 }
 0x345   : > { %v4185_v56 = vpop.eup %4184  ;;  %v1566_v12 = vmul.f32 1.442695, %v1546_v28  ;;  %v5238_v8 = vadd.f32 %v1515_v37, %v4944_v6  ;;  %v1476_v1 = vadd.f32 1e-05, %v1460_v29 }
 0x346   : > { %v4187_v39 = vpop.eup %4186  ;;  %v1593_v45 = vadd.f32 1.0, %v4185_v56  ;;  %v1421_v55 = vpop.xlane.xlu1 %1420 }
 0x347   : > { %6323 = vst [vmem:[#allocation14_spill] sm:$0xff] %v5238_v8  ;;  %v1436_v18 = vpop.xlane.xlu0 %1435  ;;  %v4189_v57 = vpop.eup %4188  ;;  %4202 = vpow2.f32 %v1566_v12  ;;  %v1547_v61 = vsub.f32 0.0, %v5238_v8  ;;  %v1502_v21 = vmul.f32 %v4187_v39, %v5146_v19  ;;  %v1453_v32 = vmul.f32 0.03125, %v1421_v55 }
 0x348   : > { %4204 = vrcp.f32 %v1593_v45  ;;  %v1504_v7 = vmul.f32 %v4189_v57, %v5140_v52  ;;  %v1458_v43 = vmul.f32 0.03125, %v1436_v18 }
 0x349   : > { %v4191_v4 = vpop.eup %4190  ;;  %v1568_v11 = vmul.f32 1.442695, %v1547_v61  ;;  %v1518_v6 = vmax.f32 %v1502_v21, 0.0  ;;  %4206 = vrsqrt.f32 %v1476_v1  ;;  %v1469_v28 = vadd.f32 1e-05, %v1453_v32 }
 0x34a   : > { %v4193_v49 = vpop.eup %4192  ;;  %v1591_v58 = vadd.f32 1.0, %v4191_v4  ;;  %v1520_v44 = vmax.f32 %v1504_v7, 0.0  ;;  %v1474_v37 = vadd.f32 1e-05, %v1458_v43 }
 0x34b   : > { %v1439_v29 = vpop.xlane.xlu0 %1438  ;;  %v4195_v56 = vpop.eup %4194  ;;  %v1626_v12 = vmul.f32 1.442695, %v4193_v49  ;;  %4208 = vpow2.f32 %v1568_v11  ;;  %v5244_v19 = vadd.f32 %v1518_v6, %v4952_v10 }
 0x34c   : > { %v1459_v39 = vmul.f32 0.03125, %v1439_v29  ;;  %v4197_v45 = vpop.eup %4196  ;;  %4210 = vrcp.f32 %v1591_v58  ;;  %v5247_v52 = vadd.f32 %v4950_v9, %v1520_v44  ;;  %v1500_v1 = vmul.f32 %v4195_v56, %v5143_v46 }
 0x34d   : > { %6324 = vst [vmem:[#allocation15_spill] sm:$0xff] %v5244_v19  ;;  %v4199_v55 = vpop.eup %4198  ;;  %4212 = vpow2.f32 %v1626_v12  ;;  %v1550_v18 = vsub.f32 0.0, %v5244_v19  ;;  %v1505_v57 = vmul.f32 %v4197_v45, %v5153_v25 }
 0x34e   : > { %6325 = vst [vmem:[#allocation16_spill] sm:$0xff] %v5247_v52  ;;  %v1475_v61 = vadd.f32 1e-05, %v1459_v39  ;;  %v4201_v21 = vpop.eup %4200  ;;  %v1552_v32 = vsub.f32 0.0, %v5247_v52  ;;  %v1516_v10 = vmax.f32 %v1500_v1, 0.0  ;;  %v1503_v7 = vmul.f32 %v4199_v55, %v5165_v62 }
 0x34f   : > { %4214 = vrsqrt.f32 %v1469_v28  ;;  %v1622_v43 = vmul.f32 1.442695, %v4201_v21  ;;  %v1574_v4 = vmul.f32 1.442695, %v1550_v18  ;;  %v1521_v9 = vmax.f32 %v1505_v57, 0.0  ;;  %v1445_v49 = vpop.xlane.xlu0 %1444 }
 0x350   : > { %4216 = vrsqrt.f32 %v1474_v37  ;;  %v1578_v11 = vmul.f32 1.442695, %v1552_v32  ;;  %v5255_v46 = vadd.f32 %v4936_v63, %v1516_v10  ;;  %v1519_v6 = vmax.f32 %v1503_v7, 0.0  ;;  %v5267_v10 = vpop.permute.xlu1 %1656 }
 0x351   : > { %4218 = vrsqrt.f32 %v1475_v61  ;;  %v4203_v25 = vpop.eup %4202  ;;  %v5258_v58 = vadd.f32 %v4956_v14, %v1521_v9  ;;  %v1461_v12 = vmul.f32 0.03125, %v1445_v49  ;;  %6329 = vst [vmem:[#allocation20_spill] sm:$0xff] %v5267_v10 }
 0x352   : > { %6326 = vst [vmem:[#allocation17_spill] sm:$0xff] %v5255_v46  ;;  %4220 = vpow2.f32 %v1622_v43  ;;  %v4205_v44 = vpop.eup %4204  ;;  %v1594_v29 = vadd.f32 1.0, %v4203_v25  ;;  %v1548_v62 = vsub.f32 0.0, %v5255_v46  ;;  %v5262_v28 = vadd.f32 %v1519_v6, %v4962_v16 }
 0x353   : > { %6327 = vst [vmem:[#allocation18_spill] sm:$0xff] %v5258_v58  ;;  %4222 = vpow2.f32 %v1574_v4  ;;  %v4207_v37 = vpop.eup %4206  ;;  %v1628_v56 = vmul.f32 1.442695, %v4205_v44  ;;  %v1553_v63 = vsub.f32 0.0, %v5258_v58  ;;  %v1477_v7 = vadd.f32 1e-05, %v1461_v12 }
 0x354   : > { %6328 = vst [vmem:[#allocation19_spill] sm:$0xff] %v5262_v28  ;;  %4224 = vpow2.f32 %v1578_v11  ;;  %v1570_v39 = vmul.f32 1.442695, %v1548_v62  ;;  %v1551_v45 = vsub.f32 0.0, %v5262_v28  ;;  %v1508_v14 = vmul.f32 %v4207_v37, %v5162_v50 }
 0x355   : > { %4226 = vrcp.f32 %v1594_v29  ;;  %v4209_v1 = vpop.eup %4208  ;;  %v1580_v55 = vmul.f32 1.442695, %v1553_v63 }
 0x356   : > { %4228 = vpow2.f32 %v1628_v56  ;;  %v4211_v18 = vpop.eup %4210  ;;  %v1595_v57 = vadd.f32 1.0, %v4209_v1  ;;  %v1576_v16 = vmul.f32 1.442695, %v1551_v45  ;;  %v1524_v61 = vmax.f32 %v1508_v14, 0.0 }
 0x357   : > { %4230 = vpow2.f32 %v1570_v39  ;;  %v4213_v21 = vpop.eup %4212  ;;  %v1624_v32 = vmul.f32 1.442695, %v4211_v18 }
 0x358   : > { %4232 = vpow2.f32 %v1580_v55  ;;  %v5270_v4 = vadd.f32 %v4954_v13, %v1524_v61  ;;  %v5273_v50 = vmul.f32 %v4213_v21, %v5267_v10 }
 0x359   : > { %v4215_v43 = vpop.eup %4214  ;;  %4234 = vrcp.f32 %v1595_v57 }
 0x35a   : > { %6330 = vst [vmem:[#allocation21_spill] sm:$0xff] %v5270_v4  ;;  %v4217_v9 = vpop.eup %4216  ;;  %4236 = vpow2.f32 %v1624_v32  ;;  %v1501_v11 = vmul.f32 %v4215_v43, %v5181_v40  ;;  %v1556_v49 = vsub.f32 0.0, %v5270_v4  ;;  %v1694_v44 = vsel %vm409_vm0, %v5273_v50, 0.0 }
 0x35b   : > { %v4219_v6 = vpop.eup %4218  ;;  %4238 = vpow2.f32 %v1576_v16  ;;  %v1506_v25 = vmul.f32 %v4217_v9, %v5172_v60  ;;  %v1695_v37 = vrot.slane %v1694_v44, 4 }
 0x35c   : > { %v4221_v29 = vpop.eup %4220  ;;  %v1517_v62 = vmax.f32 %v1501_v11, 0.0  ;;  %v1507_v13 = vmul.f32 %v4219_v6, %v5178_v35  ;;  %4240 = vrsqrt.f32 %v1477_v7  ;;  %v1586_v63 = vmul.f32 1.442695, %v1556_v49 }
 0x35d   : > { %v4223_v56 = vpop.eup %4222  ;;  %v1522_v12 = vmax.f32 %v1506_v25, 0.0  ;;  %v5282_v40 = vmul.f32 %v4221_v29, %v5267_v10  ;;  %v1696_v1 = vadd.f32 %v1695_v37, %v1694_v44 }
 0x35e   : > { %v4225_v39 = vpop.eup %4224  ;;  %v1598_v45 = vadd.f32 1.0, %v4223_v56  ;;  %v5285_v14 = vadd.f32 %v4940_v2, %v1517_v62  ;;  %v1523_v60 = vmax.f32 %v1507_v13, 0.0  ;;  %4242 = vpow2.f32 %v1586_v63 }
 0x35f   : > { %v4227_v55 = vpop.eup %4226  ;;  %v1600_v18 = vadd.f32 1.0, %v4225_v39  ;;  %v5288_v35 = vadd.f32 %v1522_v12, %v4958_v15  ;;  %v1680_v57 = vsel %vm409_vm0, %v5282_v40, 0.0  ;;  %v1697_v9 = vrot.slane %v1696_v1, 2 }
 0x360   : > { %6331 = vst [vmem:[#allocation22_spill] sm:$0xff] %v5285_v14  ;;  %v4229_v16 = vpop.eup %4228  ;;  %v1630_v61 = vmul.f32 1.442695, %v4227_v55  ;;  %4244 = vrcp.f32 %v1598_v45  ;;  %v1549_v21 = vsub.f32 0.0, %v5285_v14  ;;  %v5294_v32 = vadd.f32 %v1523_v60, %v4970_v22 }
 0x361   : > { %6332 = vst [vmem:[#allocation23_spill] sm:$0xff] %v5288_v35  ;;  %v4231_v2 = vpop.eup %4230  ;;  %4246 = vrcp.f32 %v1600_v18  ;;  %v1554_v7 = vsub.f32 0.0, %v5288_v35  ;;  %v1681_v43 = vrot.slane %v1680_v57, 4  ;;  %v1698_v29 = vadd.f32 %v1697_v9, %v1696_v1 }
 0x362   : > { %6333 = vst [vmem:[#allocation24_spill] sm:$0xff] %v5294_v32  ;;  %v4233_v11 = vpop.eup %4232  ;;  %4248 = vpow2.f32 %v1630_v61  ;;  %v1596_v15 = vadd.f32 1.0, %v4231_v2  ;;  %v1555_v6 = vsub.f32 0.0, %v5294_v32  ;;  %v1572_v25 = vmul.f32 1.442695, %v1549_v21 }
 0x363   : > { %v4235_v49 = vpop.eup %4234  ;;  %v1682_v44 = vadd.f32 %v1681_v43, %v1680_v57  ;;  %v1601_v22 = vadd.f32 1.0, %v4233_v11  ;;  %v5299_v37 = vmul.f32 %v4229_v16, %v5267_v10  ;;  %v1582_v63 = vmul.f32 1.442695, %v1554_v7 }
 0x364   : > { %v4237_v62 = vpop.eup %4236  ;;  %v1632_v13 = vmul.f32 1.442695, %v4235_v49  ;;  %4250 = vrcp.f32 %v1596_v15  ;;  %v1699_v39 = vrot.slane %v1698_v29, 1  ;;  %v1584_v18 = vmul.f32 1.442695, %v1555_v6 }
 0x365   : > { %v4239_v56 = vpop.eup %4238  ;;  %v1683_v12 = vrot.slane %v1682_v44, 2  ;;  %v5302_v45 = vmul.f32 %v4237_v62, %v5267_v10  ;;  %v1701_v1 = vsel %vm409_vm0, %v5299_v37, 0.0 }
 0x366   : > { %v4241_v60 = vpop.eup %4240  ;;  %4252 = vpow2.f32 %v1632_v13  ;;  %v1599_v55 = vadd.f32 1.0, %v4239_v56  ;;  %v1700_v61 = vadd.f32 %v1699_v39, %v1698_v29  ;;  %v1702_v7 = vrot.slane %v1701_v1, 4 }
 0x367   : > { %4254 = vpow2.f32 %v1572_v25  ;;  %v1684_v57 = vadd.f32 %v1683_v12, %v1682_v44  ;;  %v1687_v16 = vsel %vm409_vm0, %v5302_v45, 0.0  ;;  %v1509_v2 = vmul.f32 %v4241_v60, %v5189_v51 }
 0x368   : > { %4256 = vrcp.f32 %v1599_v55  ;;  %v1688_v21 = vrot.slane %v1687_v16, 4  ;;  %v4243_v43 = vpop.eup %4242  ;;  %v1794_v11 = vmax.f32 %v1700_v61, 1e-12  ;;  %v1703_v29 = vadd.f32 %v1702_v7, %v1701_v1 }
 0x369   : > { %4258 = vpow2.f32 %v1582_v63  ;;  %v1685_v9 = vrot.slane %v1684_v57, 1  ;;  %v1525_v49 = vmax.f32 %v1509_v2, 0.0  ;;  %v1604_v56 = vadd.f32 1.0, %v4243_v43 }
 0x36a   : > { %v4245_v15 = vpop.eup %4244  ;;  %4260 = vpow2.f32 %v1584_v18  ;;  %v1689_v6 = vadd.f32 %v1688_v21, %v1687_v16  ;;  %v1704_v60 = vrot.slane %v1703_v29, 2 }
 0x36b   : > { %v4247_v62 = vpop.eup %4246  ;;  %v1638_v25 = vmul.f32 1.442695, %v4245_v15  ;;  %v1686_v44 = vadd.f32 %v1685_v9, %v1684_v57  ;;  %4262 = vrcp.f32 %v1794_v11  ;;  %v5310_v51 = vadd.f32 %v4964_v17, %v1525_v49 }
 0x36c   : > { %v4249_v13 = vpop.eup %4248  ;;  %4264 = vrcp.f32 %v1601_v22  ;;  %v1690_v12 = vrot.slane %v1689_v6, 2  ;;  %v1642_v18 = vmul.f32 1.442695, %v4247_v62  ;;  %v1705_v1 = vadd.f32 %v1704_v60, %v1703_v29 }
 0x36d   : > { %6334 = vst [vmem:[#allocation25_spill] sm:$0xff] %v5310_v51  ;;  %4266 = vpow2.f32 %v1638_v25  ;;  %v1792_v63 = vmax.f32 %v1686_v44, 1e-12  ;;  %v5313_v39 = vmul.f32 %v4249_v13, %v5267_v10  ;;  %v1557_v57 = vsub.f32 0.0, %v5310_v51 }
 0x36e   : > { %v4251_v55 = vpop.eup %4250  ;;  %v1691_v61 = vadd.f32 %v1690_v12, %v1689_v6  ;;  %v1706_v11 = vrot.slane %v1705_v1, 1 }
 0x36f   : > { %v1634_v16 = vmul.f32 1.442695, %v4251_v55  ;;  %4268 = vrcp.f32 %v1792_v63  ;;  %v1708_v22 = vsel %vm409_vm0, %v5313_v39, 0.0  ;;  %v1588_v2 = vmul.f32 1.442695, %v1557_v57 }
 0x370   : > { %v4253_v21 = vpop.eup %4252  ;;  %4270 = vrcp.f32 %v1604_v56  ;;  %v1692_v17 = vrot.slane %v1691_v61, 1  ;;  %v1709_v7 = vrot.slane %v1708_v22, 4  ;;  %v1707_v29 = vadd.f32 %v1706_v11, %v1705_v1  ;;  %v5324_v1 = vpop.permute.xlu0 %1661 }
 0x371   : > { %v4255_v43 = vpop.eup %4254  ;;  %4272 = vpow2.f32 %v1634_v16  ;;  %v5319_v9 = vmul.f32 %v4253_v21, %v5267_v10 }
 0x372   : > { %v4257_v15 = vpop.eup %4256  ;;  %4274 = vpow2.f32 %v1642_v18  ;;  %v1597_v6 = vadd.f32 1.0, %v4255_v43  ;;  %v1693_v49 = vadd.f32 %v1692_v17, %v1691_v61  ;;  %v1710_v62 = vadd.f32 %v1709_v7, %v1708_v22  ;;  %v5326_v7 = vpop.permute.xlu1 %1840 }
 0x373   : > { %v4259_v25 = vpop.eup %4258  ;;  %v1640_v44 = vmul.f32 1.442695, %v4257_v15  ;;  %4276 = vpow2.f32 %v1588_v2  ;;  %v1715_v13 = vsel %vm409_vm0, %v5319_v9, 0.0  ;;  %v1795_v21 = vmax.f32 %v1707_v29, 1e-12 }
 0x374   : > { %v4261_v56 = vpop.eup %4260  ;;  %4278 = vrcp.f32 %v1597_v6  ;;  %v1602_v12 = vadd.f32 1.0, %v4259_v25  ;;  %v1793_v63 = vmax.f32 %v1693_v49, 1e-12  ;;  %v1711_v60 = vrot.slane %v1710_v62, 2 }
 0x375   : > { %v4263_v55 = vpop.eup %4262  ;;  %4280 = vpow2.f32 %v1640_v44  ;;  %v1603_v57 = vadd.f32 1.0, %v4261_v56  ;;  %v1716_v16 = vrot.slane %v1715_v13, 4 }
 0x376   : > { %v4265_v18 = vpop.eup %4264  ;;  %4282 = vrcp.f32 %v1602_v12  ;;  %v1826_v61 = vmul.f32 %v4263_v55, %v5273_v50  ;;  %v1712_v22 = vadd.f32 %v1711_v60, %v1710_v62 }
 0x377   : > { %v4267_v17 = vpop.eup %4266  ;;  %4284 = vrcp.f32 %v1603_v57  ;;  %v1717_v2 = vadd.f32 %v1716_v16, %v1715_v13  ;;  %v1644_v15 = vmul.f32 1.442695, %v4265_v18 }
 0x378   : > { %4286 = vrcp.f32 %v1793_v63  ;;  %v1713_v43 = vrot.slane %v1712_v22, 1  ;;  %v1848_v6 = vmul.f32 %v5326_v7, %v1826_v61  ;;  %v5331_v62 = vmul.f32 %v4267_v17, %v5324_v1 }
 0x379   : > { %v4269_v11 = vpop.eup %4268  ;;  %v1718_v49 = vrot.slane %v1717_v2, 2  ;;  %4288 = vrcp.f32 %v1795_v21 }
 0x37a   : > { %v4271_v25 = vpop.eup %4270  ;;  %v1824_v44 = vmul.f32 %v4269_v11, %v5282_v40  ;;  %v1714_v50 = vadd.f32 %v1713_v43, %v1712_v22  ;;  %4290 = vpow2.f32 %v1644_v15  ;;  %v1876_v16 = vsel %vm409_vm0, %v1848_v6, 0.0 }
 0x37b   : > { %v4273_v29 = vpop.eup %4272  ;;  %v1719_v56 = vadd.f32 %v1718_v49, %v1717_v2  ;;  %v1736_v22 = vsel %vm409_vm0, %v5331_v62, 0.0  ;;  %v1877_v15 = vrot.slane %v1876_v16, 4 }
 0x37c   : > { %v4275_v13 = vpop.eup %4274  ;;  %v1846_v12 = vmul.f32 %v5326_v7, %v1824_v44  ;;  %v5335_v63 = vmul.f32 %v4273_v29, %v5267_v10  ;;  %v1796_v60 = vmax.f32 %v1714_v50, 1e-12 }
 0x37d   : > { %v4277_v55 = vpop.eup %4276  ;;  %v1720_v57 = vrot.slane %v1719_v56, 1  ;;  %v5347_v44 = vmul.f32 %v4275_v13, %v5324_v1  ;;  %v1878_v13 = vadd.f32 %v1877_v15, %v1876_v16 }
 0x37e   : > { %v4279_v40 = vpop.eup %4278  ;;  %v1605_v18 = vadd.f32 1.0, %v4277_v55  ;;  %v1722_v61 = vsel %vm409_vm0, %v5335_v63, 0.0  ;;  %4292 = vrcp.f32 %v1796_v60  ;;  %v1862_v2 = vsel %vm409_vm0, %v1846_v12, 0.0 }
 0x37f   : > { %v4281_v21 = vpop.eup %4280  ;;  %v1636_v17 = vmul.f32 1.442695, %v4279_v40  ;;  %v1721_v43 = vadd.f32 %v1720_v57, %v1719_v56  ;;  %v1723_v11 = vrot.slane %v1722_v61, 4  ;;  %v1650_v40 = vmul.f32 1.442695, %v4271_v25 }
 0x380   : > { %v4283_v49 = vpop.eup %4282  ;;  %4294 = vrcp.f32 %v1605_v18  ;;  %v5344_v6 = vmul.f32 %v4281_v21, %v5324_v1  ;;  %v1863_v51 = vrot.slane %v1862_v2, 4  ;;  %v1737_v12 = vrot.slane %v1736_v22, 4 }
 0x381   : > { %v4285_v50 = vpop.eup %4284  ;;  %4296 = vpow2.f32 %v1636_v17  ;;  %v1646_v29 = vmul.f32 1.442695, %v4283_v49  ;;  %v1724_v60 = vadd.f32 %v1723_v11, %v1722_v61  ;;  %v1797_v55 = vmax.f32 %v1721_v43, 1e-12 }
 0x382   : > { %v4287_v47 = vpop.eup %4286  ;;  %v1743_v18 = vsel %vm409_vm0, %v5344_v6, 0.0  ;;  %v1648_v4 = vmul.f32 1.442695, %v4285_v50  ;;  %v1750_v17 = vsel %vm409_vm0, %v5347_v44, 0.0  ;;  %v1864_v11 = vadd.f32 %v1863_v51, %v1862_v2 }
 0x383   : > { %4298 = vpow2.f32 %v1646_v29  ;;  %v1825_v56 = vmul.f32 %v4287_v47, %v5302_v45  ;;  %v1725_v57 = vrot.slane %v1724_v60, 2  ;;  %v4289_v21 = vpop.eup %4288  ;;  %v1738_v49 = vadd.f32 %v1737_v12, %v1736_v22 }
 0x384   : > { %4300 = vrcp.f32 %v1797_v55  ;;  %v1827_v25 = vmul.f32 %v4289_v21, %v5299_v37  ;;  %v1744_v29 = vrot.slane %v1743_v18, 4  ;;  %v4291_v47 = vpop.eup %4290  ;;  %v1879_v35 = vrot.slane %v1878_v13, 2 }
 0x385   : > { %v1847_v61 = vmul.f32 %v5326_v7, %v1825_v56  ;;  %v1726_v43 = vadd.f32 %v1725_v57, %v1724_v60  ;;  %4302 = vpow2.f32 %v1650_v40  ;;  %v1751_v58 = vrot.slane %v1750_v17, 4 }
 0x386   : > { %v1849_v50 = vmul.f32 %v5326_v7, %v1827_v25  ;;  %4304 = vpow2.f32 %v1648_v4  ;;  %v1745_v51 = vadd.f32 %v1744_v29, %v1743_v18  ;;  %v1865_v2 = vrot.slane %v1864_v11, 2 }
 0x387   : > { %v1869_v45 = vsel %vm409_vm0, %v1847_v61, 0.0  ;;  %v1727_v32 = vrot.slane %v1726_v43, 1  ;;  %v1739_v40 = vrot.slane %v1738_v49, 2  ;;  %v5367_v18 = vmul.f32 %v4291_v47, %v5324_v1 }
 0x388   : > { %v4293_v16 = vpop.eup %4292  ;;  %v1870_v15 = vrot.slane %v1869_v45, 4  ;;  %v1883_v37 = vsel %vm409_vm0, %v1849_v50, 0.0  ;;  %v1752_v29 = vadd.f32 %v1751_v58, %v1750_v17  ;;  %v1866_v50 = vadd.f32 %v1865_v2, %v1864_v11 }
 0x389   : > { %v1728_v56 = vadd.f32 %v1727_v32, %v1726_v43  ;;  %v1828_v60 = vmul.f32 %v4293_v16, %v5313_v39  ;;  %v1884_v25 = vrot.slane %v1883_v37, 4  ;;  %v1746_v32 = vrot.slane %v1745_v51, 2 }
 0x38a   : > { %v4295_v22 = vpop.eup %4294  ;;  %v1871_v55 = vadd.f32 %v1870_v15, %v1869_v45  ;;  %v5364_v39 = vadd.f32 %v1879_v35, %v1878_v13  ;;  %v1740_v16 = vadd.f32 %v1739_v40, %v1738_v49  ;;  %v1753_v17 = vrot.slane %v1752_v29, 2 }
 0x38b   : > { %v4297_v12 = vpop.eup %4296  ;;  %v1652_v57 = vmul.f32 1.442695, %v4295_v22  ;;  %v1798_v21 = vmax.f32 %v1728_v56, 1e-12  ;;  %v1850_v61 = vmul.f32 %v5326_v7, %v1828_v60  ;;  %v1885_v60 = vadd.f32 %v1884_v25, %v1883_v37 }
 0x38c   : > { %v5362_v4 = vmul.f32 %v4297_v12, %v5267_v10  ;;  %v1872_v52 = vrot.slane %v1871_v55, 2  ;;  %v1747_v13 = vadd.f32 %v1746_v32, %v1745_v51  ;;  %v1867_v2 = vrot.slane %v1866_v50, 1 }
 0x38d   : > { %v4299_v43 = vpop.eup %4298  ;;  %4306 = vpow2.f32 %v1652_v57  ;;  %v1890_v22 = vsel %vm409_vm0, %v1850_v61, 0.0  ;;  %v1741_v40 = vrot.slane %v1740_v16, 1 }
 0x38e   : > { %v1729_v45 = vsel %vm409_vm0, %v5362_v4, 0.0  ;;  %4308 = vrcp.f32 %v1798_v21  ;;  %v4301_v15 = vpop.eup %4300  ;;  %v1873_v57 = vadd.f32 %v1872_v52, %v1871_v55  ;;  %v5374_v35 = vmul.f32 %v4299_v43, %v5324_v1 }
 0x38f   : > { %v1730_v56 = vrot.slane %v1729_v45, 4  ;;  %v1829_v12 = vmul.f32 %v4301_v15, %v5319_v9  ;;  %v4303_v47 = vpop.eup %4302  ;;  %v1757_v21 = vsel %vm409_vm0, %v5367_v18, 0.0  ;;  %v1886_v9 = vrot.slane %v1885_v60, 2 }
 0x390   : > { %v4305_v11 = vpop.eup %4304  ;;  %v1891_v52 = vrot.slane %v1890_v22, 4  ;;  %v1758_v55 = vrot.slane %v1757_v21, 4  ;;  %v1874_v25 = vrot.slane %v1873_v57, 1  ;;  %v1748_v32 = vrot.slane %v1747_v13, 1 }
 0x391   : > { %v1731_v58 = vadd.f32 %v1730_v56, %v1729_v45  ;;  %v1851_v49 = vmul.f32 %v5326_v7, %v1829_v12  ;;  %v1764_v43 = vsel %vm409_vm0, %v5374_v35, 0.0  ;;  %v5384_v56 = vmul.f32 %v4303_v47, %v5324_v1 }
 0x392   : > { %v1754_v12 = vadd.f32 %v1753_v17, %v1752_v29  ;;  %v5386_v10 = vadd.f32 %v1867_v2, %v1866_v50  ;;  %v5389_v37 = vmul.f32 %v4305_v11, %v5324_v1  ;;  %v1759_v28 = vadd.f32 %v1758_v55, %v1757_v21 }
 0x393   : > { %v1732_v61 = vrot.slane %v1731_v58, 2  ;;  %v1897_v51 = vsel %vm409_vm0, %v1851_v49, 0.0  ;;  %v1765_v19 = vrot.slane %v1764_v43, 4  ;;  %v5391_v49 = vadd.f32 %v1886_v9, %v1885_v60 }
 0x394   : > { %v1898_v15 = vrot.slane %v1897_v51, 4  ;;  %v1892_v8 = vadd.f32 %v1891_v52, %v1890_v22  ;;  %v1742_v36 = vadd.f32 %v1741_v40, %v1740_v16  ;;  %v1760_v34 = vrot.slane %v1759_v28, 2 }
 0x395   : > { %v1733_v45 = vadd.f32 %v1732_v61, %v1731_v58  ;;  %v1875_v58 = vadd.f32 %v1874_v25, %v1873_v57  ;;  %v1749_v61 = vadd.f32 %v1748_v32, %v1747_v13  ;;  %v1766_v47 = vadd.f32 %v1765_v19, %v1764_v43  ;;  %v5405_v43 = vpop.permute.xlu1 %1842 }
 0x396   : > { %v1899_v50 = vadd.f32 %v1898_v15, %v1897_v51  ;;  %v1755_v17 = vrot.slane %v1754_v12, 1  ;;  %v1761_v11 = vadd.f32 %v1760_v34, %v1759_v28  ;;  %v1771_v21 = vsel %vm409_vm0, %v5389_v37, 0.0 }
 0x397   : > { %v4307_v14 = vpop.eup %4306  ;;  %v1734_v46 = vrot.slane %v1733_v45, 1  ;;  %v1767_v2 = vrot.slane %v1766_v47, 2  ;;  %v1778_v60 = vsel %vm409_vm0, %v5384_v56, 0.0  ;;  %v1893_v57 = vrot.slane %v1892_v8, 2 }
 0x398   : > { %v4309_v53 = vpop.eup %4308  ;;  %v5400_v13 = vmul.f32 %v4307_v14, %v5324_v1  ;;  %v1762_v19 = vrot.slane %v1761_v11, 1  ;;  %v1900_v34 = vrot.slane %v1899_v50, 2  ;;  %v1756_v40 = vadd.f32 %v1755_v17, %v1754_v12 }
 0x399   : > { %v1735_v5 = vadd.f32 %v1734_v46, %v1733_v45  ;;  %v1830_v29 = vmul.f32 %v4309_v53, %v5335_v63  ;;  %v1768_v46 = vadd.f32 %v1767_v2, %v1766_v47  ;;  %v1772_v53 = vrot.slane %v1771_v21, 4 }
 0x39a   : > { %v1779_v63 = vrot.slane %v1778_v60, 4  ;;  %v1763_v52 = vadd.f32 %v1762_v19, %v1761_v11  ;;  %v1785_v32 = vsel %vm409_vm0, %v5400_v13, 0.0  ;;  %v1800_v14 = vmax.f32 %v1742_v36, 1e-12  ;;  %v5408_v36 = vpop.permute.xlu1 %1985 }
 0x39b   : > { %v1799_v22 = vmax.f32 %v1735_v5, 1e-12  ;;  %v1852_v16 = vmul.f32 %v5326_v7, %v1830_v29  ;;  %v1769_v55 = vrot.slane %v1768_v46, 1  ;;  %v1773_v25 = vadd.f32 %v1772_v53, %v1771_v21 }
 0x39c   : > { %v1894_v5 = vadd.f32 %v1893_v57, %v1892_v8  ;;  %v1780_v51 = vadd.f32 %v1779_v63, %v1778_v60  ;;  %v1786_v29 = vrot.slane %v1785_v32, 4  ;;  %v1901_v2 = vadd.f32 %v1900_v34, %v1899_v50 }
 0x39d   : > { %4310 = vrcp.f32 %v1799_v22  ;;  %v1904_v28 = vsel %vm409_vm0, %v1852_v16, 0.0  ;;  %v1770_v15 = vadd.f32 %v1769_v55, %v1768_v46  ;;  %v1774_v47 = vrot.slane %v1773_v25, 2 }
 0x39e   : > { %v1905_v9 = vrot.slane %v1904_v28, 4  ;;  %v1781_v22 = vrot.slane %v1780_v51, 2  ;;  %v1801_v16 = vmax.f32 %v1749_v61, 1e-12  ;;  %v1802_v12 = vmax.f32 %v1756_v40, 1e-12 }
 0x39f   : > { %v1775_v11 = vadd.f32 %v1774_v47, %v1773_v25  ;;  %v1787_v19 = vadd.f32 %v1786_v29, %v1785_v32  ;;  %v1803_v21 = vmax.f32 %v1763_v52, 1e-12  ;;  %v1888_v8 = vrot.slane %v5391_v49, 1 }
 0x3a0   : > { %v1906_v45 = vadd.f32 %v1905_v9, %v1904_v28  ;;  %v1782_v60 = vadd.f32 %v1781_v22, %v1780_v51  ;;  %v1804_v57 = vmax.f32 %v1770_v15, 1e-12  ;;  %4312 = vrcp.f32 %v1800_v14 }
 0x3a1   : > { %v1776_v63 = vrot.slane %v1775_v11, 1  ;;  %v1788_v46 = vrot.slane %v1787_v19, 2  ;;  %4314 = vrcp.f32 %v1801_v16  ;;  %v1895_v28 = vrot.slane %v1894_v5, 1 }
 0x3a2   : > { %v1907_v17 = vrot.slane %v1906_v45, 2  ;;  %v1993_v50 = vmul.f32 %v5408_v36, %v1875_v58  ;;  %v1783_v61 = vrot.slane %v1782_v60, 1  ;;  %4316 = vrcp.f32 %v1802_v12 }
 0x3a3   : > { %v1902_v34 = vrot.slane %v1901_v2, 1  ;;  %v1777_v40 = vadd.f32 %v1776_v63, %v1775_v11  ;;  %v1789_v9 = vadd.f32 %v1788_v46, %v1787_v19  ;;  %4318 = vrcp.f32 %v1803_v21 }
 0x3a4   : > { %v1908_v53 = vadd.f32 %v1907_v17, %v1906_v45  ;;  %v6335_v55 = vrot.slane %v5364_v39, 1  ;;  %v1992_v51 = vmul.f32 %v5408_v36, %v5386_v10  ;;  %v1784_v32 = vadd.f32 %v1783_v61, %v1782_v60 }
 0x3a5   : > { %4320 = vrcp.f32 %v1804_v57  ;;  %v1790_v58 = vrot.slane %v1789_v9, 1  ;;  %v1805_v15 = vmax.f32 %v1777_v40, 1e-12  ;;  %v1889_v47 = vadd.f32 %v1888_v8, %v5391_v49 }
 0x3a6   : > { %v1882_v25 = vadd.f32 %v6335_v55, %v5364_v39  ;;  %v1909_v45 = vrot.slane %v1908_v53, 1  ;;  %v1896_v29 = vadd.f32 %v1895_v28, %v1894_v5  ;;  %v2024_v22 = vsel %vm615_vm1, %v1993_v50, %v1992_v51 }
 0x3a7   : > { %v4311_v52 = vpop.eup %4310  ;;  %v1806_v16 = vmax.f32 %v1784_v32, 1e-12  ;;  %v1903_v17 = vadd.f32 %v1902_v34, %v1901_v2  ;;  %v1791_v39 = vadd.f32 %v1790_v58, %v1789_v9  ;;  %4322 = vrcp.f32 %v1805_v15 }
 0x3a8   : > { %v1831_v14 = vmul.f32 %v4311_v52, %v5362_v4  ;;  %v1994_v10 = vmul.f32 %v5408_v36, %v1882_v25  ;;  %v1910_v11 = vadd.f32 %v1909_v45, %v1908_v53  ;;  %v1996_v49 = vmul.f32 %v5408_v36, %v1896_v29 }
 0x3a9   : > { %4324 = vrcp.f32 %v1806_v16  ;;  %v1807_v19 = vmax.f32 %v1791_v39, 1e-12  ;;  %v1995_v57 = vmul.f32 %v5408_v36, %v1889_v47 }
 0x3aa   : > { %v1853_v12 = vmul.f32 %v5326_v7, %v1831_v14  ;;  %v4313_v21 = vpop.eup %4312  ;;  %v2025_v5 = vsel %vm617_vm2, %v1994_v10, %v2024_v22  ;;  %v1997_v7 = vmul.f32 %v5408_v36, %v1903_v17  ;;  %v1998_v50 = vmul.f32 %v5408_v36, %v1910_v11 }
 0x3ab   : > { %v4315_v8 = vpop.eup %4314  ;;  %4326 = vrcp.f32 %v1807_v19  ;;  %v1832_v2 = vmul.f32 %v4313_v21, %v5331_v62  ;;  %v2026_v61 = vsel %vm619_vm3, %v1995_v57, %v2025_v5 }
 0x3ac   : > { %v1911_v4 = vsel %vm409_vm0, %v1853_v12, 0.0  ;;  %v4317_v63 = vpop.eup %4316  ;;  %v1833_v53 = vmul.f32 %v4315_v8, %v5344_v6  ;;  %v2027_v55 = vsel %vm621_vm4, %v1996_v49, %v2026_v61 }
 0x3ad   : > { %v1912_v60 = vrot.slane %v1911_v4, 4  ;;  %v4319_v28 = vpop.eup %4318  ;;  %v1834_v34 = vmul.f32 %v4317_v63, %v5347_v44  ;;  %v1854_v40 = vmul.f32 %v5405_v43, %v1832_v2  ;;  %v2028_v51 = vsel %vm623_vm5, %v1997_v7, %v2027_v55 }
 0x3ae   : > { %v1835_v25 = vmul.f32 %v4319_v28, %v5367_v18  ;;  %v1855_v62 = vmul.f32 %v5405_v43, %v1833_v53  ;;  %v2029_v29 = vsel %vm625_vm6, %v1998_v50, %v2028_v51 }
 0x3af   : > { %v1913_v46 = vadd.f32 %v1912_v60, %v1911_v4  ;;  %v4321_v9 = vpop.eup %4320  ;;  %v1856_v32 = vmul.f32 %v5405_v43, %v1834_v34  ;;  %v1918_v14 = vsel %vm409_vm0, %v1854_v40, 0.0 }
 0x3b0   : > { %v1836_v6 = vmul.f32 %v4321_v9, %v5374_v35  ;;  %v1857_v44 = vmul.f32 %v5405_v43, %v1835_v25  ;;  %v1919_v58 = vrot.slane %v1918_v14, 4  ;;  %v1925_v15 = vsel %vm409_vm0, %v1855_v62, 0.0 }
 0x3b1   : > { %v1914_v52 = vrot.slane %v1913_v46, 2  ;;  %v4323_v47 = vpop.eup %4322  ;;  %v1926_v22 = vrot.slane %v1925_v15, 4  ;;  %v1932_v16 = vsel %vm409_vm0, %v1856_v32, 0.0 }
 0x3b2   : > { %v1858_v18 = vmul.f32 %v5405_v43, %v1836_v6  ;;  %v1837_v17 = vmul.f32 %v4323_v47, %v5389_v37  ;;  %v1920_v39 = vadd.f32 %v1919_v58, %v1918_v14  ;;  %v1933_v10 = vrot.slane %v1932_v16, 4  ;;  %v5458_v58 = vpop.permute.xlu1 %1989 }
 0x3b3   : > { %v1915_v45 = vadd.f32 %v1914_v52, %v1913_v46  ;;  %v4325_v12 = vpop.eup %4324  ;;  %v1927_v4 = vadd.f32 %v1926_v22, %v1925_v15  ;;  %v1939_v19 = vsel %vm409_vm0, %v1857_v44, 0.0 }
 0x3b4   : > { %v1838_v11 = vmul.f32 %v4325_v12, %v5384_v56  ;;  %v1946_v21 = vsel %vm409_vm0, %v1858_v18, 0.0  ;;  %v1859_v49 = vmul.f32 %v5405_v43, %v1837_v17  ;;  %v1921_v5 = vrot.slane %v1920_v39, 2 }
 0x3b5   : > { %v1916_v35 = vrot.slane %v1915_v45, 1  ;;  %v1934_v8 = vadd.f32 %v1933_v10, %v1932_v16  ;;  %v4327_v57 = vpop.eup %4326  ;;  %v1928_v2 = vrot.slane %v1927_v4, 2  ;;  %v1940_v63 = vrot.slane %v1939_v19, 4 }
 0x3b6   : > { %v1860_v7 = vmul.f32 %v5405_v43, %v1838_v11  ;;  %v1947_v37 = vrot.slane %v1946_v21, 4  ;;  %v1839_v56 = vmul.f32 %v4327_v57, %v5400_v13  ;;  %v1922_v53 = vadd.f32 %v1921_v5, %v1920_v39 }
 0x3b7   : > { %v1917_v60 = vadd.f32 %v1916_v35, %v1915_v45  ;;  %v1935_v28 = vrot.slane %v1934_v8, 2  ;;  %v1929_v50 = vadd.f32 %v1928_v2, %v1927_v4  ;;  %v1941_v61 = vadd.f32 %v1940_v63, %v1939_v19 }
 0x3b8   : > { %v1948_v34 = vadd.f32 %v1947_v37, %v1946_v21  ;;  %v1953_v40 = vsel %vm409_vm0, %v1859_v49, 0.0  ;;  %v1861_v52 = vmul.f32 %v5405_v43, %v1839_v56  ;;  %v1923_v55 = vrot.slane %v1922_v53, 1 }
 0x3b9   : > { %v1999_v46 = vmul.f32 %v5408_v36, %v1917_v60  ;;  %v1936_v25 = vadd.f32 %v1935_v28, %v1934_v8  ;;  %v1930_v62 = vrot.slane %v1929_v50, 1  ;;  %v1942_v51 = vrot.slane %v1941_v61, 2 }
 0x3ba   : > { %v1949_v6 = vrot.slane %v1948_v34, 2  ;;  %v1954_v13 = vrot.slane %v1953_v40, 4  ;;  %v1924_v32 = vadd.f32 %v1923_v55, %v1922_v53  ;;  %v1960_v45 = vsel %vm409_vm0, %v1860_v7, 0.0 }
 0x3bb   : > { %v2030_v9 = vsel %vm627_vm7, %v1999_v46, %v2029_v29  ;;  %v1937_v14 = vrot.slane %v1936_v25, 1  ;;  %v1967_v44 = vsel %vm409_vm0, %v1861_v52, 0.0  ;;  %v1931_v15 = vadd.f32 %v1930_v62, %v1929_v50 }
 0x3bc   : > { %2038 = vrot.lane.b32.xlu1 %v2030_v9, %s4570_s19  ;;  %v1943_v47 = vadd.f32 %v1942_v51, %v1941_v61  ;;  %v1950_v43 = vadd.f32 %v1949_v6, %v1948_v34  ;;  %v1955_v29 = vadd.f32 %v1954_v13, %v1953_v40  ;;  %v1961_v22 = vrot.slane %v1960_v45, 4 }
 0x3bd   : > { %v1938_v18 = vadd.f32 %v1937_v14, %v1936_v25  ;;  %v1968_v16 = vrot.slane %v1967_v44, 4  ;;  %v2000_v12 = vmul.f32 %v5458_v58, %v1924_v32  ;;  %v2001_v10 = vmul.f32 %v5458_v58, %v1931_v15 }
 0x3be   : > { %v1944_v35 = vrot.slane %v1943_v47, 1  ;;  %v1951_v17 = vrot.slane %v1950_v43, 1  ;;  %v1956_v39 = vrot.slane %v1955_v29, 2  ;;  %v1962_v11 = vadd.f32 %v1961_v22, %v1960_v45 }
 0x3bf   : > { %v1969_v4 = vadd.f32 %v1968_v16, %v1967_v44  ;;  %v2031_v49 = vsel %vm615_vm1, %v2001_v10, %v2000_v12  ;;  %v2002_v57 = vmul.f32 %v5458_v58, %v1938_v18 }
 0x3c0   : > { %v1945_v19 = vadd.f32 %v1944_v35, %v1943_v47  ;;  %v1952_v21 = vadd.f32 %v1951_v17, %v1950_v43  ;;  %v1957_v60 = vadd.f32 %v1956_v39, %v1955_v29  ;;  %v1963_v5 = vrot.slane %v1962_v11, 2 }
 0x3c1   : > { %v1970_v8 = vrot.slane %v1969_v4, 2  ;;  %v2032_v46 = vsel %vm617_vm2, %v2002_v57, %v2031_v49 }
 0x3c2   : > { %v1958_v7 = vrot.slane %v1957_v60, 1  ;;  %v1964_v2 = vadd.f32 %v1963_v5, %v1962_v11  ;;  %v2004_v37 = vmul.f32 %v5458_v58, %v1952_v21  ;;  %v2003_v53 = vmul.f32 %v5458_v58, %v1945_v19 }
 0x3c3   : > { %v1971_v63 = vadd.f32 %v1970_v8, %v1969_v4 }
 0x3c4   : > { %v1959_v56 = vadd.f32 %v1958_v7, %v1957_v60  ;;  %v1965_v28 = vrot.slane %v1964_v2, 1  ;;  %v2033_v34 = vsel %vm619_vm3, %v2003_v53, %v2032_v46 }
 0x3c5   : > { %v1972_v50 = vrot.slane %v1971_v63, 1  ;;  %v2034_v52 = vsel %vm621_vm4, %v2004_v37, %v2033_v34 }
 0x3c6   : > { %v2005_v61 = vmul.f32 %v5458_v58, %v1959_v56  ;;  %v1966_v40 = vadd.f32 %v1965_v28, %v1964_v2 }
 0x3c7   : > { %v1973_v9 = vadd.f32 %v1972_v50, %v1971_v63 }
 0x3c8   : > { %v2035_v55 = vsel %vm623_vm5, %v2005_v61, %v2034_v52  ;;  %v2006_v25 = vmul.f32 %v5458_v58, %v1966_v40 }
 0x3c9   : > { %v2007_v62 = vmul.f32 %v5458_v58, %v1973_v9  ;;  %v4162_v9 = vld [vmem:[%s6259_s5 + $0x10] sm:$0xff]  }
 0x3ca   : > { %v2036_v51 = vsel %vm625_vm6, %v2006_v25, %v2035_v55  ;;  %4067 = vmatpush3.bf16.msra.mxu0 %v4162_v9  ;;  %v6336_v55 = vmov 0.0  }
 0x3cb   : > { %v2037_v6 = vsel %vm627_vm7, %v2007_v62, %v2036_v51  ;;  %4068 = vmatprep.subr.bf16.mxu0 %v6336_v55 }
 0x3cc   : > { %2040 = vrot.lane.b32.xlu1 %v2037_v6, %s4570_s19  ;;  %v4163_v6 = vld [vmem:[%s6259_s5 + $0x18] sm:$0xff]  }
 0x3ce   : > { %4069 = vmatpush3.bf16.msra.mxu0 %v4163_v6 }
 0x42e   : > { %v2039_v13 = vpop.permute.xlu1 %2038 }
 0x42f   : > { %v2044_v32 = vadd.f32 %v2039_v13, %v4977_v26  ;;  %v5512_v13 = vld [vmem:[%s6260_s6 + $0x10] sm:$0xff]  }
 0x430   : > { %4074 = vmatprep.subr.bf16.mxu0 %v5512_v13 }
 0x431   : > { %2048 = vrot.lane.b32.xlu1 %v2044_v32, %s4570_s19 }
 0x43e   : > { %v2041_v14 = vpop.permute.xlu1 %2040 }
 0x43f   : > { %v2045_v45 = vadd.f32 %v2041_v14, %v4981_v31 }
 0x441   : > { %2050 = vrot.lane.b32.xlu1 %v2045_v45, %s4570_s19 }
 0x4a3   : > { %v2049_v44 = vpop.permute.xlu1 %2048 }
 0x4a4   : > { %v2054_v15 = vsel %vm409_vm0, %v2049_v44, 0.0 }
 0x4a5   : > { %2055 = vadd.xlane.f32.xlu0 %v2054_v15 }
 0x4b3   : > { %v2051_v47 = vpop.permute.xlu1 %2050 }
 0x4b4   : > { %v2057_v43 = vsel %vm409_vm0, %v2051_v47, 0.0 }
 0x4b5   : > { %2058 = vadd.xlane.f32.xlu1 %v2057_v43 }
 0x532   : > { %v2056_v29 = vpop.xlane.xlu0 %2055 }
 0x533   : > { %v2060_v18 = vmul.f32 0.03125, %v2056_v29 }
 0x535   : > { %v2062_v22 = vsub.f32 %v2044_v32, %v2060_v18 }
 0x537   : > { %v2064_v16 = vmul.f32 %v2062_v22, %v2062_v22 }
 0x539   : > { %2068 = vrot.lane.b32.xlu0 %v2064_v16, %s4570_s19 }
 0x542   : > { %v2059_v26 = vpop.xlane.xlu1 %2058 }
 0x543   : > { %v2061_v12 = vmul.f32 0.03125, %v2059_v26 }
 0x545   : > { %v2063_v35 = vsub.f32 %v2045_v45, %v2061_v12 }
 0x547   : > { %v2065_v31 = vmul.f32 %v2063_v35, %v2063_v35 }
 0x549   : > { %2070 = vrot.lane.b32.xlu1 %v2065_v31, %s4570_s19 }
 0x5ab   : > { %v2069_v17 = vpop.permute.xlu0 %2068 }
 0x5ac   : > { %v2074_v39 = vsel %vm409_vm0, %v2069_v17, 0.0 }
 0x5ad   : > { %2075 = vadd.xlane.f32.xlu0 %v2074_v39 }
 0x5bb   : > { %v2071_v10 = vpop.permute.xlu1 %2070 }
 0x5bc   : > { %v2077_v11 = vsel %vm409_vm0, %v2071_v10, 0.0 }
 0x5bd   : > { %2078 = vadd.xlane.f32.xlu1 %v2077_v11 }
 0x63a   : > { %v2076_v4 = vpop.xlane.xlu0 %2075 }
 0x63b   : > { %v2080_v19 = vmul.f32 0.03125, %v2076_v4 }
 0x63d   : > { %v2082_v21 = vadd.f32 1e-05, %v2080_v19 }
 0x63f   : > { %4328 = vrsqrt.f32 %v2082_v21 }
 0x649   : > { %v4329_v60 = vpop.eup %4328 }
 0x64a   : > { %v2086_v49 = vmul.f32 %v4329_v60, %v2062_v22  ;;  %v2079_v8 = vpop.xlane.xlu1 %2078 }
 0x64b   : > { %v2081_v57 = vmul.f32 0.03125, %v2079_v8 }
 0x64c   : > { %2104 = vrot.lane.b32.xlu0 %v2086_v49, %s4570_s19  ;;  %v2092_v5 = vrot.slane %v2086_v49, 3  ;;  %v2090_v7 = vrot.slane %v2086_v49, 1  ;;  %v2091_v63 = vrot.slane %v2086_v49, 2  ;;  %v2093_v37 = vrot.slane %v2086_v49, 4 }
 0x64d   : > { %v2083_v2 = vadd.f32 1e-05, %v2081_v57  ;;  %v2094_v46 = vrot.slane %v2086_v49, 5  ;;  %v2095_v28 = vrot.slane %v2086_v49, 6  ;;  %v2096_v34 = vrot.slane %v2086_v49, 7 }
 0x64e   : > { %2110 = vrot.lane.b32.xlu1 %v2092_v5, %s4570_s19 }
 0x64f   : > { %4330 = vrsqrt.f32 %v2083_v2 }
 0x650   : > { %2106 = vrot.lane.b32.xlu0 %v2090_v7, %s4570_s19 }
 0x654   : > { %2108 = vrot.lane.b32.xlu0 %v2091_v63, %s4570_s19 }
 0x658   : > { %2112 = vrot.lane.b32.xlu0 %v2093_v37, %s4570_s19 }
 0x659   : > { %v4331_v56 = vpop.eup %4330 }
 0x65a   : > { %v2087_v53 = vmul.f32 %v4331_v56, %v2063_v35 }
 0x65c   : > { %2114 = vrot.lane.b32.xlu0 %v2094_v46, %s4570_s19  ;;  %v2097_v50 = vrot.slane %v2087_v53, 1  ;;  %v2098_v61 = vrot.slane %v2087_v53, 2  ;;  %v2099_v40 = vrot.slane %v2087_v53, 3  ;;  %v2100_v52 = vrot.slane %v2087_v53, 4 }
 0x65d   : > { %v2101_v25 = vrot.slane %v2087_v53, 5  ;;  %v2102_v62 = vrot.slane %v2087_v53, 6  ;;  %v2103_v51 = vrot.slane %v2087_v53, 7 }
 0x65e   : > { %2122 = vrot.lane.b32.xlu1 %v2097_v50, %s4570_s19  ;;  %v6341_v50 = vld [vmem:[#allocation5_spill] sm:$0xff] }
 0x660   : > { %2116 = vrot.lane.b32.xlu0 %v2095_v28, %s4570_s19 }
 0x662   : > { %2124 = vrot.lane.b32.xlu1 %v2098_v61, %s4570_s19 }
 0x664   : > { %2120 = vrot.lane.b32.xlu0 %v2087_v53, %s4570_s19 }
 0x666   : > { %2126 = vrot.lane.b32.xlu1 %v2099_v40, %s4570_s19 }
 0x668   : > { %2118 = vrot.lane.b32.xlu0 %v2096_v34, %s4570_s19 }
 0x66a   : > { %2128 = vrot.lane.b32.xlu1 %v2100_v52, %s4570_s19 }
 0x66e   : > { %2130 = vrot.lane.b32.xlu1 %v2101_v25, %s4570_s19 }
 0x672   : > { %2132 = vrot.lane.b32.xlu1 %v2102_v62, %s4570_s19 }
 0x676   : > { %2134 = vrot.lane.b32.xlu1 %v2103_v51, %s4570_s19 }
 0x6be   : > { %v2105_v32 = vpop.permute.xlu0 %2104 }
 0x6bf   : > { %v2152_v10 = vadd.f32 %v2105_v32, %v4724_v20 }
 0x6c0   : > { %v2111_v47 = vpop.permute.xlu1 %2110 }
 0x6c2   : > { %v2107_v14 = vpop.permute.xlu0 %2106 }
 0x6c3   : > { %v2153_v12 = vadd.f32 %v2107_v14, %v4726_v23 }
 0x6c5   : > { %v5527_v19 = vmax.f32 %v2153_v12, 0.0 }
 0x6c6   : > { %v2109_v45 = vpop.permute.xlu0 %2108 }
 0x6c7   : > { %v2154_v31 = vadd.f32 %v2109_v45, %v4728_v24  ;;  %v2195_v57 = vpack.c.bf16 %v5527_v19, %v5527_v19 }
 0x6c9   : > { %v5531_v23 = vmax.f32 %v2154_v31, 0.0 }
 0x6ca   : > { %v2113_v44 = vpop.permute.xlu0 %2112 }
 0x6cb   : > { %v2196_v7 = vpack.c.bf16 %v5531_v23, %v5531_v23 }
 0x6cd   : > { %v2228_v52 = vunpack.c.l.b16 %v2196_v7 }
 0x6ce   : > { %v2115_v15 = vpop.permute.xlu0 %2114 }
 0x6cf   : > { %v2157_v21 = vadd.f32 %v2115_v15, %v4742_v38 }
 0x6d0   : > { %v2123_v29 = vpop.permute.xlu1 %2122 }
 0x6d1   : > { %v2161_v18 = vadd.f32 %v2123_v29, %v4810_v41  ;;  %v2155_v41 = vadd.f32 %v2111_v47, %v4730_v27  ;;  %v5556_v37 = vmax.f32 %v2157_v21, 0.0 }
 0x6d2   : > { %v2117_v43 = vpop.permute.xlu0 %2116 }
 0x6d3   : > { %v5520_v17 = vmax.f32 %v2161_v18, 0.0  ;;  %v5544_v8 = vmax.f32 %v2155_v41, 0.0  ;;  %v2158_v38 = vadd.f32 %v2117_v43, %v4761_v54  ;;  %v2199_v32 = vpack.c.bf16 %v5556_v37, %v5556_v37  ;;  %v6344_v43 = vld [vmem:[#allocation6_spill] sm:$0xff] }
 0x6d4   : > { %v2125_v16 = vpop.permute.xlu1 %2124 }
 0x6d5   : > { %v2162_v35 = vadd.f32 %v2125_v16, %v4812_v42  ;;  %v2203_v24 = vpack.c.bf16 %v5520_v17, %v5520_v17  ;;  %v2156_v42 = vadd.f32 %v2113_v44, %v4733_v30  ;;  %v2197_v34 = vpack.c.bf16 %v5544_v8, %v5544_v8 }
 0x6d6   : > { %v2121_v22 = vpop.permute.xlu0 %2120  ;;  %v5567_v9 = vmax.f32 %v2158_v38, 0.0 }
 0x6d7   : > { %v2160_v26 = vadd.f32 %v2121_v22, %v4807_v33  ;;  %v5529_v33 = vmax.f32 %v2162_v35, 0.0  ;;  %v2235_v2 = vunpack.c.l.b16 %v2203_v24  ;;  %v2229_v12 = vunpack.c.l.b16 %v2197_v34 }
 0x6d8   : > { %v2127_v39 = vpop.permute.xlu1 %2126  ;;  %v2244_v35 = vrot.slane %v2228_v52, 6 }
 0x6d9   : > { %v2163_v11 = vadd.f32 %v2127_v39, %v4822_v59  ;;  %v5524_v4 = vmax.f32 %v2160_v26, 0.0  ;;  %6338 = vst [vmem:[#allocation27_spill] sm:$0xff] %v5529_v33  ;;  %v5537_v59 = vmax.f32 %v2152_v10, 0.0  ;;  %v2204_v30 = vpack.c.bf16 %v5529_v33, %v5529_v33 }
 0x6da   : > { %v2119_v60 = vpop.permute.xlu0 %2118  ;;  %v2256_v25 = vrot.slane %v2235_v2, 7  ;;  %v2200_v26 = vpack.c.bf16 %v5567_v9, %v5567_v9 }
 0x6db   : > { %6337 = vst [vmem:[#allocation26_spill] sm:$0xff] %v5524_v4  ;;  %v5539_v49 = vmax.f32 %v2163_v11, 0.0  ;;  %v2202_v5 = vpack.c.bf16 %v5524_v4, %v5524_v4  ;;  %v2159_v63 = vadd.f32 %v2119_v60, %v4770_v0  ;;  %v2194_v53 = vpack.c.bf16 %v5537_v59, %v5537_v59 }
 0x6dc   : > { %v2129_v20 = vpop.permute.xlu1 %2128  ;;  %v2227_v0 = vunpack.c.l.b16 %v2195_v57  ;;  %v2236_v40 = vunpack.c.l.b16 %v2204_v30  ;;  %v2231_v11 = vunpack.c.l.b16 %v2199_v32  ;;  %v2232_v30 = vunpack.c.l.b16 %v2200_v26  ;;  %v6348_v26 = vld [vmem:[#allocation12_spill] sm:$0xff] }
 0x6dd   : > { %6339 = vst [vmem:[#allocation28_spill] sm:$0xff] %v5539_v49  ;;  %v2164_v27 = vadd.f32 %v2129_v20, %v4828_v3  ;;  %v5554_v3 = vmax.f32 %v2156_v42, 0.0  ;;  %v2205_v28 = vpack.c.bf16 %v5539_v49, %v5539_v49  ;;  %v2234_v54 = vunpack.c.l.b16 %v2202_v5 }
 0x6de   : > { %v5571_v51 = vmax.f32 %v2159_v63, 0.0  ;;  %v2226_v18 = vunpack.c.l.b16 %v2194_v53  ;;  %v2242_v22 = vrot.slane %v2227_v0, 7  ;;  %v2258_v16 = vrot.slane %v2236_v40, 6 }
 0x6df   : > { %v5558_v46 = vmax.f32 %v2164_v27, 0.0  ;;  %v2198_v6 = vpack.c.bf16 %v5554_v3, %v5554_v3  ;;  %v2237_v44 = vunpack.c.l.b16 %v2205_v28  ;;  %v2257_v15 = vsel %vm615_vm1, %v2256_v25, %v2234_v54  ;;  %v6346_v27 = vld [vmem:[#allocation7_spill] sm:$0xff] }
 0x6e0   : > { %v2131_v56 = vpop.permute.xlu1 %2130  ;;  %6343 = vst [vmem:[#allocation30_spill] sm:$0xff] %v5571_v51  ;;  %v2201_v31 = vpack.c.bf16 %v5571_v51, %v5571_v51  ;;  %v2259_v24 = vsel %vm617_vm2, %v2258_v16, %v2257_v15  ;;  %v2243_v57 = vsel %vm615_vm1, %v2242_v22, %v2226_v18  ;;  %v2246_v54 = vrot.slane %v2229_v12, 5  ;;  %v4165_v16 = vld [vmem:[%s6260_s6 + $0x18] sm:$0xff]  }
 0x6e1   : > { %6340 = vst [vmem:[#allocation29_spill] sm:$0xff] %v5558_v46  ;;  %v2165_v61 = vadd.f32 %v2131_v56, %v6341_v50  ;;  %v2206_v14 = vpack.c.bf16 %v5558_v46, %v5558_v46  ;;  %v2230_v10 = vunpack.c.l.b16 %v2198_v6  ;;  %v2260_v21 = vrot.slane %v2237_v44, 5 }
 0x6e2   : > { %v2233_v7 = vunpack.c.l.b16 %v2201_v31  ;;  %v2245_v56 = vsel %vm617_vm2, %v2244_v35, %v2243_v57  ;;  %v2250_v50 = vrot.slane %v2231_v11, 3  ;;  %v2252_v0 = vrot.slane %v2232_v30, 2  ;;  %v6349_v35 = vld [vmem:[#allocation10_spill] sm:$0xff]  ;;  %v6350_v31 = vld [vmem:[#allocation11_spill] sm:$0xff]  ;;  %v6351_v11 = vld [vmem:[#allocation13_spill] sm:$0xff] }
 0x6e3   : > { %v5569_v62 = vmax.f32 %v2165_v61, 0.0  ;;  %v2238_v41 = vunpack.c.l.b16 %v2206_v14  ;;  %v2261_v38 = vsel %vm619_vm3, %v2260_v21, %v2259_v24  ;;  %v2248_v53 = vrot.slane %v2230_v10, 4  ;;  %v6354_v21 = vld [vmem:[#allocation22_spill] sm:$0xff] }
 0x6e4   : > { %v2133_v45 = vpop.permute.xlu1 %2132  ;;  %v2247_v25 = vsel %vm619_vm3, %v2246_v54, %v2245_v56  ;;  %v2254_v6 = vrot.slane %v2233_v7, 1  ;;  %v2327_v12 = vpack.c.bf16 %v6348_v26, %v5218_v48  ;;  %v2328_v10 = vpack.c.bf16 %v6350_v31, %v6349_v35  ;;  %v6358_v57 = vld [vmem:[#allocation18_spill] sm:$0xff]  ;;  %v6360_v7 = vld [vmem:[#allocation24_spill] sm:$0xff]  ;;  %v6361_v56 = vld [vmem:[#allocation21_spill] sm:$0xff] }
 0x6e5   : > { %6342 = vst [vmem:[#allocation5_spill] sm:$0xff] %v5569_v62  ;;  %v2207_v47 = vpack.c.bf16 %v5569_v62, %v5569_v62  ;;  %v2166_v29 = vadd.f32 %v2133_v45, %v6344_v43  ;;  %v2262_v28 = vrot.slane %v2238_v41, 4  ;;  %v2249_v14 = vsel %vm621_vm4, %v2248_v53, %v2247_v25  ;;  %v6352_v41 = vld [vmem:[#allocation14_spill] sm:$0xff]  ;;  %v6362_v53 = vld [vmem:[#allocation25_spill] sm:$0xff] }
 0x6e6   : > { %v2251_v45 = vsel %vm623_vm5, %v2250_v50, %v2249_v14  ;;  %v2329_v24 = vpack.c.bf16 %v6352_v41, %v6351_v11 }
 0x6e7   : > { %v5587_v39 = vmax.f32 %v2166_v29, 0.0  ;;  %v2239_v20 = vunpack.c.l.b16 %v2207_v47  ;;  %v2263_v40 = vsel %vm621_vm4, %v2262_v28, %v2261_v38  ;;  %v2253_v47 = vsel %vm625_vm6, %v2252_v0, %v2251_v45  ;;  %v6359_v38 = vld [vmem:[#allocation23_spill] sm:$0xff] }
 0x6e8   : > { %v2135_v42 = vpop.permute.xlu1 %2134  ;;  %v2255_v29 = vsel %vm627_vm7, %v2254_v6, %v2253_v47  ;;  %v2334_v28 = vpack.c.bf16 %v6362_v53, %v6361_v56 }
 0x6e9   : > { %6345 = vst [vmem:[#allocation6_spill] sm:$0xff] %v5587_v39  ;;  %v2208_v60 = vpack.c.bf16 %v5587_v39, %v5587_v39  ;;  %v2167_v5 = vadd.f32 %v2135_v42, %v6346_v27  ;;  %v2264_v61 = vrot.slane %v2239_v20, 3  ;;  %v6353_v42 = vld [vmem:[#allocation17_spill] sm:$0xff]  ;;  %v6356_v27 = vld [vmem:[#allocation19_spill] sm:$0xff] }
 0x6ea   : > { %v2330_v20 = vpack.c.bf16 %v6354_v21, %v6353_v42 }
 0x6eb   : > { %v2240_v2 = vunpack.c.l.b16 %v2208_v60  ;;  %v5595_v63 = vmax.f32 %v2167_v5, 0.0  ;;  %v2265_v44 = vsel %vm623_vm5, %v2264_v61, %v2263_v40  ;;  %v6355_v60 = vld [vmem:[#allocation15_spill] sm:$0xff]  ;;  %v6357_v5 = vld [vmem:[#allocation16_spill] sm:$0xff] }
 0x6ec   : > { %v2332_v30 = vpack.c.bf16 %v6358_v57, %v6357_v5 }
 0x6ed   : > { %6347 = vst [vmem:[#allocation7_spill] sm:$0xff] %v5595_v63  ;;  %v2209_v34 = vpack.c.bf16 %v5595_v63, %v5595_v63  ;;  %v2266_v52 = vrot.slane %v2240_v2, 2  ;;  %v2333_v2 = vpack.c.bf16 %v6360_v7, %v6359_v38 }
 0x6ef   : > { %v2241_v32 = vunpack.c.l.b16 %v2209_v34  ;;  %v2267_v43 = vsel %vm625_vm6, %v2266_v52, %v2265_v44  ;;  %v6363_v34 = vld [vmem:[#allocation8_spill] sm:$0xff] }
 0x6f1   : > { %v2268_v15 = vrot.slane %v2241_v32, 1 }
 0x6f3   : > { %v2269_v18 = vsel %vm627_vm7, %v2268_v15, %v2267_v43  ;;  %v6364_v15 = vld [vmem:[#allocation9_spill] sm:$0xff] }
 0x6f4   : > { %v2270_v22 = vpack.c.b16 %v2269_v18, %v2255_v29 }
 0x6f6   : > { %4071 = vmatmul.mubr.msk.bf16.vlgmr.msra.gmra.mrb[12].mxu0 %vm409_vm0, %v2270_v22 }
 0x6f7   : > { %4075 = vmatpush3.bf16.msra.mxu0 %v5512_v13  ;;  %4078 = vmatprep.mubr.msk.bf16.mxu0 %vm409_vm0, %v2327_v12  ;;  %v2331_v13 = vpack.c.bf16 %v6356_v27, %v6355_v60 }
 0x6f8   : > { %4076 = vmatprep.subr.bf16.mxu0 %v4165_v16 }
 0x6fb   : > { %4077 = vmatpush3.bf16.msra.mxu0 %v4165_v16 }
 0x6fe   : > { %4079 = vmatmul.mubr.msk.bf16.vlgmr.msra.gmra.mrb[16].mxu0 %vm409_vm0, %v2328_v10 }
 0x6ff   : > { %4082 = vmatprep.mubr.msk.bf16.mxu0 %vm409_vm0, %v2329_v24 }
 0x706   : > { %4083 = vmatmul.mubr.msk.bf16.gmra.mrb[20].mxu0 %vm409_vm0, %v2330_v20 }
 0x707   : > { %4086 = vmatprep.mubr.msk.bf16.mxu0 %vm409_vm0, %v2331_v13 }
 0x70e   : > { %4087 = vmatmul.mubr.msk.bf16.gmra.mrb[24].mxu0 %vm409_vm0, %v2332_v30 }
 0x70f   : > { %4090 = vmatprep.mubr.msk.bf16.mxu0 %vm409_vm0, %v2333_v2 }
 0x716   : > { %4091 = vmatmul.mubr.msk.bf16.gmra.mrb[28].mxu0 %vm409_vm0, %v2334_v28 }
 0x7c9   : > { %v5638_v54 = vpop.f32.mrb[12].mxu0 }
 0x7ca   : > { %v2470_v50 = vcombine.high %v5638_v54, %v5638_v54  ;;  %2664 = vrot.lane.b32.xlu0 %v5638_v54, %s4566_s26  ;;  %v4072_v61 = vpop.f32.mrb[13].mxu0  ;;  %v2477_v0 = vrot.slane %v5638_v54, %v6363_v34 }
 0x7cb   : > { %v5646_v40 = vpop.f32.mrb[14].mxu0 }
 0x7cc   : > { %2666 = vrot.lane.b32.xlu1 %v5646_v40, %s4566_s26  ;;  %v4073_v52 = vpop.f32.mrb[15].mxu0  ;;  %v2493_v25 = vrot.slane %v2477_v0, %v6363_v34  ;;  %v2485_v6 = vcombine.high %v2477_v0, %v2477_v0  ;;  %v2484_v32 = vrot.slane %v2470_v50, %v6363_v34  ;;  %v2526_v20 = vrot.slane %v5646_v40, %v6363_v34 }
 0x7cd   : > { %v2519_v52 = vcombine.high %v5646_v40, %v5646_v40 }
 0x7ce   : > { %v2515_v14 = vcombine.high %v2493_v25, %v2493_v25  ;;  %v2507_v45 = vrot.slane %v2485_v6, %v6363_v34  ;;  %v2486_v44 = vcombine.high %v2484_v32, %v2484_v32  ;;  %v2500_v29 = vrot.slane %v2484_v32, %v6363_v34 }
 0x7cf   : > { %v2571_v22 = vrot.slane %v2493_v25, %v6364_v15  ;;  %v2534_v6 = vcombine.high %v2526_v20, %v2526_v20 }
 0x7d0   : > { %v2579_v47 = vrot.slane %v2515_v14, %v6364_v15  ;;  %v2517_v43 = vcombine.high %v2507_v45, %v2507_v45  ;;  %v2514_v24 = vrot.slane %v2486_v44, %v6363_v34  ;;  %v2575_v2 = vrot.slane %v2507_v45, %v6364_v15 }
 0x7d1   : > { %v4080_v18 = vpop.f32.mrb[16].mxu0  ;;  %v2516_v61 = vcombine.high %v2500_v29, %v2500_v29  ;;  %v2542_v14 = vrot.slane %v2526_v20, %v6363_v34 }
 0x7d2   : > { %v5656_v16 = vadd.f32 %v4080_v18, %v2579_v47  ;;  %v2405_v12 = vpop.f32.mrb[17].mxu0  ;;  %v2583_v10 = vrot.slane %v2517_v43, %v6364_v15  ;;  %v2518_v25 = vcombine.high %v2514_v24, %v2514_v24  ;;  %v2587_v47 = vrot.slane %v2500_v29, %v6364_v15 }
 0x7d3   : > { %v2648_v13 = vadd.f32 %v2571_v22, %v2405_v12  ;;  %v4081_v30 = vpop.f32.mrb[18].mxu0  ;;  %v2595_v32 = vrot.slane %v2516_v61, %v6364_v15  ;;  %v2556_v22 = vrot.slane %v2534_v6, %v6363_v34  ;;  %v2533_v12 = vrot.slane %v2519_v52, %v6363_v34 }
 0x7d4   : > { %v5663_v28 = vadd.f32 %v4081_v30, %v2583_v10  ;;  %v2408_v50 = vpop.f32.mrb[19].mxu0  ;;  %v2599_v18 = vrot.slane %v2518_v25, %v6364_v15  ;;  %v2564_v20 = vcombine.high %v2542_v14, %v2542_v14  ;;  %v2603_v6 = vrot.slane %v2542_v14, %v6364_v15 }
 0x7d5   : > { %v2649_v0 = vadd.f32 %v2575_v2, %v2408_v50  ;;  %v2591_v2 = vrot.slane %v2514_v24, %v6364_v15  ;;  %v2566_v63 = vcombine.high %v2556_v22, %v2556_v22  ;;  %v2535_v29 = vcombine.high %v2533_v12, %v2533_v12 }
 0x7d7   : > { %v2563_v24 = vrot.slane %v2535_v29, %v6363_v34 }
 0x7d9   : > { %v4084_v44 = vpop.f32.mrb[20].mxu0  ;;  %v2623_v29 = vrot.slane %v2563_v24, %v6364_v15 }
 0x7da   : > { %v5670_v43 = vadd.f32 %v4084_v44, %v2595_v32  ;;  %v2421_v45 = vpop.f32.mrb[21].mxu0  ;;  %v2611_v32 = vrot.slane %v2564_v20, %v6364_v15  ;;  %v2549_v44 = vrot.slane %v2533_v12, %v6363_v34  ;;  %v2567_v20 = vcombine.high %v2563_v24, %v2563_v24 }
 0x7db   : > { %v2652_v10 = vadd.f32 %v2587_v47, %v2421_v45  ;;  %v4085_v30 = vpop.f32.mrb[22].mxu0  ;;  %v2615_v47 = vrot.slane %v2566_v63, %v6364_v15 }
 0x7dc   : > { %v5676_v50 = vadd.f32 %v4085_v30, %v2599_v18  ;;  %v2424_v61 = vpop.f32.mrb[23].mxu0  ;;  %v2607_v30 = vrot.slane %v2556_v22, %v6364_v15  ;;  %v2565_v62 = vcombine.high %v2549_v44, %v2549_v44  ;;  %v2619_v14 = vrot.slane %v2549_v44, %v6364_v15 }
 0x7dd   : > { %v2653_v55 = vadd.f32 %v2591_v2, %v2424_v61  ;;  %v2631_v63 = vrot.slane %v2567_v20, %v6364_v15 }
 0x7de   : > { %v2627_v12 = vrot.slane %v2565_v62, %v6364_v15 }
 0x7e1   : > { %v4088_v25 = vpop.f32.mrb[24].mxu0 }
 0x7e2   : > { %v2658_v39 = vadd.f32 %v4088_v25, %v2611_v32  ;;  %v2437_v52 = vpop.f32.mrb[25].mxu0 }
 0x7e3   : > { %v2656_v45 = vadd.f32 %v2603_v6, %v2437_v52  ;;  %v4089_v18 = vpop.f32.mrb[26].mxu0 }
 0x7e4   : > { %v2659_v2 = vadd.f32 %v4089_v18, %v2615_v47  ;;  %v2440_v61 = vpop.f32.mrb[27].mxu0 }
 0x7e5   : > { %v2657_v51 = vadd.f32 %v2607_v30, %v2440_v61 }
 0x7e9   : > { %v4092_v46 = vpop.f32.mrb[28].mxu0 }
 0x7ea   : > { %v2662_v32 = vadd.f32 %v4092_v46, %v2627_v12  ;;  %v2453_v25 = vpop.f32.mrb[29].mxu0 }
 0x7eb   : > { %v2660_v49 = vadd.f32 %v2619_v14, %v2453_v25  ;;  %v4093_v34 = vpop.f32.mrb[30].mxu0 }
 0x7ec   : > { %v2663_v6 = vadd.f32 %v4093_v34, %v2631_v63  ;;  %v2456_v22 = vpop.f32.mrb[31].mxu0 }
 0x7ed   : > { %v2661_v52 = vadd.f32 %v2623_v29, %v2456_v22 }
 0x83c   : > { %v2665_v47 = vpop.permute.xlu0 %2664 }
 0x83d   : > { %v2670_v18 = vadd.f32 %v2665_v47, %v2648_v13  ;;  %v2671_v30 = vadd.f32 %v2665_v47, %v2649_v0  ;;  %v2672_v46 = vadd.f32 %v2665_v47, %v5656_v16  ;;  %v2673_v24 = vadd.f32 %v2665_v47, %v5663_v28 }
 0x83e   : > { %v2667_v61 = vpop.permute.xlu1 %2666  ;;  %v5699_v14 = vadd.f32 %v2665_v47, %v2652_v10  ;;  %v5707_v28 = vadd.f32 %v2665_v47, %v2653_v55  ;;  %v5716_v25 = vadd.f32 %v2665_v47, %v5670_v43  ;;  %v5725_v34 = vadd.f32 %v2665_v47, %v5676_v50 }
 0x83f   : > { %v2686_v62 = vsel %vm409_vm0, %v2670_v18, 0.0  ;;  %v2689_v4 = vsel %vm409_vm0, %v2671_v30, 0.0  ;;  %v5691_v44 = vadd.f32 %v2667_v61, %v2656_v45  ;;  %v2692_v20 = vsel %vm409_vm0, %v2672_v46, 0.0 }
 0x840   : > { %2687 = vadd.xlane.f32.xlu0 %v2686_v62  ;;  %2690 = vadd.xlane.f32.xlu1 %v2689_v4  ;;  %v2679_v13 = vadd.f32 %v2667_v61, %v2657_v51  ;;  %v2695_v0 = vsel %vm409_vm0, %v2673_v24, 0.0  ;;  %v5701_v16 = vadd.f32 %v2667_v61, %v2658_v39  ;;  %v2698_v4 = vsel %vm409_vm0, %v5699_v14, 0.0 }
 0x841   : > { %v2710_v15 = vsel %vm409_vm0, %v5691_v44, 0.0  ;;  %v5709_v51 = vadd.f32 %v2667_v61, %v2659_v2  ;;  %v2701_v10 = vsel %vm409_vm0, %v5707_v28, 0.0  ;;  %v5718_v63 = vadd.f32 %v2667_v61, %v2660_v49 }
 0x842   : > { %v2713_v12 = vsel %vm409_vm0, %v2679_v13, 0.0  ;;  %v2716_v45 = vsel %vm409_vm0, %v5701_v16, 0.0  ;;  %v2704_v55 = vsel %vm409_vm0, %v5716_v25, 0.0  ;;  %v5727_v29 = vadd.f32 %v2667_v61, %v2661_v52 }
 0x843   : > { %v2719_v39 = vsel %vm409_vm0, %v5709_v51, 0.0  ;;  %v2722_v2 = vsel %vm409_vm0, %v5718_v63, 0.0  ;;  %v2707_v43 = vsel %vm409_vm0, %v5725_v34, 0.0  ;;  %v5733_v22 = vadd.f32 %v2667_v61, %v2662_v32 }
 0x844   : > { %2693 = vadd.xlane.f32.xlu1 %v2692_v20  ;;  %2711 = vadd.xlane.f32.xlu0 %v2710_v15  ;;  %v2725_v49 = vsel %vm409_vm0, %v5727_v29, 0.0  ;;  %v5737_v20 = vadd.f32 %v2667_v61, %v2663_v6 }
 0x845   : > { %v2728_v62 = vsel %vm409_vm0, %v5733_v22, 0.0 }
 0x846   : > { %v2731_v50 = vsel %vm409_vm0, %v5737_v20, 0.0 }
 0x848   : > { %2696 = vadd.xlane.f32.xlu1 %v2695_v0  ;;  %2714 = vadd.xlane.f32.xlu0 %v2713_v12 }
 0x84c   : > { %2699 = vadd.xlane.f32.xlu1 %v2698_v4  ;;  %2717 = vadd.xlane.f32.xlu0 %v2716_v45 }
 0x850   : > { %2702 = vadd.xlane.f32.xlu1 %v2701_v10  ;;  %2720 = vadd.xlane.f32.xlu0 %v2719_v39 }
 0x854   : > { %2705 = vadd.xlane.f32.xlu1 %v2704_v55  ;;  %2723 = vadd.xlane.f32.xlu0 %v2722_v2 }
 0x858   : > { %2708 = vadd.xlane.f32.xlu1 %v2707_v43  ;;  %2726 = vadd.xlane.f32.xlu0 %v2725_v49 }
 0x85c   : > { %2729 = vadd.xlane.f32.xlu0 %v2728_v62 }
 0x860   : > { %2732 = vadd.xlane.f32.xlu0 %v2731_v50 }
 0x8cd   : > { %v2688_v52 = vpop.xlane.xlu0 %2687  ;;  %v2691_v47 = vpop.xlane.xlu1 %2690 }
 0x8ce   : > { %v2734_v15 = vmul.f32 0.03125, %v2688_v52  ;;  %v2735_v0 = vmul.f32 0.03125, %v2691_v47 }
 0x8d0   : > { %v5741_v12 = vsub.f32 %v2670_v18, %v2734_v15  ;;  %v5743_v32 = vsub.f32 %v2671_v30, %v2735_v0 }
 0x8d1   : > { %v2694_v4 = vpop.xlane.xlu1 %2693  ;;  %v2712_v45 = vpop.xlane.xlu0 %2711 }
 0x8d2   : > { %v2736_v10 = vmul.f32 0.03125, %v2694_v4  ;;  %v2766_v6 = vmul.f32 %v5741_v12, %v5741_v12  ;;  %v2767_v61 = vmul.f32 %v5743_v32, %v5743_v32 }
 0x8d4   : > { %v5749_v39 = vsub.f32 %v2672_v46, %v2736_v10  ;;  %v2782_v55 = vsel %vm409_vm0, %v2766_v6, 0.0  ;;  %v2785_v2 = vsel %vm409_vm0, %v2767_v61, 0.0  ;;  %v2742_v61 = vmul.f32 0.03125, %v2712_v45 }
 0x8d5   : > { %v2697_v43 = vpop.xlane.xlu1 %2696  ;;  %2783 = vadd.xlane.f32.xlu1 %v2782_v55  ;;  %v2715_v18 = vpop.xlane.xlu0 %2714  ;;  %2786 = vadd.xlane.f32.xlu0 %v2785_v2 }
 0x8d6   : > { %v2737_v30 = vmul.f32 0.03125, %v2697_v43  ;;  %v2743_v49 = vmul.f32 0.03125, %v2715_v18  ;;  %v2768_v62 = vmul.f32 %v5749_v39, %v5749_v39  ;;  %v5777_v45 = vsub.f32 %v5691_v44, %v2742_v61 }
 0x8d8   : > { %v5755_v50 = vsub.f32 %v2673_v24, %v2737_v30  ;;  %v5757_v52 = vsub.f32 %v2679_v13, %v2743_v49  ;;  %v2788_v46 = vsel %vm409_vm0, %v2768_v62, 0.0 }
 0x8d9   : > { %v2700_v47 = vpop.xlane.xlu1 %2699  ;;  %2789 = vadd.xlane.f32.xlu1 %v2788_v46  ;;  %v2718_v15 = vpop.xlane.xlu0 %2717 }
 0x8da   : > { %v2738_v0 = vmul.f32 0.03125, %v2700_v47  ;;  %v2744_v4 = vmul.f32 0.03125, %v2718_v15  ;;  %v2769_v10 = vmul.f32 %v5755_v50, %v5755_v50  ;;  %v2775_v6 = vmul.f32 %v5757_v52, %v5757_v52 }
 0x8dc   : > { %v5765_v55 = vsub.f32 %v5699_v14, %v2738_v0  ;;  %v5768_v24 = vsub.f32 %v5701_v16, %v2744_v4  ;;  %v2791_v13 = vsel %vm409_vm0, %v2769_v10, 0.0  ;;  %v2809_v2 = vsel %vm409_vm0, %v2775_v6, 0.0 }
 0x8dd   : > { %2792 = vadd.xlane.f32.xlu1 %v2791_v13  ;;  %v2703_v43 = vpop.xlane.xlu1 %2702  ;;  %v2721_v18 = vpop.xlane.xlu0 %2720  ;;  %2810 = vadd.xlane.f32.xlu0 %v2809_v2 }
 0x8de   : > { %v2739_v30 = vmul.f32 0.03125, %v2703_v43  ;;  %v2745_v49 = vmul.f32 0.03125, %v2721_v18  ;;  %v2770_v62 = vmul.f32 %v5765_v55, %v5765_v55  ;;  %v2776_v14 = vmul.f32 %v5768_v24, %v5768_v24 }
 0x8e0   : > { %v5780_v16 = vsub.f32 %v5707_v28, %v2739_v30  ;;  %v5783_v46 = vsub.f32 %v5709_v51, %v2745_v49  ;;  %v2794_v47 = vsel %vm409_vm0, %v2770_v62, 0.0  ;;  %v2812_v15 = vsel %vm409_vm0, %v2776_v14, 0.0 }
 0x8e1   : > { %2795 = vadd.xlane.f32.xlu1 %v2794_v47  ;;  %v2706_v0 = vpop.xlane.xlu1 %2705  ;;  %v2724_v4 = vpop.xlane.xlu0 %2723  ;;  %2813 = vadd.xlane.f32.xlu0 %v2812_v15  ;;  %v2774_v51 = vmul.f32 %v5777_v45, %v5777_v45 }
 0x8e2   : > { %v2740_v10 = vmul.f32 0.03125, %v2706_v0  ;;  %v2746_v6 = vmul.f32 0.03125, %v2724_v4  ;;  %v2771_v44 = vmul.f32 %v5780_v16, %v5780_v16  ;;  %v2777_v28 = vmul.f32 %v5783_v46, %v5783_v46 }
 0x8e3   : > { %v2806_v47 = vsel %vm409_vm0, %v2774_v51, 0.0 }
 0x8e4   : > { %v5794_v61 = vsub.f32 %v5716_v25, %v2740_v10  ;;  %v5797_v13 = vsub.f32 %v5718_v63, %v2746_v6  ;;  %v2797_v2 = vsel %vm409_vm0, %v2771_v44, 0.0  ;;  %v2815_v43 = vsel %vm409_vm0, %v2777_v28, 0.0 }
 0x8e5   : > { %2798 = vadd.xlane.f32.xlu1 %v2797_v2  ;;  %v2709_v18 = vpop.xlane.xlu1 %2708  ;;  %2816 = vadd.xlane.f32.xlu0 %v2815_v43  ;;  %v2727_v30 = vpop.xlane.xlu0 %2726 }
 0x8e6   : > { %v2741_v49 = vmul.f32 0.03125, %v2709_v18  ;;  %v2747_v62 = vmul.f32 0.03125, %v2727_v30  ;;  %v2778_v14 = vmul.f32 %v5797_v13, %v5797_v13  ;;  %v2772_v0 = vmul.f32 %v5794_v61, %v5794_v61 }
 0x8e8   : > { %v5805_v25 = vsub.f32 %v5725_v34, %v2741_v49  ;;  %v5808_v63 = vsub.f32 %v5727_v29, %v2747_v62  ;;  %v2818_v15 = vsel %vm409_vm0, %v2778_v14, 0.0  ;;  %v2800_v34 = vsel %vm409_vm0, %v2772_v0, 0.0 }
 0x8e9   : > { %2807 = vadd.xlane.f32.xlu1 %v2806_v47  ;;  %2819 = vadd.xlane.f32.xlu0 %v2818_v15  ;;  %v2730_v4 = vpop.xlane.xlu0 %2729 }
 0x8ea   : > { %v2748_v10 = vmul.f32 0.03125, %v2730_v4  ;;  %v2779_v6 = vmul.f32 %v5808_v63, %v5808_v63  ;;  %v2773_v28 = vmul.f32 %v5805_v25, %v5805_v25 }
 0x8ec   : > { %v5816_v44 = vsub.f32 %v5733_v22, %v2748_v10  ;;  %v2821_v29 = vsel %vm409_vm0, %v2779_v6, 0.0  ;;  %v2803_v22 = vsel %vm409_vm0, %v2773_v28, 0.0 }
 0x8ed   : > { %2801 = vadd.xlane.f32.xlu1 %v2800_v34  ;;  %2822 = vadd.xlane.f32.xlu0 %v2821_v29  ;;  %v2733_v51 = vpop.xlane.xlu0 %2732 }
 0x8ee   : > { %v2749_v2 = vmul.f32 0.03125, %v2733_v51  ;;  %v2780_v43 = vmul.f32 %v5816_v44, %v5816_v44 }
 0x8f0   : > { %v5825_v18 = vsub.f32 %v5737_v20, %v2749_v2  ;;  %v2824_v30 = vsel %vm409_vm0, %v2780_v43, 0.0 }
 0x8f1   : > { %2804 = vadd.xlane.f32.xlu1 %v2803_v22  ;;  %2825 = vadd.xlane.f32.xlu0 %v2824_v30 }
 0x8f2   : > { %v2781_v49 = vmul.f32 %v5825_v18, %v5825_v18 }
 0x8f4   : > { %v2827_v62 = vsel %vm409_vm0, %v2781_v49, 0.0 }
 0x8f5   : > { %2828 = vadd.xlane.f32.xlu0 %v2827_v62 }
 0x902   : > { %3214 = vrot.lane.b32.xlu1 %v5638_v54, %s4569_s18 }
 0x90b   : > { %3216 = vrot.lane.b32.xlu0 %v5646_v40, %s4569_s18  ;;  %s4504_s18 = sshll.u32 %s4571_s9, 4  ;;  %s4505_s18 = int_to_ptr.vmem [resolvable:$false] %s4504_s18 }
 0x90c   : > { %s4506_s21 = scalar_lea.vmem %s4505_s18, 512 }
 0x962   : > { %v2784_v20 = vpop.xlane.xlu1 %2783  ;;  %v2787_v14 = vpop.xlane.xlu0 %2786 }
 0x963   : > { %v2830_v47 = vmul.f32 0.03125, %v2784_v20  ;;  %v2831_v15 = vmul.f32 0.03125, %v2787_v14 }
 0x965   : > { %v2846_v0 = vadd.f32 1e-05, %v2830_v47  ;;  %v2847_v4 = vadd.f32 1e-05, %v2831_v15 }
 0x966   : > { %v2790_v10 = vpop.xlane.xlu1 %2789 }
 0x967   : > { %4332 = vrsqrt.f32 %v2846_v0  ;;  %v2832_v6 = vmul.f32 0.03125, %v2790_v10 }
 0x968   : > { %4334 = vrsqrt.f32 %v2847_v4 }
 0x969   : > { %v2848_v34 = vadd.f32 1e-05, %v2832_v6 }
 0x96a   : > { %v2793_v29 = vpop.xlane.xlu1 %2792  ;;  %v2811_v28 = vpop.xlane.xlu0 %2810 }
 0x96b   : > { %4336 = vrsqrt.f32 %v2848_v34  ;;  %v2833_v51 = vmul.f32 0.03125, %v2793_v29  ;;  %v2839_v2 = vmul.f32 0.03125, %v2811_v28 }
 0x96d   : > { %v2849_v43 = vadd.f32 1e-05, %v2833_v51  ;;  %v2855_v22 = vadd.f32 1e-05, %v2839_v2 }
 0x96e   : > { %v2796_v30 = vpop.xlane.xlu1 %2795  ;;  %v2814_v49 = vpop.xlane.xlu0 %2813 }
 0x96f   : > { %4338 = vrsqrt.f32 %v2849_v43  ;;  %v2834_v62 = vmul.f32 0.03125, %v2796_v30  ;;  %v2840_v20 = vmul.f32 0.03125, %v2814_v49 }
 0x970   : > { %4340 = vrsqrt.f32 %v2855_v22 }
 0x971   : > { %v4333_v14 = vpop.eup %4332  ;;  %v2850_v47 = vadd.f32 1e-05, %v2834_v62  ;;  %v2856_v15 = vadd.f32 1e-05, %v2840_v20 }
 0x972   : > { %v4335_v0 = vpop.eup %4334  ;;  %v2878_v4 = vmul.f32 %v4333_v14, %v5741_v12  ;;  %v2799_v10 = vpop.xlane.xlu1 %2798 }
 0x973   : > { %v2817_v6 = vpop.xlane.xlu0 %2816  ;;  %v2879_v34 = vmul.f32 %v4335_v0, %v5743_v32  ;;  %4342 = vrsqrt.f32 %v2850_v47  ;;  %v2835_v29 = vmul.f32 0.03125, %v2799_v10 }
 0x974   : > { %v2841_v28 = vmul.f32 0.03125, %v2817_v6  ;;  %v2894_v51 = vmax.f32 %v2878_v4, 0.0  ;;  %4344 = vrsqrt.f32 %v2856_v15 }
 0x975   : > { %v4337_v2 = vpop.eup %4336  ;;  %v2895_v43 = vmax.f32 %v2879_v34, 0.0  ;;  %v2851_v30 = vadd.f32 1e-05, %v2835_v29 }
 0x976   : > { %v2857_v49 = vadd.f32 1e-05, %v2841_v28  ;;  %v2910_v22 = vadd.f32 %v2894_v51, %v5218_v48  ;;  %v2880_v62 = vmul.f32 %v4337_v2, %v5749_v39  ;;  %v2808_v20 = vpop.xlane.xlu1 %2807 }
 0x977   : > { %v2820_v33 = vpop.xlane.xlu0 %2819  ;;  %v2911_v12 = vadd.f32 %v2895_v43, %v6348_v26  ;;  %4346 = vrsqrt.f32 %v2851_v30  ;;  %v2838_v14 = vmul.f32 0.03125, %v2808_v20 }
 0x978   : > { %v2842_v32 = vmul.f32 0.03125, %v2820_v33  ;;  %v2926_v47 = vsub.f32 0.0, %v2910_v22  ;;  %v2896_v0 = vmax.f32 %v2880_v62, 0.0  ;;  %4348 = vrsqrt.f32 %v2857_v49 }
 0x979   : > { %v4339_v4 = vpop.eup %4338  ;;  %v2927_v15 = vsub.f32 0.0, %v2911_v12  ;;  %v2854_v10 = vadd.f32 1e-05, %v2838_v14 }
 0x97a   : > { %v4341_v6 = vpop.eup %4340  ;;  %v2942_v34 = vmul.f32 1.442695, %v2926_v47  ;;  %v2912_v29 = vadd.f32 %v2896_v0, %v6349_v35  ;;  %v2881_v48 = vmul.f32 %v4339_v4, %v5755_v50  ;;  %v2858_v39 = vadd.f32 1e-05, %v2842_v32  ;;  %v2802_v28 = vpop.xlane.xlu1 %2801 }
 0x97b   : > { %v2823_v51 = vpop.xlane.xlu0 %2822  ;;  %v2944_v2 = vmul.f32 1.442695, %v2927_v15  ;;  %v2887_v26 = vmul.f32 %v4341_v6, %v5757_v52  ;;  %4350 = vrsqrt.f32 %v2854_v10  ;;  %v2836_v33 = vmul.f32 0.03125, %v2802_v28 }
 0x97c   : > { %4352 = vpow2.f32 %v2942_v34  ;;  %v2928_v43 = vsub.f32 0.0, %v2912_v29  ;;  %v2897_v30 = vmax.f32 %v2881_v48, 0.0  ;;  %v2843_v49 = vmul.f32 0.03125, %v2823_v51 }
 0x97d   : > { %v4343_v22 = vpop.eup %4342  ;;  %4354 = vpow2.f32 %v2944_v2  ;;  %v2903_v62 = vmax.f32 %v2887_v26, 0.0  ;;  %v2852_v20 = vadd.f32 1e-05, %v2836_v33 }
 0x97e   : > { %v4345_v12 = vpop.eup %4344  ;;  %v2946_v35 = vmul.f32 1.442695, %v2928_v43  ;;  %v2913_v50 = vadd.f32 %v2897_v30, %v6350_v31  ;;  %v2882_v14 = vmul.f32 %v4343_v22, %v5765_v55  ;;  %4356 = vrsqrt.f32 %v2858_v39  ;;  %v2805_v32 = vpop.xlane.xlu1 %2804 }
 0x97f   : > { %v2826_v47 = vpop.xlane.xlu0 %2825  ;;  %v2919_v52 = vadd.f32 %v2903_v62, %v6356_v27  ;;  %v2888_v0 = vmul.f32 %v4345_v12, %v5768_v24  ;;  %4358 = vrsqrt.f32 %v2852_v20  ;;  %v2859_v4 = vadd.f32 1e-05, %v2843_v49 }
 0x980   : > { %4360 = vpow2.f32 %v2946_v35  ;;  %v2929_v15 = vsub.f32 0.0, %v2913_v50  ;;  %v2898_v10 = vmax.f32 %v2882_v14, 0.0  ;;  %v2837_v6 = vmul.f32 0.03125, %v2805_v32 }
 0x981   : > { %v4347_v34 = vpop.eup %4346  ;;  %v2935_v29 = vsub.f32 0.0, %v2919_v52  ;;  %v2904_v48 = vmax.f32 %v2888_v0, 0.0  ;;  %4362 = vrsqrt.f32 %v2859_v4  ;;  %v2844_v31 = vmul.f32 0.03125, %v2826_v47 }
 0x982   : > { %v4349_v28 = vpop.eup %4348  ;;  %v2948_v55 = vmul.f32 1.442695, %v2929_v15  ;;  %v2914_v39 = vadd.f32 %v2898_v10, %v6351_v11  ;;  %v2883_v51 = vmul.f32 %v4347_v34, %v5780_v16  ;;  %v2853_v27 = vadd.f32 1e-05, %v2837_v6 }
 0x983   : > { %v2829_v2 = vpop.xlane.xlu0 %2828  ;;  %v2960_v24 = vmul.f32 1.442695, %v2935_v29  ;;  %v2920_v26 = vadd.f32 %v2904_v48, %v6357_v5  ;;  %v2889_v33 = vmul.f32 %v4349_v28, %v5783_v46  ;;  %v2860_v43 = vadd.f32 1e-05, %v2844_v31 }
 0x984   : > { %4364 = vpow2.f32 %v2948_v55  ;;  %v2930_v30 = vsub.f32 0.0, %v2914_v39  ;;  %v2899_v49 = vmax.f32 %v2883_v51, 0.0  ;;  %v2845_v12 = vmul.f32 0.03125, %v2829_v2 }
 0x985   : > { %v4351_v22 = vpop.eup %4350  ;;  %4366 = vpow2.f32 %v2960_v24  ;;  %v2936_v62 = vsub.f32 0.0, %v2920_v26  ;;  %v2905_v20 = vmax.f32 %v2889_v33, 0.0 }
 0x986   : > { %v4353_v35 = vpop.eup %4352  ;;  %v2950_v11 = vmul.f32 1.442695, %v2930_v30  ;;  %v2915_v16 = vadd.f32 %v2899_v49, %v6352_v41  ;;  %v2886_v50 = vmul.f32 %v4351_v22, %v5777_v45  ;;  %4368 = vrsqrt.f32 %v2853_v27 }
 0x987   : > { %v4355_v14 = vpop.eup %4354  ;;  %v2974_v5 = vadd.f32 1.0, %v4353_v35  ;;  %v2962_v32 = vmul.f32 1.442695, %v2936_v62  ;;  %v2921_v46 = vadd.f32 %v2905_v20, %v6358_v57  ;;  %4370 = vrsqrt.f32 %v2860_v43 }
 0x988   : > { %v4357_v47 = vpop.eup %4356  ;;  %v2975_v52 = vadd.f32 1.0, %v4355_v14  ;;  %4372 = vpow2.f32 %v2950_v11  ;;  %v2931_v0 = vsub.f32 0.0, %v2915_v16  ;;  %v2902_v4 = vmax.f32 %v2886_v50, 0.0 }
 0x989   : > { %v4359_v15 = vpop.eup %4358  ;;  %4374 = vrcp.f32 %v2974_v5  ;;  %v2937_v10 = vsub.f32 0.0, %v2921_v46  ;;  %v2890_v6 = vmul.f32 %v4357_v47, %v5797_v13  ;;  %v2861_v41 = vadd.f32 1e-05, %v2845_v12 }
 0x98a   : > { %v4361_v34 = vpop.eup %4360  ;;  %4376 = vrcp.f32 %v2975_v52  ;;  %v2952_v45 = vmul.f32 1.442695, %v2931_v0  ;;  %v2918_v29 = vadd.f32 %v2902_v4, %v6355_v60  ;;  %v2884_v48 = vmul.f32 %v4359_v15, %v5794_v61 }
 0x98b   : > { %v4363_v57 = vpop.eup %4362  ;;  %v2976_v31 = vadd.f32 1.0, %v4361_v34  ;;  %4378 = vpow2.f32 %v2962_v32  ;;  %v2964_v28 = vmul.f32 1.442695, %v2937_v10  ;;  %v2906_v55 = vmax.f32 %v2890_v6, 0.0 }
 0x98c   : > { %4380 = vpow2.f32 %v2952_v45  ;;  %v2934_v39 = vsub.f32 0.0, %v2918_v29  ;;  %v2900_v51 = vmax.f32 %v2884_v48, 0.0  ;;  %v2891_v27 = vmul.f32 %v4363_v57, %v5808_v63 }
 0x98d   : > { %4382 = vrcp.f32 %v2976_v31  ;;  %v2922_v13 = vadd.f32 %v2906_v55, %v6359_v38 }
 0x98e   : > { %v4365_v2 = vpop.eup %4364  ;;  %4384 = vpow2.f32 %v2964_v28  ;;  %v2958_v24 = vmul.f32 1.442695, %v2934_v39  ;;  %v2916_v60 = vadd.f32 %v2900_v51, %v6353_v42  ;;  %v2907_v26 = vmax.f32 %v2891_v27, 0.0 }
 0x98f   : > { %v4367_v61 = vpop.eup %4366  ;;  %v2977_v33 = vadd.f32 1.0, %v4365_v2  ;;  %v2938_v43 = vsub.f32 0.0, %v2922_v13  ;;  %4386 = vrsqrt.f32 %v2861_v41 }
 0x990   : > { %v4369_v30 = vpop.eup %4368  ;;  %v2983_v49 = vadd.f32 1.0, %v4367_v61  ;;  %4388 = vpow2.f32 %v2958_v24  ;;  %v2932_v22 = vsub.f32 0.0, %v2916_v60  ;;  %v2923_v62 = vadd.f32 %v2907_v26, %v6360_v7 }
 0x991   : > { %v4371_v63 = vpop.eup %4370  ;;  %4390 = vrcp.f32 %v2977_v33  ;;  %v2966_v20 = vmul.f32 1.442695, %v2938_v43  ;;  %v2885_v38 = vmul.f32 %v4369_v30, %v5805_v25  ;;  %v6365_v33 = vld [vmem:[#allocation20_spill] sm:$0xff] }
 0x992   : > { %v4373_v12 = vpop.eup %4372  ;;  %4392 = vrcp.f32 %v2983_v49  ;;  %v2954_v35 = vmul.f32 1.442695, %v2932_v22  ;;  %v2939_v5 = vsub.f32 0.0, %v2923_v62  ;;  %v2892_v52 = vmul.f32 %v4371_v63, %v5816_v44 }
 0x993   : > { %v4375_v42 = vpop.eup %4374  ;;  %v2978_v11 = vadd.f32 1.0, %v4373_v12  ;;  %4394 = vpow2.f32 %v2966_v20  ;;  %v2901_v16 = vmax.f32 %v2885_v38, 0.0 }
 0x994   : > { %v4377_v50 = vpop.eup %4376  ;;  %v3006_v14 = vmul.f32 1.442695, %v4375_v42  ;;  %4396 = vpow2.f32 %v2954_v35  ;;  %v2968_v6 = vmul.f32 1.442695, %v2939_v5  ;;  %v2908_v29 = vmax.f32 %v2892_v52, 0.0 }
 0x995   : > { %v4379_v32 = vpop.eup %4378  ;;  %v3008_v46 = vmul.f32 1.442695, %v4377_v50  ;;  %4398 = vrcp.f32 %v2978_v11  ;;  %v2917_v4 = vadd.f32 %v2901_v16, %v6354_v21 }
 0x996   : > { %v4381_v7 = vpop.eup %4380  ;;  %4400 = vpow2.f32 %v3006_v14  ;;  %v2984_v47 = vadd.f32 1.0, %v4379_v32  ;;  %v2924_v13 = vadd.f32 %v2908_v29, %v6361_v56 }
 0x997   : > { %v4383_v25 = vpop.eup %4382  ;;  %4402 = vpow2.f32 %v3008_v46  ;;  %v2979_v0 = vadd.f32 1.0, %v4381_v7  ;;  %v2933_v31 = vsub.f32 0.0, %v2917_v4 }
 0x998   : > { %v4385_v15 = vpop.eup %4384  ;;  %v3010_v10 = vmul.f32 1.442695, %v4383_v25  ;;  %4404 = vrcp.f32 %v2984_v47  ;;  %v2940_v22 = vsub.f32 0.0, %v2924_v13 }
 0x999   : > { %v4387_v41 = vpop.eup %4386  ;;  %4406 = vrcp.f32 %v2979_v0  ;;  %v2985_v34 = vadd.f32 1.0, %v4385_v15  ;;  %v2956_v24 = vmul.f32 1.442695, %v2933_v31 }
 0x99a   : > { %v4389_v45 = vpop.eup %4388  ;;  %4408 = vpow2.f32 %v3010_v10  ;;  %v2893_v21 = vmul.f32 %v4387_v41, %v5825_v18  ;;  %v2970_v32 = vmul.f32 1.442695, %v2940_v22 }
 0x99b   : > { %v4391_v48 = vpop.eup %4390  ;;  %4410 = vrcp.f32 %v2985_v34  ;;  %v2982_v57 = vadd.f32 1.0, %v4389_v45 }
 0x99c   : > { %v4393_v44 = vpop.eup %4392  ;;  %v3012_v28 = vmul.f32 1.442695, %v4391_v48  ;;  %4412 = vpow2.f32 %v2968_v6  ;;  %v2909_v30 = vmax.f32 %v2893_v21, 0.0 }
 0x99d   : > { %v4395_v55 = vpop.eup %4394  ;;  %v3024_v39 = vmul.f32 1.442695, %v4393_v44  ;;  %4414 = vrcp.f32 %v2982_v57 }
 0x99e   : > { %v4397_v51 = vpop.eup %4396  ;;  %4416 = vpow2.f32 %v3012_v28  ;;  %v2986_v27 = vadd.f32 1.0, %v4395_v55  ;;  %v2925_v14 = vadd.f32 %v2909_v30, %v6362_v53 }
 0x99f   : > { %v4399_v2 = vpop.eup %4398  ;;  %4418 = vpow2.f32 %v3024_v39  ;;  %v2980_v56 = vadd.f32 1.0, %v4397_v51 }
 0x9a0   : > { %v4401_v60 = vpop.eup %4400  ;;  %v3014_v26 = vmul.f32 1.442695, %v4399_v2  ;;  %4420 = vrcp.f32 %v2986_v27  ;;  %v2941_v34 = vsub.f32 0.0, %v2925_v14 }
 0x9a1   : > { %v4403_v61 = vpop.eup %4402  ;;  %v5868_v43 = vmul.f32 %v4401_v60, %v6365_v33 }
 0x9a2   : > { %v4405_v49 = vpop.eup %4404  ;;  %4422 = vpow2.f32 %v3014_v26  ;;  %v5871_v18 = vmul.f32 %v4403_v61, %v6365_v33  ;;  %v2972_v2 = vmul.f32 1.442695, %v2941_v34 }
 0x9a3   : > { %v4407_v62 = vpop.eup %4406  ;;  %v3026_v63 = vmul.f32 1.442695, %v4405_v49  ;;  %4424 = vpow2.f32 %v2956_v24  ;;  %v3054_v20 = vsel %vm409_vm0, %v5868_v43, 0.0 }
 0x9a4   : > { %v4409_v38 = vpop.eup %4408  ;;  %v3016_v12 = vmul.f32 1.442695, %v4407_v62  ;;  %v3055_v35 = vrot.slane %v3054_v20, 4  ;;  %v3061_v42 = vsel %vm409_vm0, %v5871_v18, 0.0 }
 0x9a5   : > { %v4411_v11 = vpop.eup %4410  ;;  %4426 = vpow2.f32 %v3026_v63  ;;  %v5878_v16 = vmul.f32 %v4409_v38, %v6365_v33  ;;  %v3062_v50 = vrot.slane %v3061_v42, 4 }
 0x9a6   : > { %v4413_v5 = vpop.eup %4412  ;;  %4428 = vpow2.f32 %v3016_v12  ;;  %v3056_v46 = vadd.f32 %v3055_v35, %v3054_v20  ;;  %v3028_v4 = vmul.f32 1.442695, %v4411_v11 }
 0x9a7   : > { %v4415_v7 = vpop.eup %4414  ;;  %4430 = vrcp.f32 %v2980_v56  ;;  %v2987_v47 = vadd.f32 1.0, %v4413_v5  ;;  %v3068_v52 = vsel %vm409_vm0, %v5878_v16, 0.0  ;;  %v3063_v25 = vadd.f32 %v3062_v50, %v3061_v42 }
 0x9a8   : > { %v4417_v0 = vpop.eup %4416  ;;  %v3022_v15 = vmul.f32 1.442695, %v4415_v7  ;;  %v3057_v10 = vrot.slane %v3056_v46, 2  ;;  %v3069_v6 = vrot.slane %v3068_v52, 4 }
 0x9a9   : > { %4432 = vrcp.f32 %v2987_v47  ;;  %v5884_v41 = vmul.f32 %v4417_v0, %v6365_v33  ;;  %v3064_v53 = vrot.slane %v3063_v25, 2  ;;  %v4419_v45 = vpop.eup %4418 }
 0x9aa   : > { %4434 = vpow2.f32 %v3022_v15  ;;  %v3058_v29 = vadd.f32 %v3057_v10, %v3056_v46  ;;  %v3070_v48 = vadd.f32 %v3069_v6, %v3068_v52  ;;  %v4421_v57 = vpop.eup %4420  ;;  %v5892_v24 = vmul.f32 %v4419_v45, %v5324_v1 }
 0x9ab   : > { %4436 = vpow2.f32 %v2970_v32  ;;  %v3075_v31 = vsel %vm409_vm0, %v5884_v41, 0.0  ;;  %v3065_v44 = vadd.f32 %v3064_v53, %v3063_v25  ;;  %v3030_v60 = vmul.f32 1.442695, %v4421_v57 }
 0x9ac   : > { %v4423_v28 = vpop.eup %4422  ;;  %4438 = vpow2.f32 %v3028_v4  ;;  %v3059_v55 = vrot.slane %v3058_v29, 1  ;;  %v3071_v39 = vrot.slane %v3070_v48, 2  ;;  %v3076_v21 = vrot.slane %v3075_v31, 4 }
 0x9ad   : > { %v4425_v51 = vpop.eup %4424  ;;  %v5889_v27 = vmul.f32 %v4423_v28, %v6365_v33  ;;  %v3066_v13 = vrot.slane %v3065_v44, 1  ;;  %v3117_v32 = vsel %vm409_vm0, %v5892_v24, 0.0 }
 0x9ae   : > { %v2981_v26 = vadd.f32 1.0, %v4425_v51  ;;  %v3060_v61 = vadd.f32 %v3059_v55, %v3058_v29  ;;  %v3072_v30 = vadd.f32 %v3071_v39, %v3070_v48  ;;  %v3077_v22 = vadd.f32 %v3076_v21, %v3075_v31 }
 0x9af   : > { %v4427_v49 = vpop.eup %4426  ;;  %v3082_v62 = vsel %vm409_vm0, %v5889_v27, 0.0  ;;  %v3067_v63 = vadd.f32 %v3066_v13, %v3065_v44  ;;  %v3118_v57 = vrot.slane %v3117_v32, 4 }
 0x9b0   : > { %v4429_v56 = vpop.eup %4428  ;;  %4440 = vrcp.f32 %v2981_v26  ;;  %v3073_v20 = vrot.slane %v3072_v30, 1  ;;  %v3083_v38 = vrot.slane %v3082_v62, 4  ;;  %v3166_v12 = vmax.f32 %v3060_v61, 1e-12 }
 0x9b1   : > { %v4431_v35 = vpop.eup %4430  ;;  %v5897_v42 = vmul.f32 %v4429_v56, %v6365_v33  ;;  %v3078_v11 = vrot.slane %v3077_v22, 2  ;;  %v3167_v50 = vmax.f32 %v3067_v63, 1e-12  ;;  %4442 = vpow2.f32 %v2972_v2 }
 0x9b2   : > { %4444 = vpow2.f32 %v3030_v60  ;;  %v3074_v14 = vadd.f32 %v3073_v20, %v3072_v30  ;;  %v3084_v5 = vadd.f32 %v3083_v38, %v3082_v62  ;;  %v5904_v52 = vmul.f32 %v4427_v49, %v5324_v1 }
 0x9b3   : > { %v4433_v46 = vpop.eup %4432  ;;  %v3079_v7 = vadd.f32 %v3078_v11, %v3077_v22  ;;  %v3089_v47 = vsel %vm409_vm0, %v5897_v42, 0.0  ;;  %4446 = vrcp.f32 %v3166_v12  ;;  %v3119_v49 = vadd.f32 %v3118_v57, %v3117_v32 }
 0x9b4   : > { %v4435_v25 = vpop.eup %4434  ;;  %v3032_v0 = vmul.f32 1.442695, %v4433_v46  ;;  %v3085_v4 = vrot.slane %v3084_v5, 2  ;;  %v3090_v15 = vrot.slane %v3089_v47, 4  ;;  %v3168_v10 = vmax.f32 %v3074_v14, 1e-12 }
 0x9b5   : > { %v4437_v6 = vpop.eup %4436  ;;  %v3080_v53 = vrot.slane %v3079_v7, 1  ;;  %4448 = vrcp.f32 %v3167_v50  ;;  %v5907_v34 = vmul.f32 %v4435_v25, %v5324_v1  ;;  %v3124_v28 = vsel %vm409_vm0, %v5904_v52, 0.0 }
 0x9b6   : > { %v4439_v45 = vpop.eup %4438  ;;  %4450 = vpow2.f32 %v3032_v0  ;;  %v3086_v29 = vadd.f32 %v3085_v4, %v3084_v5  ;;  %v3091_v48 = vadd.f32 %v3090_v15, %v3089_v47  ;;  %v2988_v21 = vadd.f32 1.0, %v4437_v6 }
 0x9b7   : > { %v3081_v31 = vadd.f32 %v3080_v53, %v3079_v7  ;;  %4452 = vrcp.f32 %v3168_v10  ;;  %v3110_v44 = vsel %vm409_vm0, %v5907_v34, 0.0  ;;  %v5914_v13 = vmul.f32 %v4439_v45, %v5324_v1 }
 0x9b8   : > { %v3092_v55 = vrot.slane %v3091_v48, 2  ;;  %v3111_v39 = vrot.slane %v3110_v44, 4  ;;  %v3125_v2 = vrot.slane %v3124_v28, 4  ;;  %v3087_v26 = vrot.slane %v3086_v29, 1 }
 0x9b9   : > { %v3169_v51 = vmax.f32 %v3081_v31, 1e-12  ;;  %v3018_v62 = vmul.f32 1.442695, %v4431_v35  ;;  %v3131_v50 = vsel %vm409_vm0, %v5914_v13, 0.0  ;;  %v3120_v46 = vrot.slane %v3119_v49, 2 }
 0x9ba   : > { %v4441_v60 = vpop.eup %4440  ;;  %v3093_v61 = vadd.f32 %v3092_v55, %v3091_v48  ;;  %v3112_v30 = vadd.f32 %v3111_v39, %v3110_v44  ;;  %v3126_v11 = vadd.f32 %v3125_v2, %v3124_v28  ;;  %v3088_v14 = vadd.f32 %v3087_v26, %v3086_v29  ;;  %v5929_v55 = vpop.permute.xlu1 %3214 }
 0x9bb   : > { %v4443_v22 = vpop.eup %4442  ;;  %4454 = vrcp.f32 %v3169_v51  ;;  %v3020_v38 = vmul.f32 1.442695, %v4441_v60  ;;  %v3132_v25 = vrot.slane %v3131_v50, 4  ;;  %v3121_v45 = vadd.f32 %v3120_v46, %v3119_v49 }
 0x9bc   : > { %v4445_v63 = vpop.eup %4444  ;;  %v3094_v56 = vrot.slane %v3093_v61, 1  ;;  %v3113_v12 = vrot.slane %v3112_v30, 2  ;;  %4456 = vrcp.f32 %v2988_v21  ;;  %v2989_v5 = vadd.f32 1.0, %v4443_v22 }
 0x9bd   : > { %v4447_v20 = vpop.eup %4446  ;;  %4458 = vpow2.f32 %v3018_v62  ;;  %v5919_v35 = vmul.f32 %v4445_v63, %v5324_v1  ;;  %v3127_v10 = vrot.slane %v3126_v11, 2  ;;  %v3170_v6 = vmax.f32 %v3088_v14, 1e-12 }
 0x9be   : > { %v3095_v47 = vadd.f32 %v3094_v56, %v3093_v61  ;;  %4460 = vpow2.f32 %v3020_v38  ;;  %v3114_v15 = vadd.f32 %v3113_v12, %v3112_v30  ;;  %v3198_v53 = vmul.f32 %v4447_v20, %v5868_v43 }
 0x9bf   : > { %v4449_v7 = vpop.eup %4448  ;;  %4462 = vrcp.f32 %v2989_v5  ;;  %v3133_v31 = vadd.f32 %v3132_v25, %v3131_v50  ;;  %v3138_v44 = vsel %vm409_vm0, %v5919_v35, 0.0  ;;  %v3128_v21 = vadd.f32 %v3127_v10, %v3126_v11 }
 0x9c0   : > { %v4451_v32 = vpop.eup %4450  ;;  %v3171_v29 = vmax.f32 %v3095_v47, 1e-12  ;;  %v3199_v48 = vmul.f32 %v4449_v7, %v5871_v18  ;;  %v3115_v39 = vrot.slane %v3114_v15, 1  ;;  %v3139_v51 = vrot.slane %v3138_v44, 4 }
 0x9c1   : > { %v4453_v0 = vpop.eup %4452  ;;  %v5922_v4 = vmul.f32 %v4451_v32, %v5324_v1  ;;  %4464 = vrcp.f32 %v3170_v6  ;;  %v3220_v2 = vmul.f32 %v5929_v55, %v3198_v53  ;;  %v3122_v60 = vrot.slane %v3121_v45, 1 }
 0x9c2   : > { %v3200_v57 = vmul.f32 %v4453_v0, %v5878_v16  ;;  %v3134_v18 = vrot.slane %v3133_v31, 2  ;;  %4466 = vrcp.f32 %v3171_v29  ;;  %v3221_v16 = vmul.f32 %v5929_v55, %v3199_v48 }
 0x9c3   : > { %v3145_v43 = vsel %vm409_vm0, %v5922_v4, 0.0  ;;  %v3140_v26 = vadd.f32 %v3139_v51, %v3138_v44  ;;  %v3116_v56 = vadd.f32 %v3115_v39, %v3114_v15  ;;  %v3129_v20 = vrot.slane %v3128_v21, 1 }
 0x9c4   : > { %v3146_v61 = vrot.slane %v3145_v43, 4  ;;  %v3222_v22 = vmul.f32 %v5929_v55, %v3200_v57  ;;  %v3135_v62 = vadd.f32 %v3134_v18, %v3133_v31  ;;  %v3236_v11 = vsel %vm409_vm0, %v3220_v2, 0.0 }
 0x9c5   : > { %v4455_v28 = vpop.eup %4454  ;;  %v3141_v38 = vrot.slane %v3140_v26, 2  ;;  %v3243_v5 = vsel %vm409_vm0, %v3221_v16, 0.0  ;;  %v3123_v46 = vadd.f32 %v3122_v60, %v3121_v45  ;;  %v3237_v15 = vrot.slane %v3236_v11, 4 }
 0x9c6   : > { %v4457_v30 = vpop.eup %4456  ;;  %v3201_v49 = vmul.f32 %v4455_v28, %v5884_v41  ;;  %v3147_v12 = vadd.f32 %v3146_v61, %v3145_v43  ;;  %v3250_v41 = vsel %vm409_vm0, %v3222_v22, 0.0  ;;  %v3136_v25 = vrot.slane %v3135_v62, 1 }
 0x9c7   : > { %v4459_v63 = vpop.eup %4458  ;;  %v3034_v14 = vmul.f32 1.442695, %v4457_v30  ;;  %v3130_v10 = vadd.f32 %v3129_v20, %v3128_v21  ;;  %v3142_v6 = vadd.f32 %v3141_v38, %v3140_v26  ;;  %v3174_v53 = vmax.f32 %v3116_v56, 1e-12 }
 0x9c8   : > { %v4461_v50 = vpop.eup %4460  ;;  %v3148_v7 = vrot.slane %v3147_v12, 2  ;;  %v3223_v32 = vmul.f32 %v5929_v55, %v3201_v49  ;;  %v5942_v0 = vmul.f32 %v4459_v63, %v6365_v33  ;;  %v3244_v29 = vrot.slane %v3243_v5, 4 }
 0x9c9   : > { %v4463_v47 = vpop.eup %4462  ;;  %v5945_v57 = vmul.f32 %v4461_v50, %v6365_v33  ;;  %4468 = vpow2.f32 %v3034_v14  ;;  %v3251_v31 = vrot.slane %v3250_v41, 4  ;;  %v3175_v28 = vmax.f32 %v3123_v46, 1e-12 }
 0x9ca   : > { %v3149_v48 = vadd.f32 %v3148_v7, %v3147_v12  ;;  %v3096_v45 = vsel %vm409_vm0, %v5942_v0, 0.0  ;;  %v3036_v44 = vmul.f32 1.442695, %v4463_v47  ;;  %v3257_v51 = vsel %vm409_vm0, %v3223_v32, 0.0 }
 0x9cb   : > { %v4465_v39 = vpop.eup %4464  ;;  %v3137_v43 = vadd.f32 %v3136_v25, %v3135_v62  ;;  %v3097_v2 = vrot.slane %v3096_v45, 4  ;;  %v3103_v21 = vsel %vm409_vm0, %v5945_v57, 0.0  ;;  %v3143_v18 = vrot.slane %v3142_v6, 1 }
 0x9cc   : > { %v4467_v60 = vpop.eup %4466  ;;  %v3176_v16 = vmax.f32 %v3130_v10, 1e-12  ;;  %4470 = vrcp.f32 %v3174_v53  ;;  %v3104_v33 = vrot.slane %v3103_v21, 4  ;;  %v3238_v26 = vadd.f32 %v3237_v15, %v3236_v11 }
 0x9cd   : > { %v3245_v61 = vadd.f32 %v3244_v29, %v3243_v5  ;;  %v3150_v30 = vrot.slane %v3149_v48, 1  ;;  %v3098_v49 = vadd.f32 %v3097_v2, %v3096_v45  ;;  %v3202_v22 = vmul.f32 %v4465_v39, %v5889_v27 }
 0x9ce   : > { %v3252_v63 = vadd.f32 %v3251_v31, %v3250_v41  ;;  %v3258_v56 = vrot.slane %v3257_v51, 4  ;;  %v3105_v20 = vadd.f32 %v3104_v33, %v3103_v21  ;;  %v3203_v62 = vmul.f32 %v4467_v60, %v5897_v42 }
 0x9cf   : > { %v3177_v38 = vmax.f32 %v3137_v43, 1e-12  ;;  %4472 = vrcp.f32 %v3175_v28  ;;  %v3099_v12 = vrot.slane %v3098_v49, 2  ;;  %v3144_v50 = vadd.f32 %v3143_v18, %v3142_v6 }
 0x9d0   : > { %4474 = vrcp.f32 %v3176_v16  ;;  %v3106_v14 = vrot.slane %v3105_v20, 2  ;;  %v3239_v46 = vrot.slane %v3238_v26, 2  ;;  %v3151_v7 = vadd.f32 %v3150_v30, %v3149_v48 }
 0x9d1   : > { %4476 = vpow2.f32 %v3036_v44  ;;  %v3100_v11 = vadd.f32 %v3099_v12, %v3098_v49  ;;  %v3224_v5 = vmul.f32 %v5929_v55, %v3202_v22  ;;  %v3246_v47 = vrot.slane %v3245_v61, 2 }
 0x9d2   : > { %v3253_v32 = vrot.slane %v3252_v63, 2  ;;  %v3107_v27 = vadd.f32 %v3106_v14, %v3105_v20  ;;  %v3225_v41 = vmul.f32 %v5929_v55, %v3203_v62  ;;  %v3259_v25 = vadd.f32 %v3258_v56, %v3257_v51  ;;  %v5960_v20 = vpop.permute.xlu0 %3216 }
 0x9d3   : > { %4478 = vrcp.f32 %v3177_v38  ;;  %v3101_v42 = vrot.slane %v3100_v11, 1  ;;  %v4469_v15 = vpop.eup %4468  ;;  %v3178_v10 = vmax.f32 %v3144_v50, 1e-12  ;;  %v3240_v6 = vadd.f32 %v3239_v46, %v3238_v26 }
 0x9d4   : > { %v3108_v53 = vrot.slane %v3107_v27, 1  ;;  %v3179_v29 = vmax.f32 %v3151_v7, 1e-12  ;;  %v3247_v44 = vadd.f32 %v3246_v47, %v3245_v61  ;;  %v3254_v28 = vadd.f32 %v3253_v32, %v3252_v63 }
 0x9d5   : > { %v3102_v45 = vadd.f32 %v3101_v42, %v3100_v11  ;;  %v3260_v43 = vrot.slane %v3259_v25, 2  ;;  %v3264_v2 = vsel %vm409_vm0, %v3224_v5, 0.0  ;;  %v3271_v21 = vsel %vm409_vm0, %v3225_v41, 0.0 }
 0x9d6   : > { %v4471_v31 = vpop.eup %4470  ;;  %v3109_v48 = vadd.f32 %v3108_v53, %v3107_v27  ;;  %4480 = vrcp.f32 %v3178_v10  ;;  %v3241_v16 = vrot.slane %v3240_v6, 1  ;;  %v3265_v26 = vrot.slane %v3264_v2, 4 }
 0x9d7   : > { %v3172_v39 = vmax.f32 %v3102_v45, 1e-12  ;;  %4482 = vrcp.f32 %v3179_v29  ;;  %v3206_v18 = vmul.f32 %v4471_v31, %v5907_v34  ;;  %v3272_v30 = vrot.slane %v3271_v21, 4 }
 0x9d8   : > { %v3173_v51 = vmax.f32 %v3109_v48, 1e-12  ;;  %v3248_v49 = vrot.slane %v3247_v44, 1  ;;  %v3255_v22 = vrot.slane %v3254_v28, 1  ;;  %v3261_v63 = vadd.f32 %v3260_v43, %v3259_v25 }
 0x9d9   : > { %v4473_v60 = vpop.eup %4472  ;;  %4484 = vrcp.f32 %v3172_v39  ;;  %v3228_v12 = vmul.f32 %v5960_v20, %v3206_v18  ;;  %v3242_v34 = vadd.f32 %v3241_v16, %v3240_v6  ;;  %v3266_v50 = vadd.f32 %v3265_v26, %v3264_v2 }
 0x9da   : > { %v4475_v33 = vpop.eup %4474  ;;  %v3207_v56 = vmul.f32 %v4473_v60, %v5892_v24  ;;  %4486 = vrcp.f32 %v3173_v51  ;;  %v3273_v14 = vadd.f32 %v3272_v30, %v3271_v21  ;;  %v3249_v46 = vadd.f32 %v3248_v49, %v3247_v44 }
 0x9db   : > { %v4477_v61 = vpop.eup %4476  ;;  %v3208_v38 = vmul.f32 %v4475_v33, %v5904_v52  ;;  %v3256_v7 = vadd.f32 %v3255_v22, %v3254_v28  ;;  %v3262_v11 = vrot.slane %v3261_v63, 1  ;;  %v5965_v5 = vmul.f32 %v4469_v15, %v5324_v1 }
 0x9dc   : > { %v3229_v24 = vmul.f32 %v5960_v20, %v3207_v56  ;;  %v5970_v32 = vmul.f32 %v4477_v61, %v5324_v1  ;;  %v3292_v27 = vsel %vm409_vm0, %v3228_v12, 0.0  ;;  %v5975_v41 = vmul.f32 %v3242_v34, %v5408_v36 }
 0x9dd   : > { %v4479_v62 = vpop.eup %4478  ;;  %v3230_v52 = vmul.f32 %v5960_v20, %v3208_v38  ;;  %v3152_v25 = vsel %vm409_vm0, %v5965_v5, 0.0  ;;  %v3267_v15 = vrot.slane %v3266_v50, 2  ;;  %v3274_v10 = vrot.slane %v3273_v14, 2 }
 0x9de   : > { %v3209_v47 = vmul.f32 %v4479_v62, %v5914_v13  ;;  %v3153_v53 = vrot.slane %v3152_v25, 4  ;;  %v3159_v13 = vsel %vm409_vm0, %v5970_v32, 0.0  ;;  %v5981_v1 = vadd.f32 %v3262_v11, %v3261_v63 }
 0x9df   : > { %v5984_v29 = vmul.f32 %v3249_v46, %v5408_v36  ;;  %v5987_v45 = vmul.f32 %v3256_v7, %v5408_v36  ;;  %v3160_v31 = vrot.slane %v3159_v13, 4  ;;  %v3293_v28 = vrot.slane %v3292_v27, 4 }
 0x9e0   : > { %v4481_v42 = vpop.eup %4480  ;;  %v3231_v48 = vmul.f32 %v5960_v20, %v3209_v47  ;;  %v3299_v39 = vsel %vm409_vm0, %v3229_v24, 0.0  ;;  %v3154_v43 = vadd.f32 %v3153_v53, %v3152_v25  ;;  %v3306_v21 = vsel %vm409_vm0, %v3230_v52, 0.0 }
 0x9e1   : > { %v4483_v6 = vpop.eup %4482  ;;  %v3210_v2 = vmul.f32 %v4481_v42, %v5919_v35  ;;  %v3161_v60 = vadd.f32 %v3160_v31, %v3159_v13  ;;  %v3268_v33 = vadd.f32 %v3267_v15, %v3266_v50  ;;  %v3275_v26 = vadd.f32 %v3274_v10, %v3273_v14 }
 0x9e2   : > { %v3211_v16 = vmul.f32 %v4483_v6, %v5922_v4  ;;  %v3155_v30 = vrot.slane %v3154_v43, 2  ;;  %v3300_v61 = vrot.slane %v3299_v39, 4  ;;  %v3294_v56 = vadd.f32 %v3293_v28, %v3292_v27 }
 0x9e3   : > { %v4485_v44 = vpop.eup %4484  ;;  %v3162_v63 = vrot.slane %v3161_v60, 2  ;;  %v3307_v62 = vrot.slane %v3306_v21, 4  ;;  %v3313_v35 = vsel %vm409_vm0, %v3231_v48, 0.0  ;;  %v3269_v14 = vrot.slane %v3268_v33, 1 }
 0x9e4   : > { %v3204_v51 = vmul.f32 %v4485_v44, %v5942_v0  ;;  %v4487_v18 = vpop.eup %4486  ;;  %v3156_v38 = vadd.f32 %v3155_v30, %v3154_v43  ;;  %v3232_v0 = vmul.f32 %v5960_v20, %v3210_v2  ;;  %v3233_v50 = vmul.f32 %v5960_v20, %v3211_v16 }
 0x9e5   : > { %v3205_v49 = vmul.f32 %v4487_v18, %v5945_v57  ;;  %v3163_v34 = vadd.f32 %v3162_v63, %v3161_v60  ;;  %v3301_v7 = vadd.f32 %v3300_v61, %v3299_v39  ;;  %v3276_v11 = vrot.slane %v3275_v26, 1 }
 0x9e6   : > { %v3226_v22 = vmul.f32 %v5929_v55, %v3204_v51  ;;  %v3157_v57 = vrot.slane %v3156_v38, 1  ;;  %v3295_v52 = vrot.slane %v3294_v56, 2  ;;  %v3308_v15 = vadd.f32 %v3307_v62, %v3306_v21 }
 0x9e7   : > { %v3227_v12 = vmul.f32 %v5929_v55, %v3205_v49  ;;  %v3164_v24 = vrot.slane %v3163_v34, 1  ;;  %v3314_v10 = vrot.slane %v3313_v35, 4  ;;  %v3320_v53 = vsel %vm409_vm0, %v3232_v0, 0.0 }
 0x9e8   : > { %v3278_v4 = vsel %vm409_vm0, %v3226_v22, 0.0  ;;  %v3158_v42 = vadd.f32 %v3157_v57, %v3156_v38  ;;  %v3327_v44 = vsel %vm409_vm0, %v3233_v50, 0.0  ;;  %v3302_v48 = vrot.slane %v3301_v7, 2 }
 0x9e9   : > { %v3279_v46 = vrot.slane %v3278_v4, 4  ;;  %v3285_v47 = vsel %vm409_vm0, %v3227_v12, 0.0  ;;  %v3165_v55 = vadd.f32 %v3164_v24, %v3163_v34  ;;  %v3270_v28 = vadd.f32 %v3269_v14, %v3268_v33 }
 0x9ea   : > { %v3286_v25 = vrot.slane %v3285_v47, 4  ;;  %v3180_v31 = vmax.f32 %v3158_v42, 1e-12  ;;  %v3277_v39 = vadd.f32 %v3276_v11, %v3275_v26  ;;  %v3321_v60 = vrot.slane %v3320_v53, 4 }
 0x9eb   : > { %v3280_v27 = vadd.f32 %v3279_v46, %v3278_v4  ;;  %v3181_v43 = vmax.f32 %v3165_v55, 1e-12  ;;  %v3296_v18 = vadd.f32 %v3295_v52, %v3294_v56  ;;  %v3315_v16 = vadd.f32 %v3314_v10, %v3313_v35 }
 0x9ec   : > { %v3287_v6 = vadd.f32 %v3286_v25, %v3285_v47  ;;  %4488 = vrcp.f32 %v3180_v31  ;;  %v3328_v21 = vrot.slane %v3327_v44, 4  ;;  %v3309_v30 = vrot.slane %v3308_v15, 2 }
 0x9ed   : > { %v3281_v13 = vrot.slane %v3280_v27, 2  ;;  %4490 = vrcp.f32 %v3181_v43  ;;  %v3351_v22 = vmul.f32 %v5981_v1, %v5408_v36  ;;  %v3303_v63 = vadd.f32 %v3302_v48, %v3301_v7 }
 0x9ee   : > { %v3288_v51 = vrot.slane %v3287_v6, 2  ;;  %v3352_v62 = vmul.f32 %v3270_v28, %v5408_v36  ;;  %v3380_v33 = vsel %vm615_vm1, %v5984_v29, %v5975_v41  ;;  %v3353_v56 = vmul.f32 %v3277_v39, %v5408_v36 }
 0x9ef   : > { %v3282_v2 = vadd.f32 %v3281_v13, %v3280_v27  ;;  %v3322_v35 = vadd.f32 %v3321_v60, %v3320_v53  ;;  %v3381_v0 = vsel %vm617_vm2, %v5987_v45, %v3380_v33  ;;  %v3297_v12 = vrot.slane %v3296_v18, 1 }
 0x9f0   : > { %v3289_v49 = vadd.f32 %v3288_v51, %v3287_v6  ;;  %v3316_v4 = vrot.slane %v3315_v16, 2  ;;  %v3329_v34 = vadd.f32 %v3328_v21, %v3327_v44  ;;  %v3382_v14 = vsel %vm619_vm3, %v3351_v22, %v3381_v0 }
 0x9f1   : > { %v3283_v61 = vrot.slane %v3282_v2, 1  ;;  %v3310_v46 = vadd.f32 %v3309_v30, %v3308_v15  ;;  %v3383_v57 = vsel %vm621_vm4, %v3352_v62, %v3382_v14  ;;  %v3304_v41 = vrot.slane %v3303_v63, 1 }
 0x9f2   : > { %v3290_v38 = vrot.slane %v3289_v49, 1  ;;  %v3384_v7 = vsel %vm623_vm5, %v3353_v56, %v3383_v57  ;;  %v3323_v11 = vrot.slane %v3322_v35, 2  ;;  %v3298_v45 = vadd.f32 %v3297_v12, %v3296_v18 }
 0x9f3   : > { %v3284_v26 = vadd.f32 %v3283_v61, %v3282_v2  ;;  %v3317_v24 = vadd.f32 %v3316_v4, %v3315_v16  ;;  %v3330_v52 = vrot.slane %v3329_v34, 2  ;;  %v3311_v42 = vrot.slane %v3310_v46, 1 }
 0x9f4   : > { %v3291_v50 = vadd.f32 %v3290_v38, %v3289_v49  ;;  %v3305_v55 = vadd.f32 %v3304_v41, %v3303_v63  ;;  %v3324_v53 = vadd.f32 %v3323_v11, %v3322_v35  ;;  %v3356_v44 = vmul.f32 %v3298_v45, %v5458_v58 }
 0x9f5   : > { %v3354_v1 = vmul.f32 %v3284_v26, %v5408_v36  ;;  %v3318_v6 = vrot.slane %v3317_v24, 1  ;;  %v3331_v31 = vadd.f32 %v3330_v52, %v3329_v34  ;;  %v3312_v28 = vadd.f32 %v3311_v42, %v3310_v46 }
 0x9f6   : > { %v3355_v29 = vmul.f32 %v3291_v50, %v5408_v36  ;;  %v4489_v27 = vpop.eup %4488  ;;  %v3357_v43 = vmul.f32 %v3305_v55, %v5458_v58  ;;  %v3325_v2 = vrot.slane %v3324_v53, 1 }
 0x9f7   : > { %v3385_v47 = vsel %vm625_vm6, %v3354_v1, %v3384_v7  ;;  %v4491_v10 = vpop.eup %4490  ;;  %v3212_v15 = vmul.f32 %v4489_v27, %v5965_v5  ;;  %v3319_v60 = vadd.f32 %v3318_v6, %v3317_v24  ;;  %v3358_v30 = vmul.f32 %v3312_v28, %v5458_v58 }
 0x9f8   : > { %v3386_v25 = vsel %vm627_vm7, %v3355_v29, %v3385_v47  ;;  %v3213_v36 = vmul.f32 %v4491_v10, %v5970_v32  ;;  %v3332_v32 = vrot.slane %v3331_v31, 1  ;;  %v3387_v16 = vsel %vm615_vm1, %v3357_v43, %v3356_v44 }
 0x9f9   : > { %3394 = vrot.lane.b32.xlu1 %v3386_v25, %s4570_s19  ;;  %v3234_v13 = vmul.f32 %v5960_v20, %v3212_v15  ;;  %v3326_v49 = vadd.f32 %v3325_v2, %v3324_v53  ;;  %v3388_v22 = vsel %vm617_vm2, %v3358_v30, %v3387_v16  ;;  %v3359_v33 = vmul.f32 %v3319_v60, %v5458_v58 }
 0x9fa   : > { %v3235_v48 = vmul.f32 %v5960_v20, %v3213_v36  ;;  %v3333_v63 = vadd.f32 %v3332_v32, %v3331_v31 }
 0x9fb   : > { %v3334_v39 = vsel %vm409_vm0, %v3234_v13, 0.0  ;;  %v3389_v56 = vsel %vm619_vm3, %v3359_v33, %v3388_v22  ;;  %v3360_v0 = vmul.f32 %v3326_v49, %v5458_v58 }
 0x9fc   : > { %v3335_v51 = vrot.slane %v3334_v39, 4  ;;  %v3341_v5 = vsel %vm409_vm0, %v3235_v48, 0.0  ;;  %v3361_v4 = vmul.f32 %v3333_v63, %v5458_v58 }
 0x9fd   : > { %v3342_v18 = vrot.slane %v3341_v5, 4  ;;  %v3390_v50 = vsel %vm621_vm4, %v3360_v0, %v3389_v56 }
 0x9fe   : > { %v3336_v21 = vadd.f32 %v3335_v51, %v3334_v39  ;;  %v3391_v57 = vsel %vm623_vm5, %v3361_v4, %v3390_v50 }
 0x9ff   : > { %v3343_v61 = vadd.f32 %v3342_v18, %v3341_v5 }
 0xa00   : > { %v3337_v20 = vrot.slane %v3336_v21, 2 }
 0xa01   : > { %v3344_v62 = vrot.slane %v3343_v61, 2 }
 0xa02   : > { %v3338_v26 = vadd.f32 %v3337_v20, %v3336_v21 }
 0xa03   : > { %v3345_v38 = vadd.f32 %v3344_v62, %v3343_v61 }
 0xa04   : > { %v3339_v35 = vrot.slane %v3338_v26, 1 }
 0xa05   : > { %v3346_v12 = vrot.slane %v3345_v38, 1 }
 0xa06   : > { %v3340_v34 = vadd.f32 %v3339_v35, %v3338_v26 }
 0xa07   : > { %v3347_v1 = vadd.f32 %v3346_v12, %v3345_v38 }
 0xa08   : > { %v3362_v14 = vmul.f32 %v3340_v34, %v5458_v58 }
 0xa09   : > { %v3363_v46 = vmul.f32 %v3347_v1, %v5458_v58 }
 0xa0a   : > { %v3392_v41 = vsel %vm625_vm6, %v3362_v14, %v3391_v57 }
 0xa0b   : > { %v3393_v29 = vsel %vm627_vm7, %v3363_v46, %v3392_v41 }
 0xa0c   : > { %3396 = vrot.lane.b32.xlu1 %v3393_v29, %s4570_s19 }
 0xa6b   : > { %v3395_v7 = vpop.permute.xlu1 %3394 }
 0xa6c   : > { %v3400_v11 = vadd.f32 %v3395_v7, %v5638_v54 }
 0xa6e   : > { %3404 = vrot.lane.b32.xlu0 %v3400_v11, %s4570_s19 }
 0xa7e   : > { %v3397_v47 = vpop.permute.xlu1 %3396 }
 0xa7f   : > { %v3401_v45 = vadd.f32 %v3397_v47, %v5646_v40 }
 0xa81   : > { %3406 = vrot.lane.b32.xlu1 %v3401_v45, %s4570_s19 }
 0xae0   : > { %v3405_v24 = vpop.permute.xlu0 %3404 }
 0xae1   : > { %v3410_v58 = vsel %vm409_vm0, %v3405_v24, 0.0 }
 0xae2   : > { %3411 = vadd.xlane.f32.xlu0 %v3410_v58 }
 0xaf3   : > { %v3407_v52 = vpop.permute.xlu1 %3406 }
 0xaf4   : > { %v3413_v27 = vsel %vm409_vm0, %v3407_v52, 0.0 }
 0xaf5   : > { %3414 = vadd.xlane.f32.xlu1 %v3413_v27 }
 0xb6f   : > { %v3412_v25 = vpop.xlane.xlu0 %3411 }
 0xb70   : > { %v3416_v42 = vmul.f32 0.03125, %v3412_v25 }
 0xb72   : > { %v3418_v10 = vsub.f32 %v3400_v11, %v3416_v42 }
 0xb74   : > { %v3420_v15 = vmul.f32 %v3418_v10, %v3418_v10 }
 0xb76   : > { %3424 = vrot.lane.b32.xlu0 %v3420_v15, %s4570_s19  ;;  %v6366_v15 = vld [vmem:[#allocation27_spill] sm:$0xff] }
 0xb82   : > { %v3415_v54 = vpop.xlane.xlu1 %3414 }
 0xb83   : > { %v3417_v55 = vmul.f32 0.03125, %v3415_v54 }
 0xb85   : > { %v3419_v36 = vsub.f32 %v3401_v45, %v3417_v55  ;;  %v6367_v55 = vld [vmem:[#allocation26_spill] sm:$0xff] }
 0xb87   : > { %v3421_v40 = vmul.f32 %v3419_v36, %v3419_v36 }
 0xb89   : > { %3426 = vrot.lane.b32.xlu1 %v3421_v40, %s4570_s19 }
 0xbe8   : > { %v3425_v53 = vpop.permute.xlu0 %3424 }
 0xbe9   : > { %v3430_v13 = vsel %vm409_vm0, %v3425_v53, 0.0 }
 0xbea   : > { %3431 = vadd.xlane.f32.xlu0 %v3430_v13  ;;  %v6368_v13 = vld [vmem:[#allocation28_spill] sm:$0xff] }
 0xbfb   : > { %v3427_v6 = vpop.permute.xlu1 %3426 }
 0xbfc   : > { %v3433_v31 = vsel %vm409_vm0, %v3427_v6, 0.0 }
 0xbfd   : > { %3434 = vadd.xlane.f32.xlu1 %v3433_v31 }
 0xc77   : > { %v3432_v44 = vpop.xlane.xlu0 %3431 }
 0xc78   : > { %v3436_v48 = vmul.f32 0.03125, %v3432_v44 }
 0xc7a   : > { %v3438_v28 = vadd.f32 1e-05, %v3436_v48  ;;  %v6369_v48 = vld [vmem:[#allocation29_spill] sm:$0xff] }
 0xc7c   : > { %4492 = vrsqrt.f32 %v3438_v28 }
 0xc86   : > { %v4493_v39 = vpop.eup %4492 }
 0xc87   : > { %v3442_v43 = vmul.f32 %v4493_v39, %v3418_v10 }
 0xc89   : > { %3460 = vrot.lane.b32.xlu0 %v3442_v43, %s4570_s19  ;;  %v3448_v2 = vrot.slane %v3442_v43, 3  ;;  %v3446_v51 = vrot.slane %v3442_v43, 1  ;;  %v3447_v18 = vrot.slane %v3442_v43, 2  ;;  %v3449_v61 = vrot.slane %v3442_v43, 4 }
 0xc8a   : > { %v3435_v5 = vpop.xlane.xlu1 %3434  ;;  %v3450_v20 = vrot.slane %v3442_v43, 5  ;;  %v3451_v63 = vrot.slane %v3442_v43, 6  ;;  %v3452_v33 = vrot.slane %v3442_v43, 7 }
 0xc8b   : > { %3466 = vrot.lane.b32.xlu1 %v3448_v2, %s4570_s19  ;;  %v3437_v60 = vmul.f32 0.03125, %v3435_v5 }
 0xc8d   : > { %3462 = vrot.lane.b32.xlu0 %v3446_v51, %s4570_s19  ;;  %v3439_v32 = vadd.f32 1e-05, %v3437_v60  ;;  %v6370_v51 = vld [vmem:[#allocation30_spill] sm:$0xff] }
 0xc8f   : > { %4494 = vrsqrt.f32 %v3439_v32 }
 0xc91   : > { %3464 = vrot.lane.b32.xlu0 %v3447_v18, %s4570_s19 }
 0xc99   : > { %v4495_v16 = vpop.eup %4494 }
 0xc9a   : > { %v3443_v21 = vmul.f32 %v4495_v16, %v3419_v36 }
 0xc9c   : > { %v3453_v30 = vrot.slane %v3443_v21, 1  ;;  %3476 = vrot.lane.b32.xlu0 %v3443_v21, %s4570_s19  ;;  %v3454_v49 = vrot.slane %v3443_v21, 2  ;;  %v3455_v22 = vrot.slane %v3443_v21, 3  ;;  %v3456_v62 = vrot.slane %v3443_v21, 4 }
 0xc9d   : > { %v3457_v26 = vrot.slane %v3443_v21, 5  ;;  %v3458_v38 = vrot.slane %v3443_v21, 6  ;;  %v3459_v56 = vrot.slane %v3443_v21, 7 }
 0xc9e   : > { %3478 = vrot.lane.b32.xlu1 %v3453_v30, %s4570_s19 }
 0xca0   : > { %3468 = vrot.lane.b32.xlu0 %v3449_v61, %s4570_s19 }
 0xca2   : > { %3480 = vrot.lane.b32.xlu1 %v3454_v49, %s4570_s19 }
 0xca4   : > { %3470 = vrot.lane.b32.xlu0 %v3450_v20, %s4570_s19  ;;  %v6371_v20 = vld [vmem:[#allocation5_spill] sm:$0xff] }
 0xca6   : > { %3482 = vrot.lane.b32.xlu1 %v3455_v22, %s4570_s19 }
 0xca8   : > { %3472 = vrot.lane.b32.xlu0 %v3451_v63, %s4570_s19 }
 0xcaa   : > { %3484 = vrot.lane.b32.xlu1 %v3456_v62, %s4570_s19 }
 0xcac   : > { %3474 = vrot.lane.b32.xlu0 %v3452_v33, %s4570_s19 }
 0xcae   : > { %3486 = vrot.lane.b32.xlu1 %v3457_v26, %s4570_s19 }
 0xcb2   : > { %3488 = vrot.lane.b32.xlu1 %v3458_v38, %s4570_s19 }
 0xcb6   : > { %3490 = vrot.lane.b32.xlu1 %v3459_v56, %s4570_s19  ;;  %s347_s19 = sand.u32 1, %s4554_s28  }
 0xcb7   : > { %s3912_s23 = sshll.u32 %s347_s19, 4  ;;  %s6213_s20 = scalar_lea.sflag [#allocation3], %s347_s19 }
 0xcb8   : > { %s349_s24 = scalar_lea.vmem [#allocation2], %s3912_s23 }
 0xcb9   : > { %s3813_s25 = sshll.u32 %s349_s24, 4  ;;  %s6206_s25 = int_to_ptr.vmem [resolvable:$true] %s3813_s25 }
 0xcba   : > { %s4500_s26 = scalar_lea.vmem %s6206_s25, 256  ;;  %p4507_p0 = scmp.lt.s32.totalorder %s6206_s25, %s4505_s18 }
 0xcbb   : > { %p4501_p11 = scmp.ne.s32.totalorder %s6206_s25, %s4500_s26  ;;  %p4508_p1 = scmp.lt.s32.totalorder %s4506_s21, %s4500_s26 }
 0xcbd   : > { %p4502_p12 = pnand %p4501_p11, %p4657_p5  ;;  %p4509_p2 = por %p4508_p1, %p4507_p0 }
 0xcbf   : > { %p4503_p13 = pneg %p4502_p12 }
 0xcc1   : > { %p4510_p3 = pnand %p4509_p2, %p4503_p13 }
 0xcfb   : > { %v3461_v35 = vpop.permute.xlu0 %3460 }
 0xcfc   : > { %v3508_v47 = vadd.f32 %v3461_v35, %v5537_v59 }
 0xcfd   : > { %v3467_v4 = vpop.permute.xlu1 %3466 }
 0xcfe   : > { %v3511_v57 = vadd.f32 %v3467_v4, %v5544_v8  ;;  %v6088_v27 = vmax.f32 %v3508_v47, 0.0 }
 0xcff   : > { %v3463_v0 = vpop.permute.xlu0 %3462 }
 0xd00   : > { %v3509_v50 = vadd.f32 %v3463_v0, %v5527_v19  ;;  %v6080_v58 = vmax.f32 %v3511_v57, 0.0 }
 0xd02   : > { %v6073_v41 = vmax.f32 %v3509_v50, 0.0  ;;  %v3543_v42 = vmul.f32 %v6080_v58, %v6080_v58 }
 0xd03   : > { %v3465_v12 = vpop.permute.xlu0 %3464 }
 0xd04   : > { %v3510_v14 = vadd.f32 %v3465_v12, %v5531_v23  ;;  %v3541_v19 = vmul.f32 %v6073_v41, %v6073_v41  ;;  %v3576_v60 = vrot.slane %v3543_v42, 5 }
 0xd06   : > { %v6075_v7 = vmax.f32 %v3510_v14, 0.0  ;;  %v3572_v10 = vrot.slane %v3541_v19, 7  ;;  %v6372_v14 = vld [vmem:[#allocation6_spill] sm:$0xff] }
 0xd08   : > { %v3542_v8 = vmul.f32 %v6075_v7, %v6075_v7 }
 0xd0a   : > { %v3574_v53 = vrot.slane %v3542_v8, 6 }
 0xd0e   : > { %v3477_v34 = vpop.permute.xlu0 %3476 }
 0xd0f   : > { %v3516_v36 = vadd.f32 %v3477_v34, %v6367_v55 }
 0xd10   : > { %v3479_v1 = vpop.permute.xlu1 %3478 }
 0xd11   : > { %v6116_v16 = vmax.f32 %v3516_v36, 0.0 }
 0xd12   : > { %v3469_v46 = vpop.permute.xlu0 %3468 }
 0xd13   : > { %v3512_v11 = vadd.f32 %v3469_v46, %v5554_v3  ;;  %v3517_v3 = vadd.f32 %v3479_v1, %v5520_v17  ;;  %v3548_v0 = vmul.f32 %v6116_v16, %v6116_v16 }
 0xd14   : > { %v3481_v29 = vpop.permute.xlu1 %3480 }
 0xd15   : > { %v6086_v52 = vmax.f32 %v3512_v11, 0.0  ;;  %v3518_v54 = vadd.f32 %v3481_v29, %v6366_v15  ;;  %v6105_v44 = vmax.f32 %v3517_v3, 0.0 }
 0xd16   : > { %v3471_v45 = vpop.permute.xlu0 %3470 }
 0xd17   : > { %v3513_v24 = vadd.f32 %v3471_v45, %v5556_v37  ;;  %v3544_v17 = vmul.f32 %v6086_v52, %v6086_v52  ;;  %v6114_v18 = vmax.f32 %v3518_v54, 0.0  ;;  %v3549_v63 = vmul.f32 %v6105_v44, %v6105_v44 }
 0xd18   : > { %v3483_v23 = vpop.permute.xlu1 %3482 }
 0xd19   : > { %v6091_v25 = vmax.f32 %v3513_v24, 0.0  ;;  %v3519_v6 = vadd.f32 %v3483_v23, %v6368_v13  ;;  %v3578_v49 = vrot.slane %v3544_v17, 4  ;;  %v3550_v35 = vmul.f32 %v6114_v18, %v6114_v18 }
 0xd1a   : > { %v3473_v59 = vpop.permute.xlu0 %3472  ;;  %v3586_v57 = vrot.slane %v3549_v63, 7 }
 0xd1b   : > { %v3514_v37 = vadd.f32 %v3473_v59, %v5567_v9  ;;  %v3540_v9 = vmul.f32 %v6088_v27, %v6088_v27  ;;  %v3545_v39 = vmul.f32 %v6091_v25, %v6091_v25  ;;  %v6119_v61 = vmax.f32 %v3519_v6, 0.0 }
 0xd1c   : > { %v3485_v40 = vpop.permute.xlu1 %3484  ;;  %v3588_v23 = vrot.slane %v3550_v35, 6  ;;  %v3587_v8 = vsel %vm615_vm1, %v3586_v57, %v3548_v0 }
 0xd1d   : > { %v6101_v31 = vmax.f32 %v3514_v37, 0.0  ;;  %v3520_v28 = vadd.f32 %v3485_v40, %v6369_v48  ;;  %v3573_v32 = vsel %vm615_vm1, %v3572_v10, %v3540_v9  ;;  %v3580_v33 = vrot.slane %v3545_v39, 3  ;;  %v6373_v10 = vld [vmem:[#allocation7_spill] sm:$0xff] }
 0xd1e   : > { %v3475_v43 = vpop.permute.xlu0 %3474  ;;  %v3575_v30 = vsel %vm617_vm2, %v3574_v53, %v3573_v32  ;;  %v3551_v50 = vmul.f32 %v6119_v61, %v6119_v61  ;;  %v3589_v53 = vsel %vm617_vm2, %v3588_v23, %v3587_v8 }
 0xd1f   : > { %v3546_v2 = vmul.f32 %v6101_v31, %v6101_v31  ;;  %v3515_v5 = vadd.f32 %v3475_v43, %v6370_v51  ;;  %v6124_v62 = vmax.f32 %v3520_v28, 0.0  ;;  %v3577_v12 = vsel %vm619_vm3, %v3576_v60, %v3575_v30  ;;  %v4166_v51 = vld [vmem:[%s6261_s7] sm:$0xff]  }
 0xd20   : > { %v3487_v21 = vpop.permute.xlu1 %3486  ;;  %v3579_v1 = vsel %vm621_vm4, %v3578_v49, %v3577_v12  ;;  %v3590_v37 = vrot.slane %v3551_v50, 5  ;;  %4095 = vmatpush3.bf16.msra.mxu1 %v4166_v51  ;;  %v6374_v60 = vmov 0.0  }
 0xd21   : > { %v3521_v22 = vadd.f32 %v3487_v21, %v6371_v20  ;;  %v6126_v26 = vmax.f32 %v3515_v5, 0.0  ;;  %v3582_v56 = vrot.slane %v3546_v2, 2  ;;  %v3552_v29 = vmul.f32 %v6124_v62, %v6124_v62  ;;  %v4167_v5 = vld [vmem:[%s6261_s7 + $0x8] sm:$0xff]   ;;  %4096 = vmatprep.subr.bf16.mxu1 %v6374_v60 }
 0xd22   : > { %v3581_v47 = vsel %vm623_vm5, %v3580_v33, %v3579_v1  ;;  %v3591_v6 = vsel %vm619_vm3, %v3590_v37, %v3589_v53 }
 0xd23   : > { %v6128_v38 = vmax.f32 %v3521_v22, 0.0  ;;  %v3547_v34 = vmul.f32 %v6126_v26, %v6126_v26  ;;  %v3583_v19 = vsel %vm625_vm6, %v3582_v56, %v3581_v47  ;;  %v3592_v55 = vrot.slane %v3552_v29, 4 }
 0xd24   : > { %v3489_v4 = vpop.permute.xlu1 %3488  ;;  %4097 = vmatpush3.bf16.msra.mxu1 %v4167_v5 }
 0xd25   : > { %v3522_v46 = vadd.f32 %v3489_v4, %v6372_v14  ;;  %v3584_v11 = vrot.slane %v3547_v34, 1  ;;  %v3553_v45 = vmul.f32 %v6128_v38, %v6128_v38  ;;  %v3593_v9 = vsel %vm621_vm4, %v3592_v55, %v3591_v6 }
 0xd27   : > { %v6146_v24 = vmax.f32 %v3522_v46, 0.0  ;;  %v3585_v59 = vsel %vm627_vm7, %v3584_v11, %v3583_v19  ;;  %v3594_v36 = vrot.slane %v3553_v45, 3 }
 0xd28   : > { %v3491_v3 = vpop.permute.xlu1 %3490  ;;  %v3602_v54 = vsel %vm409_vm0, %v3585_v59, 0.0 }
 0xd29   : > { %v3554_v42 = vmul.f32 %v6146_v24, %v6146_v24  ;;  %v3523_v15 = vadd.f32 %v3491_v3, %v6373_v10  ;;  %3603 = vadd.xlane.f32.xlu0 %v3602_v54  ;;  %v3595_v28 = vsel %vm623_vm5, %v3594_v36, %v3593_v9 }
 0xd2b   : > { %v6155_v40 = vmax.f32 %v3523_v15, 0.0  ;;  %v3596_v13 = vrot.slane %v3554_v42, 2 }
 0xd2d   : > { %v3555_v17 = vmul.f32 %v6155_v40, %v6155_v40  ;;  %v3597_v39 = vsel %vm625_vm6, %v3596_v13, %v3595_v28 }
 0xd2f   : > { %v3598_v48 = vrot.slane %v3555_v17, 1 }
 0xd31   : > { %v3599_v43 = vsel %vm627_vm7, %v3598_v48, %v3597_v39 }
 0xd32   : > { %v3605_v2 = vsel %vm409_vm0, %v3599_v43, 0.0 }
 0xd33   : > { %3606 = vadd.xlane.f32.xlu1 %v3605_v2 }
 0xdb6   : > { %v3604_v32 = vpop.xlane.xlu0 %3603 }
 0xdb7   : > { %v3608_v21 = vmax.f32 %v3604_v32, 1e-24 }
 0xdb9   : > { %4496 = vrsqrt.f32 %v3608_v21 }
 0xdc0   : > { %v3607_v30 = vpop.xlane.xlu1 %3606 }
 0xdc1   : > { %v3609_v49 = vmax.f32 %v3607_v30, 1e-24 }
 0xdc3   : > { %4498 = vrsqrt.f32 %v3609_v49  ;;  %v4497_v20 = vpop.eup %4496 }
 0xdc4   : > { %v3614_v22 = vrot.slane %v4497_v20, 1  ;;  %v3615_v63 = vrot.slane %v4497_v20, 2  ;;  %v3616_v33 = vrot.slane %v4497_v20, 3  ;;  %v3617_v56 = vrot.slane %v4497_v20, 4 }
 0xdc5   : > { %v3618_v35 = vrot.slane %v4497_v20, 5  ;;  %v3619_v0 = vrot.slane %v4497_v20, 6  ;;  %v3620_v12 = vrot.slane %v4497_v20, 7  ;;  %v3644_v14 = vmul.f32 %v4497_v20, %v6088_v27 }
 0xdc6   : > { %v3645_v4 = vmul.f32 %v3614_v22, %v6073_v41  ;;  %v3646_v34 = vmul.f32 %v3615_v63, %v6075_v7  ;;  %v3647_v50 = vmul.f32 %v3616_v33, %v6080_v58  ;;  %v3648_v1 = vmul.f32 %v3617_v56, %v6086_v52 }
 0xdc7   : > { %v3649_v46 = vmul.f32 %v3618_v35, %v6091_v25  ;;  %v3650_v57 = vmul.f32 %v3619_v0, %v6101_v31  ;;  %v3651_v29 = vmul.f32 %v3620_v12, %v6126_v26  ;;  %v3660_v8 = vpack.c.bf16 %v3644_v14, %v3644_v14 }
 0xdc8   : > { %v3661_v11 = vpack.c.bf16 %v3645_v4, %v3645_v4  ;;  %v3662_v47 = vpack.c.bf16 %v3646_v34, %v3646_v34  ;;  %v3663_v45 = vpack.c.bf16 %v3647_v50, %v3647_v50  ;;  %v3664_v19 = vpack.c.bf16 %v3648_v1, %v3648_v1 }
 0xdc9   : > { %v3665_v7 = vpack.c.bf16 %v3649_v46, %v3649_v46  ;;  %v3666_v3 = vpack.c.bf16 %v3650_v57, %v3650_v57  ;;  %v3667_v58 = vpack.c.bf16 %v3651_v29, %v3651_v29  ;;  %v3696_v60 = vunpack.c.l.b16 %v3660_v8 }
 0xdca   : > { %v3697_v23 = vunpack.c.l.b16 %v3661_v11  ;;  %v3698_v41 = vunpack.c.l.b16 %v3662_v47  ;;  %v3699_v52 = vunpack.c.l.b16 %v3663_v45  ;;  %v3700_v37 = vunpack.c.l.b16 %v3664_v19 }
 0xdcb   : > { %v3702_v32 = vunpack.c.l.b16 %v3666_v3  ;;  %v3703_v12 = vunpack.c.l.b16 %v3667_v58 }
 0xdcc   : > { %v3712_v27 = vrot.slane %v3697_v23, 7  ;;  %v3714_v42 = vrot.slane %v3698_v41, 6  ;;  %v3716_v30 = vrot.slane %v3699_v52, 5 }
 0xdcd   : > { %v4499_v59 = vpop.eup %4498  ;;  %v3722_v57 = vrot.slane %v3702_v32, 2  ;;  %v3724_v8 = vrot.slane %v3703_v12, 1 }
 0xdce   : > { %v3621_v25 = vrot.slane %v4499_v59, 1  ;;  %v3622_v10 = vrot.slane %v4499_v59, 2  ;;  %v3623_v31 = vrot.slane %v4499_v59, 3  ;;  %v3624_v15 = vrot.slane %v4499_v59, 4 }
 0xdcf   : > { %v3625_v26 = vrot.slane %v4499_v59, 5  ;;  %v3626_v54 = vrot.slane %v4499_v59, 6  ;;  %v3627_v55 = vrot.slane %v4499_v59, 7  ;;  %v3652_v36 = vmul.f32 %v4499_v59, %v6116_v16 }
 0xdd0   : > { %v3653_v53 = vmul.f32 %v3621_v25, %v6105_v44  ;;  %v3654_v13 = vmul.f32 %v3622_v10, %v6114_v18  ;;  %v3655_v6 = vmul.f32 %v3623_v31, %v6119_v61  ;;  %v3656_v17 = vmul.f32 %v3624_v15, %v6124_v62 }
 0xdd1   : > { %v3657_v9 = vmul.f32 %v3625_v26, %v6128_v38  ;;  %v3658_v48 = vmul.f32 %v3626_v54, %v6146_v24  ;;  %v3659_v28 = vmul.f32 %v3627_v55, %v6155_v40  ;;  %v3668_v39 = vpack.c.bf16 %v3652_v36, %v3652_v36 }
 0xdd2   : > { %v3669_v43 = vpack.c.bf16 %v3653_v53, %v3653_v53  ;;  %v3670_v2 = vpack.c.bf16 %v3654_v13, %v3654_v13  ;;  %v3671_v51 = vpack.c.bf16 %v3655_v6, %v3655_v6  ;;  %v3672_v5 = vpack.c.bf16 %v3656_v17, %v3656_v17 }
 0xdd3   : > { %v3673_v16 = vpack.c.bf16 %v3657_v9, %v3657_v9  ;;  %v3701_v44 = vunpack.c.l.b16 %v3665_v7  ;;  %v3674_v18 = vpack.c.bf16 %v3658_v48, %v3658_v48  ;;  %v3675_v62 = vpack.c.bf16 %v3659_v28, %v3659_v28 }
 0xdd4   : > { %v3705_v21 = vunpack.c.l.b16 %v3669_v43  ;;  %v3706_v61 = vunpack.c.l.b16 %v3670_v2  ;;  %v3707_v49 = vunpack.c.l.b16 %v3671_v51  ;;  %v3713_v38 = vsel %vm615_vm1, %v3712_v27, %v3696_v60 }
 0xdd5   : > { %v3718_v24 = vrot.slane %v3700_v37, 4  ;;  %v3704_v20 = vunpack.c.l.b16 %v3668_v39  ;;  %v3708_v40 = vunpack.c.l.b16 %v3672_v5  ;;  %v3709_v22 = vunpack.c.l.b16 %v3673_v16 }
 0xdd6   : > { %v3715_v63 = vsel %vm617_vm2, %v3714_v42, %v3713_v38  ;;  %v3720_v56 = vrot.slane %v3701_v44, 3  ;;  %v3726_v35 = vrot.slane %v3705_v21, 7  ;;  %v3728_v0 = vrot.slane %v3706_v61, 6 }
 0xdd7   : > { %v3717_v33 = vsel %vm619_vm3, %v3716_v30, %v3715_v63  ;;  %v3710_v4 = vunpack.c.l.b16 %v3674_v18  ;;  %v3711_v50 = vunpack.c.l.b16 %v3675_v62  ;;  %v3730_v46 = vrot.slane %v3707_v49, 5 }
 0xdd8   : > { %v3719_v34 = vsel %vm621_vm4, %v3718_v24, %v3717_v33  ;;  %v3727_v14 = vsel %vm615_vm1, %v3726_v35, %v3704_v20  ;;  %v3732_v11 = vrot.slane %v3708_v40, 4  ;;  %v3734_v45 = vrot.slane %v3709_v22, 3 }
 0xdd9   : > { %v3721_v1 = vsel %vm623_vm5, %v3720_v56, %v3719_v34  ;;  %v3729_v29 = vsel %vm617_vm2, %v3728_v0, %v3727_v14  ;;  %v3736_v41 = vrot.slane %v3710_v4, 2  ;;  %v3738_v3 = vrot.slane %v3711_v50, 1 }
 0xdda   : > { %v3731_v47 = vsel %vm619_vm3, %v3730_v46, %v3729_v29  ;;  %v3723_v19 = vsel %vm625_vm6, %v3722_v57, %v3721_v1 }
 0xddb   : > { %v3733_v23 = vsel %vm621_vm4, %v3732_v11, %v3731_v47  ;;  %v3725_v59 = vsel %vm627_vm7, %v3724_v8, %v3723_v19 }
 0xddc   : > { %v3735_v7 = vsel %vm623_vm5, %v3734_v45, %v3733_v23 }
 0xddd   : > { %v3737_v58 = vsel %vm625_vm6, %v3736_v41, %v3735_v7 }
 0xdde   : > { %v3739_v52 = vsel %vm627_vm7, %v3738_v3, %v3737_v58 }
 0xddf   : > { %v3740_v37 = vpack.c.b16 %v3739_v52, %v3725_v59 }
 0xde1   : > { %4099 = vmatmul.mubr.msk.bf16.vlgmr.msra.gmra.mrb[24].mxu1 %vm409_vm0, %v3740_v37 }
 0xeb4   : > { %v3790_v27 = vpop.f32.mrb[24].mxu1 }
 0xeb5   : > { %3797 = vst [vmem:[%s349_s24] sm:$0xff] %v3790_v27  ;;  %v4100_v42 = vpop.f32.mrb[25].mxu1 }
 0xeb6   : > { %v3793_v25 = vpop.f32.mrb[26].mxu1 }
 0xeb7   : > { %3798 = vst [vmem:[%s349_s24 + $0x8] sm:$0xff] %v3793_v25  ;;  %v4101_v10 = vpop.f32.mrb[27].mxu1 }
 0xeb8   : > { %4513 = shalt.err (!%p4510_p3)
}
 0xeb9   : > { %s4514_s22 = scalar_lea.hbm %s6211_s17, 256  ;;  %s4518_s24 = scalar_lea.hbm %s6262_s8, 512 }
 0xeba   : > { %p4515_p4 = scmp.ne.s32.totalorder %s6211_s17, %s4514_s22  ;;  %p4519_p9 = scmp.lt.u32.totalorder %s6211_s17, %s6262_s8 }
 0xebb   : > { %p4520_p10 = scmp.lt.u32.totalorder %s4518_s24, %s4514_s22  ;;  %p4522_p12 = scmp.lt.u32.totalorder %s4514_s22, %s6211_s17 }
 0xebc   : > { %p4516_p7 = pnand %p4515_p4, %p4657_p5 }
 0xebd   : > { %p4521_p11 = por %p4520_p10, %p4519_p9 }
 0xebe   : > { %p4517_p8 = pneg %p4516_p7 }
 0xebf   : > { %p4523_p13 = por %p4522_p12, %p4521_p11 }
 0xec1   : > { %p4524_p0 = pnand %p4523_p13, %p4517_p8 }
 0xec3   : > { %4527 = shalt.err (!%p4524_p0)
}
 0xec4   : > { %s4572_s13 = smov 128   ;;  %s4573_s26 = smov 8  }
 0xec5   : > { %4106 = dma.vmem_to_hbm [thread:$0]  (%p4657_p5), %s6206_s25, 256, %s6211_s17, %s6213_s20, %s4572_s13, %s4572_s13, %s4573_s26  }
 0xec6 PF: > { %p4112_p1 = scmp.ge.s32.totalorder %s4562_s30, 2  ;;  %s3828_s9 = sand.u32 1, %s4550_s27  }
 0xec7   : > { %s3829_s18 = scalar_lea.sflag [#allocation3], %s3828_s9 }
 0xec8   : > { %p4109_p2 = pnand %p4112_p1, %p4661_p6 }
 0xeca   : > { %4545 = dma.done.wait (!%p4109_p2), %s3829_s18, 256  }
 0xecb   : > { %4547 = vsyncadd (!%p4109_p2), %s3829_s18, 4294967040  ;;  %p18_p3 = scmp.ge.s32.totalorder %s4644_s11, 4   ;;  %s6375_s27 = smov %s4554_s28 }
 0xecc   : > { %s6376_s28 = smov %s4558_s29  ;;  %s6377_s29 = smov %s4655_s14 }
 0xecd   : > { %s6378_s30 = smov %s4644_s11  ;;  %20 = sbr.rel (!%p18_p3) target bundleno = 3 (0x3), region = 98 }
 0xed4   :  { %3834 = vsyncpa [#allocation3], 1 }
 0xed5   :  { %3836 = vsyncpa [#allocation3 + $0x1], 1 }

</bundles_post_ra>
